<compile_context>
chip_gen: v7x
topology: tpu7x:2x2x1
jax: 0.10.0
libtpu: 0.0.40
codegen_flags: <defaults>
</compile_context>

<pallas_src>
import functools

import jax
import jax.numpy as jnp
from jax.experimental import pallas as pl
from jax.experimental.pallas import tpu as pltpu

# ----------------------------------------------------------------------------
# Synthetic config (mirrors configer.get(...) values, scaled down)
# ----------------------------------------------------------------------------
NUM_CLASSES = 8                      # configer('data', 'num_classes')
NUM_PROTOTYPE = 4                    # configer('protoseg', 'num_prototype')
BACKBONE_CH = (8, 16, 32, 64)        # HRNet-W48 would be (48, 96, 192, 384)
IN_CHANNELS = sum(BACKBONE_CH)       # 720 in the real model, 120 here
PROJ_DIM = IN_CHANNELS               # feat_norm = LayerNorm(proj_dim)
BN_EPS = 1e-5
LN_EPS = 1e-5

LANE = 128


def _round_up(n, m):
    return ((n + m - 1) // m) * m


CP = _round_up(IN_CHANNELS, LANE)                      # padded channel dim
DP = _round_up(PROJ_DIM, LANE)                         # padded proj dim
PCOLS = _round_up(NUM_PROTOTYPE * NUM_CLASSES, LANE)   # dense prototype columns
VW = max(CP, DP, PCOLS)                                # stacked-vector width


def _const_spec(block_shape, index_map):
    """BlockSpec for grid-invariant operands, single-buffered when supported."""
    try:
        return pl.BlockSpec(block_shape, index_map, pipeline_mode=pl.Buffered(1))
    except Exception:   # older jax without pipeline_mode / Buffered
        return pl.BlockSpec(block_shape, index_map)


# ----------------------------------------------------------------------------
# Fused Pallas kernel
# ----------------------------------------------------------------------------
def _fused_cls_proto_kernel(x_ref, wc_ref, w1_ref, w2_ref, pm_ref, vec_ref,
                            o_ref, *, TH, W, d_real, k_real, m_proto):
    """cls_head -> proj_head -> feat_norm -> l2 -> prototype sims -> mask_norm.

    x_ref:  (H+2, W+2, CP) bf16  spatially padded NHWC features (whole image,
                                 resident across the row-block grid axis)
    wc_ref: (9, CP, CP)    bf16  folded 3x3 conv weights, tap index = 3*dy + dx
    w1_ref: (CP, CP)       bf16  proj conv1 (BN scale folded into columns)
    w2_ref: (CP, DP)       bf16  proj conv2
    pm_ref: (DP, PCOLS)    bf16  prototypes, column m*K + k = proto[k, m, :]
    vec_ref:(8, VW)        f32   rows: [conv shift, proj s1, proj b2,
                                        feat_g, feat_b, mask_g, mask_b, 0]
    o_ref:  (TH*W, PCOLS)  f32   lane-dense class scores (first K cols real)
    """
    CPd = w1_ref.shape[0]
    DPd = w2_ref.shape[1]
    PC = pm_ref.shape[1]
    TM = TH * W
    row0 = pl.multiple_of(pl.program_id(1) * TH, TH)

    # ---- cls_head: 3x3 conv as 9 K=CP matmuls; each dy row-band loaded once.
    # The (TH, W, CP) -> (TM, CP) collapse is layout-free because W % 16 == 0.
    acc = None
    for dy in range(3):
        rows = x_ref[pl.ds(row0 + dy, TH), :, :]             # (TH, W+2, CP)
        for dx in range(3):
            slab = rows[:, dx:dx + W, :].reshape(TM, CPd)
            part = jnp.dot(slab, wc_ref[3 * dy + dx],
                           preferred_element_type=jnp.float32)
            acc = part if acc is None else acc + part
    # folded BN + ReLU; Dropout2d(0.1) is identity in eval mode.
    h = jnp.maximum(acc + vec_ref[0:1, 0:CPd], 0.0)

    # ---- proj_head (convmlp): 1x1 conv + folded BN + ReLU + 1x1 conv ----
    h = jnp.dot(h.astype(jnp.bfloat16), w1_ref[...],
                preferred_element_type=jnp.float32)
    h = jnp.maximum(h + vec_ref[1:2, 0:CPd], 0.0)
    y = jnp.dot(h.astype(jnp.bfloat16), w2_ref[...],
                preferred_element_type=jnp.float32) + vec_ref[2:3, 0:DPd]

    # ---- feat_norm = LayerNorm(proj_dim).  Pad columns of y are exactly zero
    # by construction, so their (−mu)^2 contribution is removed analytically.
    inv_d = 1.0 / d_real
    mu = jnp.sum(y, axis=-1, keepdims=True) * inv_d
    cen = y - mu
    var = (jnp.sum(cen * cen, axis=-1, keepdims=True)
           - (DPd - d_real) * mu * mu) * inv_d
    y = cen * jax.lax.rsqrt(var + LN_EPS) * vec_ref[3:4, 0:DPd] + vec_ref[4:5, 0:DPd]

    # ---- l2_normalize along the feature dim (EUP rsqrt; pad cols stay 0) ----
    y = y * jax.lax.rsqrt(jnp.sum(y * y, axis=-1, keepdims=True) + 1e-12)

    # ---- prototype similarities: one dense MXU push over M*K columns, then
    # max over prototypes via XLU lane rolls (class k ends up in column k).
    sims = jnp.dot(y.astype(jnp.bfloat16), pm_ref[...],
                   preferred_element_type=jnp.float32)       # (TM, PC)
    seg = sims
    for m in range(1, m_proto):
        seg = jnp.maximum(seg, pltpu.roll(sims, shift=PC - m * k_real, axis=1))

    # ---- mask_norm = LayerNorm(num_classes) over the K real columns only ----
    lane = jax.lax.broadcasted_iota(jnp.int32, seg.shape, 1)
    segm = jnp.where(lane < k_real, seg, 0.0)
    inv_k = 1.0 / k_real
    mu = jnp.sum(segm, axis=-1, keepdims=True) * inv_k
    cen = segm - mu
    var = (jnp.sum(cen * cen, axis=-1, keepdims=True)
           - (PC - k_real) * mu * mu) * inv_k
    # Pad columns: cen = -mu but gamma/beta pads are zero -> output pads are 0.
    o_ref[...] = (cen * jax.lax.rsqrt(var + LN_EPS) * vec_ref[5:6, 0:PC]
                  + vec_ref[6:7, 0:PC]).astype(o_ref.dtype)


# ----------------------------------------------------------------------------
# pallas_call wrapper (host-side BN folding / padding / packing)
# ----------------------------------------------------------------------------
def cls_proj_proto_seg(c_pad, p):
    """c_pad: (B, H, W, CP) f32 channel-padded NHWC concat of backbone features.

    Returns (B, H*W, PCOLS) f32 lane-dense class scores (first NUM_CLASSES
    columns are real, the rest are exactly zero).
    """
    B, H, W, _ = c_pad.shape
    C, D, K, M = IN_CHANNELS, PROJ_DIM, NUM_CLASSES, NUM_PROTOTYPE

    # bf16 sublane packing: the in-kernel (TH, W, CP) -> (TH*W, CP) collapse is
    # layout-free only if W is a multiple of 16.
    assert W % 16 == 0, "pad W to a multiple of 16 (bf16 sublane packing)"

    # Row-block size: >= 2 row blocks per batch (pipelining depth / megacore).
    if H % 8 == 0 and H // 8 >= 2:
        TH = 8
    elif H % 4 == 0 and H // 4 >= 2:
        TH = 4
    elif H % 2 == 0:
        TH = 2
    else:
        TH = H
    TM = TH * W

    # ---- cls_head: fold eval-BatchNorm + conv bias into weights / shift ----
    inv_std = 1.0 / jnp.sqrt(p['cls_bn_var'] + BN_EPS)
    scale = p['cls_bn_gamma'] * inv_std
    cshift = p['cls_b'] * scale + p['cls_bn_beta'] - p['cls_bn_mean'] * scale
    wf = p['cls_w'] * scale[None, None, None, :]                     # (3,3,C,C)
    wf = jnp.pad(wf, ((0, 0), (0, 0), (0, CP - C), (0, CP - C)))
    wtap = wf.reshape(9, CP, CP).astype(jnp.bfloat16)                # tap = 3*dy+dx
    cshift = jnp.pad(cshift, (0, CP - C))

    # ---- proj_head convmlp: fold BN scale into w1, bias+BN shift into s1 ----
    inv_std = 1.0 / jnp.sqrt(p['proj_bn_var'] + BN_EPS)
    scale = p['proj_bn_gamma'] * inv_std
    s1 = p['proj_b1'] * scale + p['proj_bn_beta'] - p['proj_bn_mean'] * scale
    w1 = jnp.pad(p['proj_w1'] * scale[None, :],
                 ((0, CP - C), (0, CP - C))).astype(jnp.bfloat16)
    s1 = jnp.pad(s1, (0, CP - C))
    w2 = jnp.pad(p['proj_w2'], ((0, CP - C), (0, DP - D))).astype(jnp.bfloat16)
    b2 = jnp.pad(p['proj_b2'], (0, DP - D))
    fg = jnp.pad(p['feat_ln_gamma'], (0, DP - D))
    fb = jnp.pad(p['feat_ln_beta'], (0, DP - D))

    # ---- prototypes: dense packing, column m*K + k = proto[k, m, :] ----
    pm = jnp.transpose(p['prototypes'], (1, 0, 2)).reshape(M * K, D)   # (M*K, D)
    pm = jnp.pad(pm, ((0, PCOLS - M * K), (0, DP - D)))
    pm = jnp.transpose(pm, (1, 0)).astype(jnp.bfloat16)                # (DP, PCOLS)

    mg = jnp.pad(p['mask_ln_gamma'], (0, PCOLS - K))
    mb = jnp.pad(p['mask_ln_beta'], (0, PCOLS - K))

    # ---- stack the seven per-channel vectors into one (8, VW) operand ----
    def _row(v):
        return jnp.pad(v.astype(jnp.float32), (0, VW - v.shape[0]))
    vec = jnp.stack([_row(cshift), _row(s1), _row(b2), _row(fg), _row(fb),
                     _row(mg), _row(mb), jnp.zeros((VW,), jnp.float32)])

    # ---- spatial zero-pad (padding=1 of the 3x3 conv) and cast to bf16 ----
    xpad = jnp.pad(c_pad, ((0, 0), (1, 1), (1, 1), (0, 0))).astype(jnp.bfloat16)

    kern = functools.partial(_fused_cls_proto_kernel, TH=TH, W=W,
                             d_real=D, k_real=K, m_proto=M)
    grid = (B, H // TH)

    # TODO(synk): emit bf16 / pixel-packed scores at real HRNet-W48 sizes to cut
    # the 128-lane class-padding write bandwidth; kept f32 here for fidelity.
    return pl.pallas_call(
        kern,
        out_shape=jax.ShapeDtypeStruct((B, H * W, PCOLS), jnp.float32),
        grid_spec=pltpu.PrefetchScalarGridSpec(
            num_scalar_prefetch=0,
            grid=grid,
            in_specs=[
                # Whole padded image per batch; index map ignores r so it is
                # fetched once per batch and stays resident across row blocks.
                pl.BlockSpec((None, H + 2, W + 2, CP),
                             lambda b, r: (b, 0, 0, 0)),
                _const_spec((9, CP, CP), lambda b, r: (0, 0, 0)),
                _const_spec((CP, CP), lambda b, r: (0, 0)),
                _const_spec((CP, DP), lambda b, r: (0, 0)),
                _const_spec((DP, PCOLS), lambda b, r: (0, 0)),
                _const_spec((8, VW), lambda b, r: (0, 0)),
            ],
            out_specs=pl.BlockSpec((None, TM, PCOLS), lambda b, r: (b, r, 0)),
        ),
        compiler_params=pltpu.CompilerParams(
            dimension_semantics=("parallel", "parallel"),
            vmem_limit_bytes=32 * 1024 * 1024),
    )(xpad, wtap, w1, w2, pm, vec)


# ----------------------------------------------------------------------------
# Plain-JAX glue
# ----------------------------------------------------------------------------
def _interp_matrix(out_size, in_size, dtype):
    """Row-interpolation matrix for bilinear, align_corners=True."""
    if in_size == 1:
        return jnp.ones((out_size, 1), dtype)
    src = jnp.arange(out_size, dtype=jnp.float32) * (in_size - 1) / (out_size - 1)
    i0 = jnp.clip(jnp.floor(src).astype(jnp.int32), 0, in_size - 2)
    w1 = src - i0.astype(jnp.float32)
    w0 = 1.0 - w1
    rows = jnp.arange(out_size)
    m = jnp.zeros((out_size, in_size), jnp.float32)
    m = m.at[rows, i0].add(w0).at[rows, i0 + 1].add(w1)
    return m.astype(dtype)


def bilinear_upsample_align_corners(x, out_hw):
    """x: (B, h, w, C) NHWC -> (B, H, W, C); matches F.interpolate(align_corners=True)."""
    _, h, w, _ = x.shape
    H, W = out_hw
    Ah = _interp_matrix(H, h, x.dtype)
    Aw = _interp_matrix(W, w, x.dtype)
    y = jnp.einsum('Hh,bhwc->bHwc', Ah, x)
    y = jnp.einsum('Ww,bHwc->bHWc', Aw, y)
    return y


def synthetic_backbone(bparams, x_nhwc):
    # TODO(synk): the real HRNet-W48 backbone (BackboneSelector) is an entire
    # network; replaced by a deterministic multi-scale stem (avg-pool + 1x1
    # conv + ReLU) producing features at strides 4/8/16/32 like HRNet.
    feats = []
    B, H, W, _ = x_nhwc.shape
    for i, bp in enumerate(bparams):
        s = 4 * (2 ** i)
        xp = x_nhwc.reshape(B, H // s, s, W // s, s, x_nhwc.shape[-1]).mean(axis=(2, 4))
        f = jnp.maximum(jnp.einsum('bhwc,cd->bhwd', xp, bp['w']) + bp['b'], 0.0)
        feats.append(f)
    return feats


def hrnet_w48_attn_uncer_proto_forward(params, x_nchw):
    """Inference forward (gt_semantic_seg=None, use_boundary=False)."""
    x = jnp.transpose(x_nchw, (0, 2, 3, 1))                      # NCHW -> NHWC
    feats = synthetic_backbone(params['backbone'], x)
    B, h, w, _ = feats[0].shape
    ups = [feats[0]] + [bilinear_upsample_align_corners(f, (h, w)) for f in feats[1:]]
    c = jnp.concatenate(ups, axis=-1)                            # (B, h, w, IN_CHANNELS)
    c = jnp.pad(c, ((0, 0), (0, 0), (0, 0), (0, CP - IN_CHANNELS)))  # lane-pad channels

    # Fused Pallas kernel: cls_head + proj_head + feat_norm + l2_normalize
    # + prototype similarities + mask_norm.
    seg = cls_proj_proto_seg(c, params)                          # (B, h*w, PCOLS) f32
    seg = seg[:, :, :NUM_CLASSES].reshape(B, h, w, NUM_CLASSES)
    seg = jnp.transpose(seg, (0, 3, 1, 2))                       # back to NCHW

    # TODO(synk): confidence_head / boundary heads only run when gt_semantic_seg
    # is provided (training / uncertainty-vis path); inference returns seg only.
    return {'seg': seg}


# ----------------------------------------------------------------------------
# Deterministic parameter init (shapes follow the module's __init__)
# ----------------------------------------------------------------------------
def init_params(seed=42):
    keys = iter(jax.random.split(jax.random.PRNGKey(seed), 64))
    nk = lambda: next(keys)
    C, D, K, M = IN_CHANNELS, PROJ_DIM, NUM_CLASSES, NUM_PROTOTYPE
    p = {}
    p['backbone'] = [
        {'w': 0.3 * jax.random.normal(nk(), (3, ch), jnp.float32),
         'b': 0.05 * jax.random.normal(nk(), (ch,), jnp.float32)}
        for ch in BACKBONE_CH
    ]
    # cls_head: Conv2d(C, C, k=3, pad=1) + BN + ReLU
    p['cls_w'] = 0.05 * jax.random.normal(nk(), (3, 3, C, C), jnp.float32)
    p['cls_b'] = 0.02 * jax.random.normal(nk(), (C,), jnp.float32)
    p['cls_bn_gamma'] = 1.0 + 0.1 * jax.random.normal(nk(), (C,), jnp.float32)
    p['cls_bn_beta'] = 0.05 * jax.random.normal(nk(), (C,), jnp.float32)
    p['cls_bn_mean'] = 0.02 * jax.random.normal(nk(), (C,), jnp.float32)
    p['cls_bn_var'] = 0.8 + 0.4 * jax.random.uniform(nk(), (C,), jnp.float32)
    # proj_head (convmlp): 1x1 conv + BN + ReLU + 1x1 conv
    p['proj_w1'] = 0.05 * jax.random.normal(nk(), (C, C), jnp.float32)
    p['proj_b1'] = 0.02 * jax.random.normal(nk(), (C,), jnp.float32)
    p['proj_bn_gamma'] = 1.0 + 0.1 * jax.random.normal(nk(), (C,), jnp.float32)
    p['proj_bn_beta'] = 0.05 * jax.random.normal(nk(), (C,), jnp.float32)
    p['proj_bn_mean'] = 0.02 * jax.random.normal(nk(), (C,), jnp.float32)
    p['proj_bn_var'] = 0.8 + 0.4 * jax.random.uniform(nk(), (C,), jnp.float32)
    p['proj_w2'] = 0.05 * jax.random.normal(nk(), (C, D), jnp.float32)
    p['proj_b2'] = 0.02 * jax.random.normal(nk(), (D,), jnp.float32)
    # feat_norm / mask_norm LayerNorms (PyTorch default init: weight=1, bias=0)
    p['feat_ln_gamma'] = jnp.ones((D,), jnp.float32)
    p['feat_ln_beta'] = jnp.zeros((D,), jnp.float32)
    p['mask_ln_gamma'] = jnp.ones((K,), jnp.float32)
    p['mask_ln_beta'] = jnp.zeros((K,), jnp.float32)
    # prototypes: (num_classes, num_prototype, proj_dim), l2-normalized
    proto = jax.random.normal(nk(), (K, M, D), jnp.float32)
    proto = proto / jnp.maximum(
        jnp.linalg.norm(proto, axis=-1, keepdims=True), 1e-12)
    p['prototypes'] = proto
    return p


# ----------------------------------------------------------------------------
if __name__ == "__main__":
    params = init_params(seed=42)
    x_ = jax.random.normal(jax.random.PRNGKey(0), (2, 3, 64, 64), jnp.float32)  # NCHW

    fwd = jax.jit(hrnet_w48_attn_uncer_proto_forward)
    preds = fwd(params, x_)
    preds = jax.block_until_ready(preds)

    seg = preds['seg']
    assert seg.shape == (2, NUM_CLASSES, 16, 16), seg.shape
    assert bool(jnp.all(jnp.isfinite(seg)))
    print("KERNEL_OK")
</pallas_src>

<mosaic_0001>
module attributes {stable_mosaic.version = 11 : i64} {
  func.func private @main(%arg0: i32) attributes {dimension_semantics = [#tpu.dimension_semantics<core_parallel>], iteration_bounds = array<i64: 2>, tpu.core_type = #tpu.core_type<sc_scalar_subcore>, window_params = []} {
    return
  }
}

module attributes {stable_mosaic.version = 11 : i64} {
  func.func private @main(%arg0: i32) attributes {dimension_semantics = [#tpu.dimension_semantics<core_parallel>], iteration_bounds = array<i64: 2>, tpu.core_type = #tpu.core_type<sc_scalar_subcore>, window_params = []} {
    return
  }
}

module attributes {stable_mosaic.version = 11 : i64} {
  func.func @_fused_cls_proto_kernel(%arg0: i32, %arg1: i32, %arg2: memref<1x18x18x128xbf16, #tpu.memory_space<vmem>>, %arg3: memref<9x128x128xbf16, #tpu.memory_space<vmem>>, %arg4: memref<128x128xbf16, #tpu.memory_space<vmem>>, %arg5: memref<128x128xbf16, #tpu.memory_space<vmem>>, %arg6: memref<128x128xbf16, #tpu.memory_space<vmem>>, %arg7: memref<8x128xf32, #tpu.memory_space<vmem>>, %arg8: memref<1x128x128xf32, #tpu.memory_space<vmem>>) attributes {dimension_semantics = [#tpu.dimension_semantics<parallel>, #tpu.dimension_semantics<parallel>], iteration_bounds = array<i64: 2, 2>, scalar_prefetch = 0 : i64, scratch_operands = 0 : i64, tpu.core_type = #tpu.core_type<tc>, window_params = [{transform_indices = @transform_0, window_bounds = array<i64: 1, 18, 18, 128>}, {pipeline_mode = #tpu.pipeline_mode<synchronous>, transform_indices = @transform_1, window_bounds = array<i64: 9, 128, 128>}, {pipeline_mode = #tpu.pipeline_mode<synchronous>, transform_indices = @transform_2, window_bounds = array<i64: 128, 128>}, {pipeline_mode = #tpu.pipeline_mode<synchronous>, transform_indices = @transform_3, window_bounds = array<i64: 128, 128>}, {pipeline_mode = #tpu.pipeline_mode<synchronous>, transform_indices = @transform_4, window_bounds = array<i64: 128, 128>}, {pipeline_mode = #tpu.pipeline_mode<synchronous>, transform_indices = @transform_5, window_bounds = array<i64: 8, 128>}, {transform_indices = @transform_6, window_bounds = array<i64: 1, 128, 128>}]} {
    %c8_i32 = arith.constant 8 : i32
    %0 = arith.muli %arg1, %c8_i32 : i32
    %1 = tpu.assume_multiple %0, 8 : i32
    %c0_i32 = arith.constant 0 : i32
    %2 = arith.addi %1, %c0_i32 : i32
    %c0 = arith.constant 0 : index
    %3 = arith.index_cast %2 : i32 to index
    %c0_0 = arith.constant 0 : index
    %c0_1 = arith.constant 0 : index
    %4 = vector.load %arg2[%c0, %3, %c0_0, %c0_1] : memref<1x18x18x128xbf16, #tpu.memory_space<vmem>>, vector<1x8x18x128xbf16>
    %5 = vector.shape_cast %4 : vector<1x8x18x128xbf16> to vector<8x18x128xbf16>
    %6 = vector.extract_strided_slice %5 {offsets = [0, 0, 0], sizes = [8, 16, 128], strides = [1, 1, 1]} : vector<8x18x128xbf16> to vector<8x16x128xbf16>
    %7 = vector.shape_cast %6 : vector<8x16x128xbf16> to vector<128x128xbf16>
    %c0_2 = arith.constant 0 : index
    %c0_3 = arith.constant 0 : index
    %c0_4 = arith.constant 0 : index
    %8 = vector.load %arg3[%c0_2, %c0_3, %c0_4] : memref<9x128x128xbf16, #tpu.memory_space<vmem>>, vector<1x128x128xbf16>
    %9 = vector.shape_cast %8 : vector<1x128x128xbf16> to vector<128x128xbf16>
    %cst = arith.constant dense<0.000000e+00> : vector<128x128xf32>
    %10 = tpu.matmul %7, %9, %cst {dimension_numbers = #tpu.dot_dimension_numbers<[1], [0], [0], [1], [0, 0, 1, 1], [], []>} : vector<128x128xbf16>, vector<128x128xbf16>, vector<128x128xf32> -> vector<128x128xf32>
    %11 = vector.extract_strided_slice %5 {offsets = [0, 1, 0], sizes = [8, 16, 128], strides = [1, 1, 1]} : vector<8x18x128xbf16> to vector<8x16x128xbf16>
    %12 = vector.shape_cast %11 : vector<8x16x128xbf16> to vector<128x128xbf16>
    %c1 = arith.constant 1 : index
    %c0_5 = arith.constant 0 : index
    %c0_6 = arith.constant 0 : index
    %13 = vector.load %arg3[%c1, %c0_5, %c0_6] : memref<9x128x128xbf16, #tpu.memory_space<vmem>>, vector<1x128x128xbf16>
    %14 = vector.shape_cast %13 : vector<1x128x128xbf16> to vector<128x128xbf16>
    %cst_7 = arith.constant dense<0.000000e+00> : vector<128x128xf32>
    %15 = tpu.matmul %12, %14, %cst_7 {dimension_numbers = #tpu.dot_dimension_numbers<[1], [0], [0], [1], [0, 0, 1, 1], [], []>} : vector<128x128xbf16>, vector<128x128xbf16>, vector<128x128xf32> -> vector<128x128xf32>
    %16 = arith.addf %10, %15 : vector<128x128xf32>
    %17 = vector.extract_strided_slice %5 {offsets = [0, 2, 0], sizes = [8, 16, 128], strides = [1, 1, 1]} : vector<8x18x128xbf16> to vector<8x16x128xbf16>
    %18 = vector.shape_cast %17 : vector<8x16x128xbf16> to vector<128x128xbf16>
    %c2 = arith.constant 2 : index
    %c0_8 = arith.constant 0 : index
    %c0_9 = arith.constant 0 : index
    %19 = vector.load %arg3[%c2, %c0_8, %c0_9] : memref<9x128x128xbf16, #tpu.memory_space<vmem>>, vector<1x128x128xbf16>
    %20 = vector.shape_cast %19 : vector<1x128x128xbf16> to vector<128x128xbf16>
    %cst_10 = arith.constant dense<0.000000e+00> : vector<128x128xf32>
    %21 = tpu.matmul %18, %20, %cst_10 {dimension_numbers = #tpu.dot_dimension_numbers<[1], [0], [0], [1], [0, 0, 1, 1], [], []>} : vector<128x128xbf16>, vector<128x128xbf16>, vector<128x128xf32> -> vector<128x128xf32>
    %22 = arith.addf %16, %21 : vector<128x128xf32>
    %c1_i32 = arith.constant 1 : i32
    %23 = arith.addi %1, %c1_i32 : i32
    %c0_11 = arith.constant 0 : index
    %24 = arith.index_cast %23 : i32 to index
    %c0_12 = arith.constant 0 : index
    %c0_13 = arith.constant 0 : index
    %25 = vector.load %arg2[%c0_11, %24, %c0_12, %c0_13] : memref<1x18x18x128xbf16, #tpu.memory_space<vmem>>, vector<1x8x18x128xbf16>
    %26 = vector.shape_cast %25 : vector<1x8x18x128xbf16> to vector<8x18x128xbf16>
    %27 = vector.extract_strided_slice %26 {offsets = [0, 0, 0], sizes = [8, 16, 128], strides = [1, 1, 1]} : vector<8x18x128xbf16> to vector<8x16x128xbf16>
    %28 = vector.shape_cast %27 : vector<8x16x128xbf16> to vector<128x128xbf16>
    %c3 = arith.constant 3 : index
    %c0_14 = arith.constant 0 : index
    %c0_15 = arith.constant 0 : index
    %29 = vector.load %arg3[%c3, %c0_14, %c0_15] : memref<9x128x128xbf16, #tpu.memory_space<vmem>>, vector<1x128x128xbf16>
    %30 = vector.shape_cast %29 : vector<1x128x128xbf16> to vector<128x128xbf16>
    %cst_16 = arith.constant dense<0.000000e+00> : vector<128x128xf32>
    %31 = tpu.matmul %28, %30, %cst_16 {dimension_numbers = #tpu.dot_dimension_numbers<[1], [0], [0], [1], [0, 0, 1, 1], [], []>} : vector<128x128xbf16>, vector<128x128xbf16>, vector<128x128xf32> -> vector<128x128xf32>
    %32 = arith.addf %22, %31 : vector<128x128xf32>
    %33 = vector.extract_strided_slice %26 {offsets = [0, 1, 0], sizes = [8, 16, 128], strides = [1, 1, 1]} : vector<8x18x128xbf16> to vector<8x16x128xbf16>
    %34 = vector.shape_cast %33 : vector<8x16x128xbf16> to vector<128x128xbf16>
    %c4 = arith.constant 4 : index
    %c0_17 = arith.constant 0 : index
    %c0_18 = arith.constant 0 : index
    %35 = vector.load %arg3[%c4, %c0_17, %c0_18] : memref<9x128x128xbf16, #tpu.memory_space<vmem>>, vector<1x128x128xbf16>
    %36 = vector.shape_cast %35 : vector<1x128x128xbf16> to vector<128x128xbf16>
    %cst_19 = arith.constant dense<0.000000e+00> : vector<128x128xf32>
    %37 = tpu.matmul %34, %36, %cst_19 {dimension_numbers = #tpu.dot_dimension_numbers<[1], [0], [0], [1], [0, 0, 1, 1], [], []>} : vector<128x128xbf16>, vector<128x128xbf16>, vector<128x128xf32> -> vector<128x128xf32>
    %38 = arith.addf %32, %37 : vector<128x128xf32>
    %39 = vector.extract_strided_slice %26 {offsets = [0, 2, 0], sizes = [8, 16, 128], strides = [1, 1, 1]} : vector<8x18x128xbf16> to vector<8x16x128xbf16>
    %40 = vector.shape_cast %39 : vector<8x16x128xbf16> to vector<128x128xbf16>
    %c5 = arith.constant 5 : index
    %c0_20 = arith.constant 0 : index
    %c0_21 = arith.constant 0 : index
    %41 = vector.load %arg3[%c5, %c0_20, %c0_21] : memref<9x128x128xbf16, #tpu.memory_space<vmem>>, vector<1x128x128xbf16>
    %42 = vector.shape_cast %41 : vector<1x128x128xbf16> to vector<128x128xbf16>
    %cst_22 = arith.constant dense<0.000000e+00> : vector<128x128xf32>
    %43 = tpu.matmul %40, %42, %cst_22 {dimension_numbers = #tpu.dot_dimension_numbers<[1], [0], [0], [1], [0, 0, 1, 1], [], []>} : vector<128x128xbf16>, vector<128x128xbf16>, vector<128x128xf32> -> vector<128x128xf32>
    %44 = arith.addf %38, %43 : vector<128x128xf32>
    %c2_i32 = arith.constant 2 : i32
    %45 = arith.addi %1, %c2_i32 : i32
    %c0_23 = arith.constant 0 : index
    %46 = arith.index_cast %45 : i32 to index
    %c0_24 = arith.constant 0 : index
    %c0_25 = arith.constant 0 : index
    %47 = vector.load %arg2[%c0_23, %46, %c0_24, %c0_25] : memref<1x18x18x128xbf16, #tpu.memory_space<vmem>>, vector<1x8x18x128xbf16>
    %48 = vector.shape_cast %47 : vector<1x8x18x128xbf16> to vector<8x18x128xbf16>
    %49 = vector.extract_strided_slice %48 {offsets = [0, 0, 0], sizes = [8, 16, 128], strides = [1, 1, 1]} : vector<8x18x128xbf16> to vector<8x16x128xbf16>
    %50 = vector.shape_cast %49 : vector<8x16x128xbf16> to vector<128x128xbf16>
    %c6 = arith.constant 6 : index
    %c0_26 = arith.constant 0 : index
    %c0_27 = arith.constant 0 : index
    %51 = vector.load %arg3[%c6, %c0_26, %c0_27] : memref<9x128x128xbf16, #tpu.memory_space<vmem>>, vector<1x128x128xbf16>
    %52 = vector.shape_cast %51 : vector<1x128x128xbf16> to vector<128x128xbf16>
    %cst_28 = arith.constant dense<0.000000e+00> : vector<128x128xf32>
    %53 = tpu.matmul %50, %52, %cst_28 {dimension_numbers = #tpu.dot_dimension_numbers<[1], [0], [0], [1], [0, 0, 1, 1], [], []>} : vector<128x128xbf16>, vector<128x128xbf16>, vector<128x128xf32> -> vector<128x128xf32>
    %54 = arith.addf %44, %53 : vector<128x128xf32>
    %55 = vector.extract_strided_slice %48 {offsets = [0, 1, 0], sizes = [8, 16, 128], strides = [1, 1, 1]} : vector<8x18x128xbf16> to vector<8x16x128xbf16>
    %56 = vector.shape_cast %55 : vector<8x16x128xbf16> to vector<128x128xbf16>
    %c7 = arith.constant 7 : index
    %c0_29 = arith.constant 0 : index
    %c0_30 = arith.constant 0 : index
    %57 = vector.load %arg3[%c7, %c0_29, %c0_30] : memref<9x128x128xbf16, #tpu.memory_space<vmem>>, vector<1x128x128xbf16>
    %58 = vector.shape_cast %57 : vector<1x128x128xbf16> to vector<128x128xbf16>
    %cst_31 = arith.constant dense<0.000000e+00> : vector<128x128xf32>
    %59 = tpu.matmul %56, %58, %cst_31 {dimension_numbers = #tpu.dot_dimension_numbers<[1], [0], [0], [1], [0, 0, 1, 1], [], []>} : vector<128x128xbf16>, vector<128x128xbf16>, vector<128x128xf32> -> vector<128x128xf32>
    %60 = arith.addf %54, %59 : vector<128x128xf32>
    %61 = vector.extract_strided_slice %48 {offsets = [0, 2, 0], sizes = [8, 16, 128], strides = [1, 1, 1]} : vector<8x18x128xbf16> to vector<8x16x128xbf16>
    %62 = vector.shape_cast %61 : vector<8x16x128xbf16> to vector<128x128xbf16>
    %c8 = arith.constant 8 : index
    %c0_32 = arith.constant 0 : index
    %c0_33 = arith.constant 0 : index
    %63 = vector.load %arg3[%c8, %c0_32, %c0_33] : memref<9x128x128xbf16, #tpu.memory_space<vmem>>, vector<1x128x128xbf16>
    %64 = vector.shape_cast %63 : vector<1x128x128xbf16> to vector<128x128xbf16>
    %cst_34 = arith.constant dense<0.000000e+00> : vector<128x128xf32>
    %65 = tpu.matmul %62, %64, %cst_34 {dimension_numbers = #tpu.dot_dimension_numbers<[1], [0], [0], [1], [0, 0, 1, 1], [], []>} : vector<128x128xbf16>, vector<128x128xbf16>, vector<128x128xf32> -> vector<128x128xf32>
    %66 = arith.addf %60, %65 : vector<128x128xf32>
    %c0_35 = arith.constant 0 : index
    %c0_36 = arith.constant 0 : index
    %67 = vector.load %arg7[%c0_35, %c0_36] : memref<8x128xf32, #tpu.memory_space<vmem>>, vector<1x128xf32>
    %68 = vector.broadcast %67 : vector<1x128xf32> to vector<128x128xf32>
    %69 = arith.addf %66, %68 : vector<128x128xf32>
    %cst_37 = arith.constant 0.000000e+00 : f32
    %70 = vector.broadcast %cst_37 : f32 to vector<128x128xf32>
    %71 = arith.maximumf %69, %70 : vector<128x128xf32>
    %72 = arith.truncf %71 : vector<128x128xf32> to vector<128x128xbf16>
    %c0_38 = arith.constant 0 : index
    %c0_39 = arith.constant 0 : index
    %73 = vector.load %arg4[%c0_38, %c0_39] : memref<128x128xbf16, #tpu.memory_space<vmem>>, vector<128x128xbf16>
    %cst_40 = arith.constant dense<0.000000e+00> : vector<128x128xf32>
    %74 = tpu.matmul %72, %73, %cst_40 {dimension_numbers = #tpu.dot_dimension_numbers<[1], [0], [0], [1], [0, 0, 1, 1], [], []>} : vector<128x128xbf16>, vector<128x128xbf16>, vector<128x128xf32> -> vector<128x128xf32>
    %c1_41 = arith.constant 1 : index
    %c0_42 = arith.constant 0 : index
    %75 = vector.load %arg7[%c1_41, %c0_42] : memref<8x128xf32, #tpu.memory_space<vmem>>, vector<1x128xf32>
    %76 = vector.broadcast %75 : vector<1x128xf32> to vector<128x128xf32>
    %77 = arith.addf %74, %76 : vector<128x128xf32>
    %cst_43 = arith.constant 0.000000e+00 : f32
    %78 = vector.broadcast %cst_43 : f32 to vector<128x128xf32>
    %79 = arith.maximumf %77, %78 : vector<128x128xf32>
    %80 = arith.truncf %79 : vector<128x128xf32> to vector<128x128xbf16>
    %c0_44 = arith.constant 0 : index
    %c0_45 = arith.constant 0 : index
    %81 = vector.load %arg5[%c0_44, %c0_45] : memref<128x128xbf16, #tpu.memory_space<vmem>>, vector<128x128xbf16>
    %cst_46 = arith.constant dense<0.000000e+00> : vector<128x128xf32>
    %82 = tpu.matmul %80, %81, %cst_46 {dimension_numbers = #tpu.dot_dimension_numbers<[1], [0], [0], [1], [0, 0, 1, 1], [], []>} : vector<128x128xbf16>, vector<128x128xbf16>, vector<128x128xf32> -> vector<128x128xf32>
    %c2_47 = arith.constant 2 : index
    %c0_48 = arith.constant 0 : index
    %83 = vector.load %arg7[%c2_47, %c0_48] : memref<8x128xf32, #tpu.memory_space<vmem>>, vector<1x128xf32>
    %84 = vector.broadcast %83 : vector<1x128xf32> to vector<128x128xf32>
    %85 = arith.addf %82, %84 : vector<128x128xf32>
    %cst_49 = arith.constant dense<0.000000e+00> : vector<128xf32>
    %86 = vector.multi_reduction <add>, %85, %cst_49 [1] : vector<128x128xf32> to vector<128xf32>
    %87 = vector.shape_cast %86 : vector<128xf32> to vector<128x1xf32>
    %cst_50 = arith.constant 0.00833333377 : f32
    %88 = vector.broadcast %cst_50 : f32 to vector<128x1xf32>
    %89 = arith.mulf %87, %88 : vector<128x1xf32>
    %90 = vector.broadcast %89 : vector<128x1xf32> to vector<128x128xf32>
    %91 = arith.subf %85, %90 : vector<128x128xf32>
    %92 = arith.mulf %91, %91 : vector<128x128xf32>
    %cst_51 = arith.constant dense<0.000000e+00> : vector<128xf32>
    %93 = vector.multi_reduction <add>, %92, %cst_51 [1] : vector<128x128xf32> to vector<128xf32>
    %94 = vector.shape_cast %93 : vector<128xf32> to vector<128x1xf32>
    %cst_52 = arith.constant 8.000000e+00 : f32
    %95 = vector.broadcast %cst_52 : f32 to vector<128x1xf32>
    %96 = arith.mulf %95, %89 : vector<128x1xf32>
    %97 = arith.mulf %96, %89 : vector<128x1xf32>
    %98 = arith.subf %94, %97 : vector<128x1xf32>
    %cst_53 = arith.constant 0.00833333377 : f32
    %99 = vector.broadcast %cst_53 : f32 to vector<128x1xf32>
    %100 = arith.mulf %98, %99 : vector<128x1xf32>
    %cst_54 = arith.constant 9.99999974E-6 : f32
    %101 = vector.broadcast %cst_54 : f32 to vector<128x1xf32>
    %102 = arith.addf %100, %101 : vector<128x1xf32>
    %103 = math.rsqrt %102 : vector<128x1xf32>
    %104 = vector.broadcast %103 : vector<128x1xf32> to vector<128x128xf32>
    %105 = arith.mulf %91, %104 : vector<128x128xf32>
    %c3_55 = arith.constant 3 : index
    %c0_56 = arith.constant 0 : index
    %106 = vector.load %arg7[%c3_55, %c0_56] : memref<8x128xf32, #tpu.memory_space<vmem>>, vector<1x128xf32>
    %107 = vector.broadcast %106 : vector<1x128xf32> to vector<128x128xf32>
    %108 = arith.mulf %105, %107 : vector<128x128xf32>
    %c4_57 = arith.constant 4 : index
    %c0_58 = arith.constant 0 : index
    %109 = vector.load %arg7[%c4_57, %c0_58] : memref<8x128xf32, #tpu.memory_space<vmem>>, vector<1x128xf32>
    %110 = vector.broadcast %109 : vector<1x128xf32> to vector<128x128xf32>
    %111 = arith.addf %108, %110 : vector<128x128xf32>
    %112 = arith.mulf %111, %111 : vector<128x128xf32>
    %cst_59 = arith.constant dense<0.000000e+00> : vector<128xf32>
    %113 = vector.multi_reduction <add>, %112, %cst_59 [1] : vector<128x128xf32> to vector<128xf32>
    %114 = vector.shape_cast %113 : vector<128xf32> to vector<128x1xf32>
    %cst_60 = arith.constant 9.99999996E-13 : f32
    %115 = vector.broadcast %cst_60 : f32 to vector<128x1xf32>
    %116 = arith.addf %114, %115 : vector<128x1xf32>
    %117 = math.rsqrt %116 : vector<128x1xf32>
    %118 = vector.broadcast %117 : vector<128x1xf32> to vector<128x128xf32>
    %119 = arith.mulf %111, %118 : vector<128x128xf32>
    %120 = arith.truncf %119 : vector<128x128xf32> to vector<128x128xbf16>
    %c0_61 = arith.constant 0 : index
    %c0_62 = arith.constant 0 : index
    %121 = vector.load %arg6[%c0_61, %c0_62] : memref<128x128xbf16, #tpu.memory_space<vmem>>, vector<128x128xbf16>
    %cst_63 = arith.constant dense<0.000000e+00> : vector<128x128xf32>
    %122 = tpu.matmul %120, %121, %cst_63 {dimension_numbers = #tpu.dot_dimension_numbers<[1], [0], [0], [1], [0, 0, 1, 1], [], []>} : vector<128x128xbf16>, vector<128x128xbf16>, vector<128x128xf32> -> vector<128x128xf32>
    %c120_i32 = arith.constant 120 : i32
    %123 = tpu.dynamic_rotate %122 by %c120_i32 dim 1 : vector<128x128xf32>, i32 -> vector<128x128xf32>
    %124 = arith.maximumf %122, %123 : vector<128x128xf32>
    %c112_i32 = arith.constant 112 : i32
    %125 = tpu.dynamic_rotate %122 by %c112_i32 dim 1 : vector<128x128xf32>, i32 -> vector<128x128xf32>
    %126 = arith.maximumf %124, %125 : vector<128x128xf32>
    %c104_i32 = arith.constant 104 : i32
    %127 = tpu.dynamic_rotate %122 by %c104_i32 dim 1 : vector<128x128xf32>, i32 -> vector<128x128xf32>
    %128 = arith.maximumf %126, %127 : vector<128x128xf32>
    %129 = tpu.iota {dimensions = array<i32: 1>} : vector<128x128xi32>
    %c8_i32_64 = arith.constant 8 : i32
    %130 = vector.broadcast %c8_i32_64 : i32 to vector<128x128xi32>
    %131 = arith.cmpi slt, %129, %130 : vector<128x128xi32>
    %cst_65 = arith.constant 0.000000e+00 : f32
    %132 = vector.broadcast %cst_65 : f32 to vector<128x128xf32>
    %133 = arith.select %131, %128, %132 : vector<128x128xi1>, vector<128x128xf32>
    %cst_66 = arith.constant dense<0.000000e+00> : vector<128xf32>
    %134 = vector.multi_reduction <add>, %133, %cst_66 [1] : vector<128x128xf32> to vector<128xf32>
    %135 = vector.shape_cast %134 : vector<128xf32> to vector<128x1xf32>
    %cst_67 = arith.constant 1.250000e-01 : f32
    %136 = vector.broadcast %cst_67 : f32 to vector<128x1xf32>
    %137 = arith.mulf %135, %136 : vector<128x1xf32>
    %138 = vector.broadcast %137 : vector<128x1xf32> to vector<128x128xf32>
    %139 = arith.subf %133, %138 : vector<128x128xf32>
    %140 = arith.mulf %139, %139 : vector<128x128xf32>
    %cst_68 = arith.constant dense<0.000000e+00> : vector<128xf32>
    %141 = vector.multi_reduction <add>, %140, %cst_68 [1] : vector<128x128xf32> to vector<128xf32>
    %142 = vector.shape_cast %141 : vector<128xf32> to vector<128x1xf32>
    %cst_69 = arith.constant 1.200000e+02 : f32
    %143 = vector.broadcast %cst_69 : f32 to vector<128x1xf32>
    %144 = arith.mulf %143, %137 : vector<128x1xf32>
    %145 = arith.mulf %144, %137 : vector<128x1xf32>
    %146 = arith.subf %142, %145 : vector<128x1xf32>
    %cst_70 = arith.constant 1.250000e-01 : f32
    %147 = vector.broadcast %cst_70 : f32 to vector<128x1xf32>
    %148 = arith.mulf %146, %147 : vector<128x1xf32>
    %cst_71 = arith.constant 9.99999974E-6 : f32
    %149 = vector.broadcast %cst_71 : f32 to vector<128x1xf32>
    %150 = arith.addf %148, %149 : vector<128x1xf32>
    %151 = math.rsqrt %150 : vector<128x1xf32>
    %152 = vector.broadcast %151 : vector<128x1xf32> to vector<128x128xf32>
    %153 = arith.mulf %139, %152 : vector<128x128xf32>
    %c5_72 = arith.constant 5 : index
    %c0_73 = arith.constant 0 : index
    %154 = vector.load %arg7[%c5_72, %c0_73] : memref<8x128xf32, #tpu.memory_space<vmem>>, vector<1x128xf32>
    %155 = vector.broadcast %154 : vector<1x128xf32> to vector<128x128xf32>
    %156 = arith.mulf %153, %155 : vector<128x128xf32>
    %c6_74 = arith.constant 6 : index
    %c0_75 = arith.constant 0 : index
    %157 = vector.load %arg7[%c6_74, %c0_75] : memref<8x128xf32, #tpu.memory_space<vmem>>, vector<1x128xf32>
    %158 = vector.broadcast %157 : vector<1x128xf32> to vector<128x128xf32>
    %159 = arith.addf %156, %158 : vector<128x128xf32>
    %c0_76 = arith.constant 0 : index
    %c0_77 = arith.constant 0 : index
    %c0_78 = arith.constant 0 : index
    %160 = vector.load %arg8[%c0_76, %c0_77, %c0_78] : memref<1x128x128xf32, #tpu.memory_space<vmem>>, vector<1x128x128xf32>
    %161 = vector.shape_cast %160 : vector<1x128x128xf32> to vector<128x128xf32>
    %162 = vector.shape_cast %159 : vector<128x128xf32> to vector<1x128x128xf32>
    tpu.vector_store %arg8[%c0_76, %c0_77, %c0_78], %162 {strides = array<i32>} : memref<1x128x128xf32, #tpu.memory_space<vmem>>, vector<1x128x128xf32>,
    return
  }
  func.func @transform_0(%arg0: i32, %arg1: i32) -> (i32, i32, i32, i32) {
    %c0_i32 = arith.constant 0 : i32
    %c0_i32_0 = arith.constant 0 : i32
    %c0_i32_1 = arith.constant 0 : i32
    %c0_i32_2 = arith.constant 0 : i32
    return %arg0, %c0_i32, %c0_i32_0, %c0_i32_1 : i32, i32, i32, i32
  }
  func.func @transform_1(%arg0: i32, %arg1: i32) -> (i32, i32, i32) {
    %c0_i32 = arith.constant 0 : i32
    %c0_i32_0 = arith.constant 0 : i32
    %c0_i32_1 = arith.constant 0 : i32
    %c0_i32_2 = arith.constant 0 : i32
    return %c0_i32, %c0_i32_0, %c0_i32_1 : i32, i32, i32
  }
  func.func @transform_2(%arg0: i32, %arg1: i32) -> (i32, i32) {
    %c0_i32 = arith.constant 0 : i32
    %c0_i32_0 = arith.constant 0 : i32
    %c0_i32_1 = arith.constant 0 : i32
    return %c0_i32, %c0_i32_0 : i32, i32
  }
  func.func @transform_3(%arg0: i32, %arg1: i32) -> (i32, i32) {
    %c0_i32 = arith.constant 0 : i32
    %c0_i32_0 = arith.constant 0 : i32
    %c0_i32_1 = arith.constant 0 : i32
    return %c0_i32, %c0_i32_0 : i32, i32
  }
  func.func @transform_4(%arg0: i32, %arg1: i32) -> (i32, i32) {
    %c0_i32 = arith.constant 0 : i32
    %c0_i32_0 = arith.constant 0 : i32
    %c0_i32_1 = arith.constant 0 : i32
    return %c0_i32, %c0_i32_0 : i32, i32
  }
  func.func @transform_5(%arg0: i32, %arg1: i32) -> (i32, i32) {
    %c0_i32 = arith.constant 0 : i32
    %c0_i32_0 = arith.constant 0 : i32
    %c0_i32_1 = arith.constant 0 : i32
    return %c0_i32, %c0_i32_0 : i32, i32
  }
  func.func @transform_6(%arg0: i32, %arg1: i32) -> (i32, i32, i32) {
    %c0_i32 = arith.constant 0 : i32
    %c0_i32_0 = arith.constant 0 : i32
    return %arg0, %arg1, %c0_i32 : i32, i32, i32
  }
}

</mosaic_0001>

<bundles_post_ra>
// kernel: hrnet_w48_attn_uncer_proto_forward.1
= control target key start
LH: loop header
LB: loop body
LE: loop exit
PB: predicated region body
PF: predicated region fallthrough
CT: control target
= control target key end

     0   :  { %s5957_s21 = smov 0   ;;  %s5959_s22 = smov 0   ;;  %s7987_s0 = inlined_call_operand.vmem [shape: bf16[2,18,18,128], index: 0, kind: input, shape index: {}]   ;;  %s7988_s1 = inlined_call_operand.vmem [shape: bf16[9,128,128], index: 1, kind: input, shape index: {}]   ;;  %s7989_s2 = inlined_call_operand.vmem [shape: bf16[128,128], index: 2, kind: input, shape index: {}]   ;;  %s7990_s3 = inlined_call_operand.vmem [shape: bf16[128,128], index: 3, kind: input, shape index: {}]   ;;  %s7991_s4 = inlined_call_operand.vmem [shape: bf16[128,128], index: 4, kind: input, shape index: {}]   ;;  %s7992_s5 = inlined_call_operand.vmem [shape: f32[8,128], index: 5, kind: input, shape index: {}]   ;;  %s7993_s6 = inlined_call_operand.vmem [shape: f32[2,256,128], index: 6, kind: output, shape index: {}]  }
   0x1   :  { %s5961_s23 = smov 0   ;;  %s5963_s24 = smov 0  }
   0x2   :  { %s5965_s25 = smov 0  }
   0x3 LB: > { %s25_s26 = sadd.s32 1, %s5909_s23  ;;  %s28_s27 = sadd.s32 1, %s5913_s24  ;;  %s5917_s25 = sphi %s5965_s25, %s16_s25   ;;  %s5913_s24 = sphi %s5963_s24, %s8031_s24   ;;  %s5909_s23 = sphi %s5961_s23, %s8030_s23   ;;  %s5905_s22 = sphi %s5959_s22, %s8029_s22   ;;  %s5901_s21 = sphi %s5957_s21, %s8028_s21  }
   0x4   : > { %p26_p0 = scmp.ge.s32.totalorder %s25_s26, 2  ;;  %p4514_p1 = scmp.ge.s32.totalorder %s5917_s25, 1 }
   0x5   : > { %p226_p2 = scmp.lt.s32.totalorder %s5917_s25, 5 }
   0x6   : > { %s8033_s26 = smov (%p26_p0, %s25_s26), 0  ;;  %s8035_s27 = smov (!%p26_p0, %s28_s27), %s5913_s24 }
   0x7   : > { %p227_p3 = pnand %p4514_p1, %p226_p2  ;;  %p30_p4 = scmp.ge.s32.totalorder %s8035_s27, 2 }
   0x9   : > { %s8037_s27 = smov (%p30_p4, %s8035_s27), 0  ;;  %230 = sbr.rel (%p227_p3) target bundleno = 2103 (0x837), region = 44 }
  0x10   : > { %v5652_v0 = vld [vmem:[%s7988_s1 + $0xc0] sm:$0xff]   ;;  %p260_p5 = scmp.lt.s32.totalorder %s5905_s22, 1  ;;  %v5653_v1 = vld [vmem:[%s7988_s1 + $0xc8] sm:$0xff]   ;;  %s4903_s8 = smul.u32 96, %s5901_s21  ;;  %v5654_v2 = vld [vmem:[%s7988_s1 + $0xd0] sm:$0xff]   ;;  %vm910_vm0 = vcmask 1042432  }
  0x11   : > { %5192 = vmatprep.subr.bf16.mxu0 %v5652_v0  ;;  %v5655_v3 = vld [vmem:[%s7988_s1 + $0xd8] sm:$0xff]   ;;  %v5660_v4 = vld [vmem:[%s7988_s1 + $0x40] sm:$0xff]   ;;  %vm911_vm1 = vcmask 1046532   ;;  %v5664_v11 = vld [vmem:[%s7988_s1 + $0x48] sm:$0xff]   ;;  %vm320_vm3 = vsmask.f32 3328 }
  0x12   : > { %s8039_s22 = smov (!%p260_p5, %s5905_s22), 1  ;;  %5193 = vmatpush3.bf16.msra.mxu0 %v5652_v0  ;;  %v5656_v7 = vld [vmem:[%s7988_s1 + $0xe0] sm:$0xff]   ;;  %5096 = vmatprep.subr.bf16.mxu1 %v5660_v4  ;;  %vm6036_vm2 = vmor %vm910_vm0, %vm911_vm1  ;;  %v5657_v20 = vld [vmem:[%s7988_s1 + $0xe8] sm:$0xff]   ;;  %vm321_vm4 = vsmask.f32 7440  ;;  %s5919_s15 = smov 112  }
  0x13   : > { %5194 = vmatprep.subr.bf16.mxu0 %v5653_v1  ;;  %s5608_s11 = smul.u32 216, %s8039_s22  ;;  %5097 = vmatpush3.bf16.msra.mxu1 %v5660_v4  ;;  %v5666_v28 = vld [vmem:[%s7988_s1 + $0x50] sm:$0xff]   ;;  %v5670_v35 = vld [vmem:[%s7988_s1 + $0x58] sm:$0xff]   ;;  %v5672_v51 = vld [vmem:[%s7988_s1 + $0x60] sm:$0xff]   ;;  %s5920_s16 = smov 120  }
  0x14   : > { %5098 = vmatprep.subr.bf16.mxu1 %v5664_v11  ;;  %v5658_v36 = vld [vmem:[%s7988_s1 + $0xf0] sm:$0xff]   ;;  %v5659_v46 = vld [vmem:[%s7988_s1 + $0xf8] sm:$0xff]   ;;  %v5663_v60 = vld [vmem:[%s7988_s1 + $0x100] sm:$0xff]   ;;  %s5921_s18 = smov 104   ;;  %s4516_s19 = sshll.u32 %s5901_s21, 4 }
  0x15   : > { %s264_s14 = scalar_lea.vmem %s7987_s0, %s5608_s11  ;;  %v5676_v0 = vld [vmem:[%s7988_s1 + $0x68] sm:$0xff]   ;;  %vm6215_vm5 = vmor %vm320_vm3, %vm321_vm4  ;;  %v5751_v19 = vld [vmem:[%s7989_s2 + $0x18] sm:$0xff]   ;;  %p268_p6 = scmp.lt.s32.totalorder %s4516_s19, 31 }
  0x16   : > { %5195 = vmatpush3.bf16.msra.mxu0 %v5653_v1  ;;  %s6008_s17 = scalar_lea.vmem %s264_s14, %s4903_s8 }
  0x17   : > { %5196 = vmatprep.subr.bf16.mxu0 %v5654_v2  ;;  %v4612_v5 = vld [vmem:[%s6008_s17 + $0xc] sm:$0xf]  ;;  %v6015_v6 = vld [vmem:[%s6008_s17 + $0x10] sm:$0xf]  ;;  %v6022_v10 = vld [vmem:[%s6008_s17 + $0x18] sm:$0xf]  ;;  %5099 = vmatpush3.bf16.msra.mxu1 %v5664_v11 }
  0x18   : > { %v4652_v8 = vcombine.low %v4612_v5, %v6015_v6  ;;  %v1434_v9 = vshrl.u32 %v4612_v5, 16  ;;  %v4700_v12 = vrot.slane %v4612_v5, 9  ;;  %v6028_v13 = vld [vmem:[%s6008_s17 + $0x1c] sm:$0xf]  ;;  %v1458_v14 = vshrl.u32 %v6022_v10, 16  ;;  %5100 = vmatprep.subr.bf16.mxu1 %v5666_v28  ;;  %v5665_v11 = vld [vmem:[%s7988_s1 + $0x108] sm:$0xff]  }
  0x19   : > { %v1437_v15 = vshll.u32 %v4612_v5, 16  ;;  %v1461_v16 = vshll.u32 %v6022_v10, 16  ;;  %v1467_v17 = vshll.u32 %v6028_v13, 16  ;;  %v1471_v18 = vshrl.u32 %v6028_v13, 16  ;;  %v6072_v40 = vld [vmem:[%s6008_s17 + $0x24] sm:$0xf] }
  0x1a   : > { %5197 = vmatpush3.bf16.msra.mxu0 %v5654_v2  ;;  %5208 = vmatprep.mubr.bf16.mxu0 %v4652_v8  ;;  %v1443_v21 = vshll.u32 %v6015_v6, 16  ;;  %v7994_v22 = vrot.slane %v6015_v6, 5  ;;  %v4701_v23 = vrot.slane %v6022_v10, 9  ;;  %v1852_v24 = vrot.slane %v6028_v13, 5  ;;  %v6078_v43 = vld [vmem:[%s6008_s17 + $0x28] sm:$0xf] }
  0x1b   : > { %5198 = vmatprep.subr.bf16.mxu0 %v5655_v3  ;;  %v1447_v25 = vshrl.u32 %v6015_v6, 16  ;;  %v1460_v26 = vrot.slane %v1458_v14, 4  ;;  %v1463_v27 = vrot.slane %v1461_v16, 5  ;;  %v6051_v29 = vrot.slane %v1467_v17, 5  ;;  %5101 = vmatpush3.bf16.msra.mxu1 %v5666_v28  ;;  %v6089_v50 = vld [vmem:[%s6008_s17 + $0x30] sm:$0xf] }
  0x1c   : > { %v1473_v30 = vrot.slane %v1471_v18, 4  ;;  %v6057_v31 = vsel %vm6036_vm2, %v4700_v12, %v7994_v22  ;;  %v6061_v32 = vsel %vm6036_vm2, %v4701_v23, %v1852_v24  ;;  %v1436_v33 = vrot.slane %v1434_v9, 4  ;;  %5102 = vmatprep.subr.bf16.mxu1 %v5670_v35  ;;  %v6097_v53 = vld [vmem:[%s6008_s17 + $0x34] sm:$0xf]  ;;  %v6101_v55 = vld [vmem:[%s6008_s17 + $0x3c] sm:$0xf] }
  0x1d   : > { %v1439_v34 = vrot.slane %v1437_v15, 5  ;;  %v6069_v37 = vrot.slane %v1443_v21, 5  ;;  %v1449_v38 = vrot.slane %v1447_v25, 4  ;;  %v1464_v39 = vor.u32 %v1463_v27, %v1460_v26  ;;  %v6112_v61 = vld [vmem:[%s6008_s17 + $0x40] sm:$0xf]  ;;  %v5678_v8 = vld [vmem:[%s7988_s1 + $0x70] sm:$0xff]  }
  0x1e   : > { %5199 = vmatpush3.bf16.msra.mxu0 %v5655_v3  ;;  %v1474_v41 = vor.u32 %v1473_v30, %v6051_v29  ;;  %v6075_v42 = vrot.slane %v1852_v24, 4  ;;  %v1482_v44 = vshrl.u32 %v6072_v40, 16  ;;  %v1485_v48 = vshll.u32 %v6072_v40, 16  ;;  %v6116_v63 = vld [vmem:[%s6008_s17 + $0x48] sm:$0xf]  ;;  %v5682_v23 = vld [vmem:[%s7988_s1 + $0x78] sm:$0xff]  }
  0x1f   : > { %5200 = vmatprep.subr.bf16.mxu0 %v5656_v7  ;;  %v1440_v45 = vor.u32 %v1439_v34, %v1436_v33  ;;  %v6084_v47 = vrot.slane %v1464_v39, 4  ;;  %v1495_v49 = vshrl.u32 %v6078_v43, 16  ;;  %5103 = vmatpush3.bf16.msra.mxu1 %v5670_v35  ;;  %v1506_v54 = vshrl.u32 %v6089_v50, 16  ;;  %v6123_v2 = vld [vmem:[%s6008_s17 + $0x4c] sm:$0xf]  ;;  %v5669_v25 = vld [vmem:[%s7988_s1 + $0x110] sm:$0xff]  }
  0x20   : > { %v6094_v52 = vrot.slane %v1474_v41, 4  ;;  %v1509_v56 = vshll.u32 %v6089_v50, 16  ;;  %v1519_v57 = vshrl.u32 %v6097_v53, 16  ;;  %5104 = vmatprep.subr.bf16.mxu1 %v5672_v51  ;;  %v1450_v1 = vor.u32 %v1449_v38, %v6069_v37  ;;  %v6138_v12 = vld [vmem:[%s6008_s17 + $0x54] sm:$0xf]  ;;  %s8041_s19 = smov (!%p268_p6, %s4516_s19), 31 }
  0x21   : > { %v6106_v59 = vrot.slane %v1440_v45, 4  ;;  %v4653_v9 = vcombine.low %v6022_v10, %v6028_v13  ;;  %v6141_v14 = vld [vmem:[%s6008_s17 + $0x58] sm:$0xf]  ;;  %v6145_v16 = vrot.slane %v1482_v44, 4  ;;  %v4654_v17 = vcombine.low %v6072_v40, %v6078_v43  ;;  %v6152_v18 = vld [vmem:[%s6008_s17 + $0x60] sm:$0xf] }
  0x22   : > { %5201 = vmatpush3.bf16.msra.mxu0 %v5656_v7  ;;  %v6143_v15 = vrot.slane %v1450_v1, 4  ;;  %v6156_v21 = vld [vmem:[%s6008_s17 + $0x64] sm:$0xf]  ;;  %v4655_v24 = vcombine.low %v6089_v50, %v6097_v53  ;;  %v6169_v28 = vld [vmem:[%s6008_s17] sm:$0xf]  ;;  %v4656_v33 = vcombine.low %v6101_v55, %v6112_v61  ;;  %v4657_v34 = vcombine.low %v6116_v63, %v6123_v2  ;;  %v5671_v13 = vld [vmem:[%s7988_s1 + $0x118] sm:$0xff]  }
  0x23   : > { %5202 = vmatprep.subr.bf16.mxu0 %v5657_v20  ;;  %5105 = vmatpush3.bf16.msra.mxu1 %v5672_v51  ;;  %v6172_v30 = vld [vmem:[%s6008_s17 + $0x4] sm:$0xf]  ;;  %v6179_v35 = vld [vmem:[%s6008_s17 + $0x8] sm:$0x1]  ;;  %v327_v38 = vshll.u32 %v6169_v28, 16  ;;  %v4658_v45 = vcombine.low %v6138_v12, %v6141_v14  ;;  %v1446_v3 = vsel %vm6215_vm5, %v6106_v59, %v6069_v37 }
  0x24   : > { %5106 = vmatprep.subr.bf16.mxu1 %v5676_v0  ;;  %v333_v39 = vshll.u32 %v6172_v30, 16  ;;  %v337_v41 = vshrl.u32 %v6172_v30, 16  ;;  %v6186_v44 = vld [vmem:[%s6008_s17 + $0xc] sm:$0xf]  ;;  %v285_v1 = vld [vmem:[%s6008_s17 + $0x14] sm:$0x1] }
  0x25   : > { %v348_v26 = vshrl.u32 %v6186_v44, 16 }
  0x26   : > { %5203 = vmatpush3.bf16.msra.mxu0 %v5657_v20  ;;  %v339_v22 = vrot.slane %v337_v41, 4  ;;  %v351_v20 = vshll.u32 %v6186_v44, 16  ;;  %v367_v41 = vshll.u32 %v285_v1, 16  ;;  %v6224_v1 = vrot.slane %v1485_v48, 5 }
  0x27   : > { %5204 = vmatprep.subr.bf16.mxu0 %v5658_v36  ;;  %5107 = vmatpush3.bf16.msra.mxu1 %v5676_v0  ;;  %v6195_v0 = vld [vmem:[%s6008_s17 + $0x10] sm:$0xf]  ;;  %v350_v7 = vrot.slane %v348_v26, 4  ;;  %v1470_v48 = vsel %vm6215_vm5, %v6084_v47, %v6051_v29  ;;  %v5675_v26 = vld [vmem:[%s7988_s1 + $0x120] sm:$0xff]  }
  0x28   : > { %5108 = vmatprep.subr.bf16.mxu1 %v5678_v8  ;;  %v357_v51 = vshll.u32 %v6195_v0, 16 }
  0x2a   : > { %5205 = vmatpush3.bf16.msra.mxu0 %v5658_v36  ;;  %v324_v36 = vshrl.u32 %v6169_v28, 16 }
  0x2b   : > { %5206 = vmatprep.subr.bf16.mxu0 %v5659_v46  ;;  %5109 = vmatpush3.bf16.msra.mxu1 %v5678_v8 }
  0x2c   : > { %5110 = vmatprep.subr.bf16.mxu1 %v5682_v23  ;;  %v326_v8 = vrot.slane %v324_v36, 4 }
  0x2e   : > { %5207 = vmatpush3.bf16.msra.mxu0 %v5659_v46  ;;  %v4659_v46 = vcombine.low %v6152_v18, %v6156_v21 }
  0x2f   : > { %5224 = vmatprep.subr.bf16.mxu0 %v5663_v60  ;;  %5111 = vmatpush3.bf16.msra.mxu1 %v5682_v23  ;;  %v353_v23 = vrot.slane %v351_v20, 5 }
  0x31   : > { %5209 = vmatmul.mubr.bf16.vlgmr.msra.gmra.mrb[0].mxu0 %v4653_v9  ;;  %v329_v9 = vrot.slane %v327_v38, 5  ;;  %v354_v20 = vor.u32 %v353_v23, %v350_v7  ;;  %v1488_v23 = vor.u32 %v6224_v1, %v6145_v16 }
  0x32   : > { %5225 = vmatpush3.bf16.msra.mxu0 %v5663_v60  ;;  %5212 = vmatprep.mubr.bf16.mxu0 %v4654_v17  ;;  %v343_v60 = vshll.u32 %v6179_v35, 16  ;;  %v335_v17 = vrot.slane %v333_v39, 5  ;;  %v361_v39 = vshrl.u32 %v6195_v0, 16 }
  0x33   : > { %5226 = vmatprep.subr.bf16.mxu0 %v5665_v11  ;;  %v330_v36 = vor.u32 %v329_v9, %v326_v8  ;;  %v359_v8 = vrot.slane %v357_v51, 5  ;;  %v355_v51 = vrot.slane %v354_v20, 4 }
  0x34   : > { %v345_v27 = vrot.slane %v343_v60, 5  ;;  %v340_v38 = vor.u32 %v339_v22, %v335_v17  ;;  %v6211_v60 = vld [vmem:[%s6008_s17 + $0x14] sm:$0x1]  ;;  %v6220_v22 = vld [vmem:[%s6008_s17 + $0x20] sm:$0x1]  ;;  %v363_v4 = vrot.slane %v361_v39, 4 }
  0x35   : > { %v331_v9 = vrot.slane %v330_v36, 4  ;;  %v1453_v40 = vshll.u32 %v6211_v60, 16  ;;  %v6248_v39 = vld [vmem:[%s6008_s17 + $0x1c] sm:$0xf] }
  0x36   : > { %5227 = vmatpush3.bf16.msra.mxu0 %v5665_v11  ;;  %v6208_v11 = vld [vmem:[%s7988_s1] sm:$0xff]   ;;  %v341_v5 = vrot.slane %v340_v38, 4  ;;  %v364_v7 = vor.u32 %v363_v4, %v359_v8  ;;  %v6245_v38 = vld [vmem:[%s6008_s17 + $0x18] sm:$0xf] }
  0x37   : > { %5228 = vmatprep.subr.bf16.mxu0 %v5669_v25  ;;  %5128 = vmatprep.subr.bf16.mxu1 %v6208_v11  ;;  %v336_v37 = vsel %vm6215_vm5, %v331_v9, %v335_v17  ;;  %v1455_v29 = vrot.slane %v1453_v40, 5  ;;  %v1491_v17 = vshll.u32 %v6078_v43, 16  ;;  %v372_v1 = vshrl.u32 %v6245_v38, 16  ;;  %v6268_v9 = vld [vmem:[%s6008_s17 + $0x24] sm:$0xf] }
  0x38   : > { %v346_v59 = vsel %vm6215_vm5, %v341_v5, %v345_v27  ;;  %v365_v36 = vrot.slane %v364_v7, 4  ;;  %v360_v5 = vsel %vm6215_vm5, %v355_v51, %v359_v8  ;;  %v6281_v40 = vld [vmem:[%s6008_s17 + $0x28] sm:$0xf]  ;;  %v396_v51 = vshrl.u32 %v6268_v9, 16 }
  0x39   : > { %5213 = vmatmul.mubr.bf16.gmra.mrb[4].mxu0 %v4655_v24  ;;  %v1477_v24 = vshll.u32 %v6220_v22, 16  ;;  %v1456_v27 = vsel %vm6215_vm5, %v6143_v15, %v1455_v29  ;;  %v374_v7 = vrot.slane %v372_v1, 4  ;;  %v399_v29 = vshll.u32 %v6268_v9, 16 }
  0x3a   : > { %5229 = vmatpush3.bf16.msra.mxu0 %v5669_v25  ;;  %5216 = vmatprep.mubr.bf16.mxu0 %v4656_v33  ;;  %v369_v25 = vrot.slane %v367_v41, 5  ;;  %v4538_v33 = vcombine.low %v336_v37, %v346_v59  ;;  %v6264_v41 = vld [vmem:[%s6008_s17 + $0x20] sm:$0x1]  ;;  %v6275_v20 = vcombine.low %v1446_v3, %v1456_v27  ;;  %v5686_v59 = vld [vmem:[%s7988_s1 + $0x8] sm:$0xff]   ;;  %v409_v27 = vshrl.u32 %v6281_v40, 16 }
  0x3b   : > { %5230 = vmatprep.subr.bf16.mxu0 %v5671_v13  ;;  %v1479_v47 = vrot.slane %v1477_v24, 5  ;;  %v6284_v24 = vld [vmem:[%s6008_s17 + $0x2c] sm:$0x1] }
  0x3c   : > { %5112 = vmatprep.mubr.bf16.mxu1 %v4538_v33  ;;  %v370_v8 = vsel %vm6215_vm5, %v365_v36, %v369_v25  ;;  %8004 = vst [vmem:[#allocation2_spill] sm:$0xff] %v6284_v24  ;;  %v381_v33 = vshll.u32 %v6248_v39, 16  ;;  %v385_v25 = vshrl.u32 %v6248_v39, 16  ;;  %v415_v4 = vshll.u32 %v6284_v24, 16 }
  0x3d   : > { %v1480_v16 = vsel %vm6215_vm5, %v6094_v52, %v1479_v47  ;;  %v375_v52 = vshll.u32 %v6245_v38, 16  ;;  %v4539_v37 = vcombine.low %v360_v5, %v370_v8  ;;  %v405_v5 = vshll.u32 %v6281_v40, 16 }
  0x3e   : > { %5231 = vmatpush3.bf16.msra.mxu0 %v5671_v13  ;;  %v5677_v13 = vld [vmem:[%s7988_s1 + $0x128] sm:$0xff]   ;;  %v6277_v15 = vcombine.low %v1470_v48, %v1480_v16  ;;  %v391_v48 = vshll.u32 %v6264_v41, 16  ;;  %v383_v47 = vrot.slane %v381_v33, 5  ;;  %v387_v36 = vrot.slane %v385_v25, 4 }
  0x3f   : > { %5232 = vmatprep.subr.bf16.mxu0 %v5675_v26  ;;  %v377_v3 = vrot.slane %v375_v52, 5  ;;  %5113 = vmatmul.mubr.bf16.vlgmr.msra.gmra.mrb[0].mxu1 %v4539_v37  ;;  %v398_v8 = vrot.slane %v396_v51, 4  ;;  %v6306_v52 = vld [vmem:[%s6008_s17 + $0x2c] sm:$0x1]  ;;  %v407_v33 = vrot.slane %v405_v5, 5  ;;  %v411_v25 = vrot.slane %v409_v27, 4 }
  0x40   : > { %v393_v1 = vrot.slane %v391_v48, 5  ;;  %5129 = vmatpush3.bf16.msra.mxu1 %v6208_v11  ;;  %v5688_v37 = vld [vmem:[%s7988_s1 + $0x10] sm:$0xff]   ;;  %v5683_v11 = vld [vmem:[%s7988_s1 + $0x138] sm:$0xff]  }
  0x41   : > { %5217 = vmatmul.mubr.bf16.gmra.mrb[8].mxu0 %v4657_v34  ;;  %v5681_v34 = vld [vmem:[%s7988_s1 + $0x130] sm:$0xff]   ;;  %v378_v16 = vor.u32 %v377_v3, %v374_v7  ;;  %5130 = vmatprep.subr.bf16.mxu1 %v5686_v59  ;;  %v1489_v7 = vrot.slane %v1488_v23, 4  ;;  %v1493_v3 = vrot.slane %v1491_v17, 5  ;;  %v412_v51 = vor.u32 %v411_v25, %v407_v33  ;;  %v6319_v5 = vld [vmem:[%s6008_s17 + $0x38] sm:$0x1] }
  0x42   : > { %5233 = vmatpush3.bf16.msra.mxu0 %v5675_v26  ;;  %5220 = vmatprep.mubr.bf16.mxu0 %v4658_v45  ;;  %v401_v26 = vrot.slane %v399_v29, 5  ;;  %v388_v45 = vor.u32 %v387_v36, %v383_v47  ;;  %v417_v29 = vrot.slane %v415_v4, 5  ;;  %v1497_v36 = vrot.slane %v1495_v49, 4 }
  0x43   : > { %5234 = vmatprep.subr.bf16.mxu0 %v5677_v13  ;;  %v379_v62 = vrot.slane %v378_v16, 4  ;;  %v1494_v17 = vsel %vm6215_vm5, %v1489_v7, %v1493_v3  ;;  %v413_v16 = vrot.slane %v412_v51, 4  ;;  %v1508_v49 = vrot.slane %v1506_v54, 4  ;;  %v5690_v54 = vld [vmem:[%s7988_s1 + $0x18] sm:$0xff]  }
  0x44   : > { %v402_v58 = vor.u32 %v401_v26, %v398_v8  ;;  %v389_v48 = vrot.slane %v388_v45, 4  ;;  %5131 = vmatpush3.bf16.msra.mxu1 %v5686_v59  ;;  %v1498_v43 = vor.u32 %v1497_v36, %v1493_v3  ;;  %v6331_v8 = vld [vmem:[%s6008_s17 + $0x30] sm:$0xf]  ;;  %v1521_v45 = vrot.slane %v1519_v57, 4  ;;  %v6361_v3 = vld [vmem:[%s6008_s17 + $0x3c] sm:$0xf] }
  0x45   : > { %v384_v27 = vsel %vm6215_vm5, %v379_v62, %v383_v47  ;;  %5132 = vmatprep.subr.bf16.mxu1 %v5688_v37  ;;  %v1511_v47 = vrot.slane %v1509_v56, 5  ;;  %v418_v26 = vsel %vm6215_vm5, %v413_v16, %v417_v29  ;;  %v1515_v56 = vshll.u32 %v6097_v53, 16  ;;  %v5692_v16 = vld [vmem:[%s7988_s1 + $0x20] sm:$0xff]  }
  0x46   : > { %5235 = vmatpush3.bf16.msra.mxu0 %v5677_v13  ;;  %v403_v23 = vrot.slane %v402_v58, 4  ;;  %v1501_v13 = vshll.u32 %v6306_v52, 16  ;;  %v394_v4 = vsel %vm6215_vm5, %v389_v48, %v393_v1  ;;  %v6344_v1 = vld [vmem:[%s6008_s17 + $0x34] sm:$0xf]  ;;  %v1499_v50 = vrot.slane %v1498_v43, 4 }
  0x47   : > { %5236 = vmatprep.subr.bf16.mxu0 %v5681_v34  ;;  %v4540_v58 = vcombine.low %v384_v27, %v394_v4  ;;  %v1512_v25 = vor.u32 %v1511_v47, %v1508_v49  ;;  %v420_v7 = vshrl.u32 %v6331_v8, 16  ;;  %v6364_v48 = vld [vmem:[%s6008_s17 + $0x40] sm:$0xf]  ;;  %v1517_v29 = vrot.slane %v1515_v56, 5  ;;  %v6381_v47 = vld [vmem:[%s6008_s17 + $0x44] sm:$0x1] }
  0x48   : > { %v408_v62 = vsel %vm6215_vm5, %v403_v23, %v407_v33  ;;  %v1503_v59 = vrot.slane %v1501_v13, 5  ;;  %v6356_v33 = vld [vmem:[%s6008_s17 + $0x38] sm:$0x1]  ;;  %5133 = vmatpush3.bf16.msra.mxu1 %v5688_v37  ;;  %v423_v57 = vshll.u32 %v6331_v8, 16  ;;  %v429_v36 = vshll.u32 %v6344_v1, 16  ;;  %8006 = vst [vmem:[#allocation4_spill] sm:$0xff] %v6381_v47 }
  0x49   : > { %5221 = vmatmul.mubr.bf16.gmra.mrb[12].mxu0 %v4659_v46  ;;  %v5685_v46 = vld [vmem:[%s7988_s1 + $0x140] sm:$0xff]   ;;  %8005 = vst [vmem:[#allocation3_spill] sm:$0xff] %v6356_v33  ;;  %5116 = vmatprep.mubr.bf16.mxu1 %v4540_v58  ;;  %v1513_v23 = vrot.slane %v1512_v25, 4  ;;  %v422_v4 = vrot.slane %v420_v7, 4  ;;  %v1522_v37 = vor.u32 %v1521_v45, %v1517_v29  ;;  %v433_v58 = vshrl.u32 %v6344_v1, 16  ;;  %v5694_v25 = vld [vmem:[%s7988_s1 + $0x28] sm:$0xff]  }
  0x4a   : > { %5237 = vmatpush3.bf16.msra.mxu0 %v5681_v34  ;;  %5240 = vmatprep.mubr.bf16.mxu0 %v6275_v20  ;;  %v4541_v34 = vcombine.low %v408_v62, %v418_v26  ;;  %v1525_v20 = vshll.u32 %v6319_v5, 16  ;;  %v1504_v51 = vsel %vm6215_vm5, %v1499_v50, %v1503_v59  ;;  %v425_v43 = vrot.slane %v423_v57, 5  ;;  %v5687_v62 = vld [vmem:[%s7988_s1 + $0x148] sm:$0xff]  }
  0x4b   : > { %5238 = vmatprep.subr.bf16.mxu0 %v5683_v11  ;;  %v4686_v27 = vcombine.low %v1494_v17, %v1504_v51  ;;  %5134 = vmatprep.subr.bf16.mxu1 %v5690_v54  ;;  %v431_v49 = vrot.slane %v429_v36, 5  ;;  %v1518_v17 = vsel %vm6215_vm5, %v1513_v23, %v1517_v29  ;;  %v439_v59 = vshll.u32 %v6356_v33, 16 }
  0x4c   : > { %5117 = vmatmul.mubr.bf16.gmra.mrb[4].mxu1 %v4541_v34  ;;  %v1527_v13 = vrot.slane %v1525_v20, 5  ;;  %v447_v26 = vshll.u32 %v6361_v3, 16  ;;  %v1523_v50 = vrot.slane %v1522_v37, 4  ;;  %v426_v56 = vor.u32 %v425_v43, %v422_v4  ;;  %v5689_v20 = vld [vmem:[%s7988_s1 + $0x150] sm:$0xff]  }
  0x4d   : > { %5135 = vmatpush3.bf16.msra.mxu1 %v5690_v54  ;;  %v435_v45 = vrot.slane %v433_v58, 4  ;;  %v453_v34 = vshll.u32 %v6364_v48, 16  ;;  %v441_v7 = vrot.slane %v439_v59, 5  ;;  %v457_v57 = vshrl.u32 %v6364_v48, 16  ;;  %v6395_v54 = vld [vmem:[%s6008_s17 + $0x44] sm:$0x1] }
  0x4e   : > { %5239 = vmatpush3.bf16.msra.mxu0 %v5683_v11  ;;  %v444_v11 = vshrl.u32 %v6361_v3, 16  ;;  %v449_v29 = vrot.slane %v447_v26, 5  ;;  %5136 = vmatprep.subr.bf16.mxu1 %v5692_v16  ;;  %v1528_v36 = vsel %vm6215_vm5, %v1523_v50, %v1527_v13  ;;  %v427_v23 = vrot.slane %v426_v56, 4 }
  0x4f   : > { %5256 = vmatprep.subr.bf16.mxu0 %v5685_v46  ;;  %v436_v4 = vor.u32 %v435_v45, %v431_v49  ;;  %v4687_v37 = vcombine.low %v1518_v17, %v1528_v36  ;;  %v459_v58 = vrot.slane %v457_v57, 4  ;;  %v463_v59 = vshll.u32 %v6381_v47, 16  ;;  %v6470_v47 = vld [vmem:[%s6008_s17 + $0x5c] sm:$0x1] }
  0x50   : > { %v446_v51 = vrot.slane %v444_v11, 4  ;;  %v432_v11 = vsel %vm6215_vm5, %v427_v23, %v431_v49  ;;  %v8008_v33 = vshll.u32 %v6101_v55, 16  ;;  %v1539_v17 = vshll.u32 %v6112_v61, 16  ;;  %v5691_v49 = vld [vmem:[%s7988_s1 + $0x158] sm:$0xff]   ;;  %8014 = vst [vmem:[#allocation6_spill] sm:$0xff] %v6470_v47 }
  0x51   : > { %5241 = vmatmul.mubr.bf16.vlgmr.msra.gmra.mrb[0].mxu0 %v6277_v15  ;;  %v455_v15 = vrot.slane %v453_v34, 5  ;;  %v437_v26 = vrot.slane %v436_v4, 4  ;;  %5137 = vmatpush3.bf16.msra.mxu1 %v5692_v16  ;;  %v465_v45 = vrot.slane %v463_v59, 5  ;;  %v6421_v4 = vld [vmem:[%s6008_s17 + $0x50] sm:$0x1]  ;;  %v8010_v59 = vshrl.u32 %v6116_v63, 16 }
  0x52   : > { %5257 = vmatpush3.bf16.msra.mxu0 %v5685_v46  ;;  %5244 = vmatprep.mubr.bf16.mxu0 %v4686_v27  ;;  %v450_v43 = vor.u32 %v449_v29, %v446_v51  ;;  %v8007_v46 = vshrl.u32 %v6101_v55, 16  ;;  %v1535_v13 = vrot.slane %v8008_v33, 5  ;;  %v8009_v55 = vshrl.u32 %v6112_v61, 16  ;;  %v5696_v29 = vld [vmem:[%s7988_s1 + $0x30] sm:$0xff]  }
  0x53   : > { %5258 = vmatprep.subr.bf16.mxu0 %v5687_v62  ;;  %v460_v56 = vor.u32 %v459_v58, %v455_v15  ;;  %5138 = vmatprep.subr.bf16.mxu1 %v5694_v25  ;;  %v442_v16 = vsel %vm6215_vm5, %v437_v26, %v441_v7  ;;  %v1549_v51 = vshll.u32 %v6395_v54, 16  ;;  %v1541_v23 = vrot.slane %v1539_v17, 5  ;;  %v6424_v7 = vld [vmem:[%s6008_s17 + $0x48] sm:$0xf]  ;;  %v5693_v17 = vld [vmem:[%s7988_s1 + $0x160] sm:$0xff]  }
  0x54   : > { %v1532_v27 = vrot.slane %v8007_v46, 4  ;;  %v451_v50 = vrot.slane %v450_v43, 4  ;;  %v1545_v33 = vrot.slane %v8009_v55, 4  ;;  %v4542_v57 = vcombine.low %v432_v11, %v442_v16  ;;  %v6448_v55 = vld [vmem:[%s6008_s17 + $0x54] sm:$0xf] }
  0x55   : > { %v461_v36 = vrot.slane %v460_v56, 4  ;;  %v1551_v58 = vrot.slane %v1549_v51, 5  ;;  %v1556_v26 = vrot.slane %v8010_v59, 4  ;;  %v8011_v46 = vshll.u32 %v6116_v63, 16  ;;  %5139 = vmatpush3.bf16.msra.mxu1 %v5694_v25  ;;  %v6439_v63 = vld [vmem:[%s6008_s17 + $0x4c] sm:$0xf] }
  0x56   : > { %5259 = vmatpush3.bf16.msra.mxu0 %v5687_v62  ;;  %v1536_v34 = vor.u32 %v1535_v13, %v1532_v27  ;;  %v456_v62 = vsel %vm6215_vm5, %v451_v50, %v455_v15  ;;  %5120 = vmatprep.mubr.bf16.mxu1 %v4542_v57  ;;  %v1546_v11 = vor.u32 %v1545_v33, %v1541_v23  ;;  %v1563_v13 = vshll.u32 %v6123_v2, 16  ;;  %v5698_v33 = vld [vmem:[%s7988_s1 + $0x38] sm:$0xff]  }
  0x57   : > { %5260 = vmatprep.subr.bf16.mxu0 %v5689_v20  ;;  %v1559_v27 = vrot.slane %v8011_v46, 5  ;;  %v466_v15 = vsel %vm6215_vm5, %v461_v36, %v465_v45  ;;  %v8012_v50 = vshrl.u32 %v6123_v2, 16  ;;  %v1573_v45 = vshll.u32 %v6421_v4, 16  ;;  %5140 = vmatprep.subr.bf16.mxu1 %v5696_v29  ;;  %v6456_v36 = vld [vmem:[%s6008_s17 + $0x58] sm:$0xf]  ;;  %v6463_v46 = vld [vmem:[%s7988_s1 + $0x80] sm:$0xff]  }
  0x58   : > { %v1537_v43 = vrot.slane %v1536_v34, 4  ;;  %v4543_v25 = vcombine.low %v456_v62, %v466_v15  ;;  %v6445_v34 = vld [vmem:[%s6008_s17 + $0x50] sm:$0x1]  ;;  %v1547_v51 = vrot.slane %v1546_v11, 4  ;;  %v1565_v57 = vrot.slane %v1563_v13, 5 }
  0x59   : > { %5245 = vmatmul.mubr.bf16.gmra.mrb[4].mxu0 %v4687_v37  ;;  %v1569_v56 = vrot.slane %v8012_v50, 4  ;;  %v1560_v16 = vor.u32 %v1559_v27, %v1556_v26  ;;  %8013 = vst [vmem:[#allocation5_spill] sm:$0xff] %v6445_v34  ;;  %v471_v62 = vshll.u32 %v6424_v7, 16  ;;  %v477_v59 = vshll.u32 %v6439_v63, 16  ;;  %5141 = vmatpush3.bf16.msra.mxu1 %v5696_v29 }
  0x5a   : > { %5261 = vmatpush3.bf16.msra.mxu0 %v5689_v20  ;;  %v1542_v37 = vsel %vm6215_vm5, %v1537_v43, %v1541_v23  ;;  %v468_v20 = vshrl.u32 %v6424_v7, 16  ;;  %5121 = vmatmul.mubr.bf16.gmra.mrb[8].mxu1 %v4543_v25  ;;  %v1575_v43 = vrot.slane %v1573_v45, 5  ;;  %v481_v26 = vshrl.u32 %v6439_v63, 16 }
  0x5b   : > { %5262 = vmatprep.subr.bf16.mxu0 %v5691_v49  ;;  %v1561_v23 = vrot.slane %v1560_v16, 4  ;;  %v1552_v27 = vsel %vm6215_vm5, %v1547_v51, %v1551_v58  ;;  %v1570_v15 = vor.u32 %v1569_v56, %v1565_v57  ;;  %v473_v13 = vrot.slane %v471_v62, 5  ;;  %5142 = vmatprep.subr.bf16.mxu1 %v5698_v33  ;;  %v5695_v58 = vld [vmem:[%s7988_s1 + $0x168] sm:$0xff]  }
  0x5c   : > { %v470_v11 = vrot.slane %v468_v20, 4  ;;  %v4688_v50 = vcombine.low %v1542_v37, %v1552_v27  ;;  %v479_v16 = vrot.slane %v477_v59, 5  ;;  %v483_v45 = vrot.slane %v481_v26, 4  ;;  %v6483_v27 = vld [vmem:[%s6008_s17 + $0x5c] sm:$0x1] }
  0x5d   : > { %v1566_v25 = vsel %vm6215_vm5, %v1561_v23, %v1565_v57  ;;  %v1571_v24 = vrot.slane %v1570_v15, 4  ;;  %v487_v29 = vshll.u32 %v6445_v34, 16  ;;  %v495_v51 = vshll.u32 %v6448_v55, 16  ;;  %5143 = vmatpush3.bf16.msra.mxu1 %v5698_v33 }
  0x5e   : > { %5263 = vmatpush3.bf16.msra.mxu0 %v5691_v49  ;;  %v474_v56 = vor.u32 %v473_v13, %v470_v11  ;;  %v492_v49 = vshrl.u32 %v6448_v55, 16  ;;  %5248 = vmatprep.mubr.bf16.mxu0 %v4688_v50  ;;  %v484_v37 = vor.u32 %v483_v45, %v479_v16  ;;  %v501_v57 = vshll.u32 %v6456_v36, 16 }
  0x5f   : > { %5264 = vmatprep.subr.bf16.mxu0 %v5693_v17  ;;  %v505_v20 = vshrl.u32 %v6456_v36, 16  ;;  %v1576_v62 = vsel %vm6215_vm5, %v1571_v24, %v1575_v43  ;;  %v489_v59 = vrot.slane %v487_v29, 5  ;;  %v497_v13 = vrot.slane %v495_v51, 5  ;;  %5160 = vmatprep.subr.bf16.mxu1 %v6463_v46 }
  0x60   : > { %v475_v23 = vrot.slane %v474_v56, 4  ;;  %v494_v26 = vrot.slane %v492_v49, 4  ;;  %v4689_v15 = vcombine.low %v1566_v25, %v1576_v62  ;;  %v485_v11 = vrot.slane %v484_v37, 4 }
  0x61   : > { %v503_v50 = vrot.slane %v501_v57, 5  ;;  %v507_v34 = vrot.slane %v505_v20, 4  ;;  %v511_v24 = vshll.u32 %v6470_v47, 16  ;;  %v8015_v43 = vshrl.u32 %v6138_v12, 16 }
  0x62   : > { %5265 = vmatpush3.bf16.msra.mxu0 %v5693_v17  ;;  %v480_v45 = vsel %vm6215_vm5, %v475_v23, %v479_v16  ;;  %v5697_v17 = vld [vmem:[%s7988_s1 + $0x170] sm:$0xff]   ;;  %v490_v33 = vsel %vm6215_vm5, %v485_v11, %v489_v59  ;;  %v498_v25 = vor.u32 %v497_v13, %v494_v26  ;;  %v8016_v29 = vshll.u32 %v6138_v12, 16  ;;  %v6502_v23 = vld [vmem:[%s6008_s17 + $0x68] sm:$0x1]  ;;  %v5699_v12 = vld [vmem:[%s7988_s1 + $0x178] sm:$0xff]  }
  0x63   : > { %5266 = vmatprep.subr.bf16.mxu0 %v5695_v58  ;;  %v1580_v56 = vrot.slane %v8015_v43, 4  ;;  %5249 = vmatmul.mubr.bf16.gmra.mrb[8].mxu0 %v4689_v15  ;;  %v1587_v16 = vshll.u32 %v6141_v14, 16  ;;  %v4544_v37 = vcombine.low %v480_v45, %v490_v33  ;;  %v508_v51 = vor.u32 %v507_v34, %v503_v50 }
  0x64   : > { %v1583_v49 = vrot.slane %v8016_v29, 5  ;;  %v513_v57 = vrot.slane %v511_v24, 5  ;;  %v8017_v20 = vshrl.u32 %v6141_v14, 16  ;;  %v499_v43 = vrot.slane %v498_v25, 4 }
  0x65   : > { %v1589_v47 = vrot.slane %v1587_v16, 5  ;;  %v1597_v59 = vshll.u32 %v6483_v27, 16  ;;  %5124 = vmatprep.mubr.bf16.mxu1 %v4544_v37  ;;  %v509_v26 = vrot.slane %v508_v51, 4  ;;  %v8018_v34 = vshrl.u32 %v6152_v18, 16 }
  0x66   : > { %v1593_v62 = vrot.slane %v8017_v20, 4  ;;  %5267 = vmatpush3.bf16.msra.mxu0 %v5695_v58  ;;  %v1584_v15 = vor.u32 %v1583_v49, %v1580_v56  ;;  %v8019_v13 = vshll.u32 %v6152_v18, 16  ;;  %v1611_v24 = vshll.u32 %v6156_v21, 16 }
  0x67   : > { %v1604_v11 = vrot.slane %v8018_v34, 4  ;;  %5268 = vmatprep.subr.bf16.mxu0 %v5697_v17  ;;  %v504_v58 = vsel %vm6215_vm5, %v499_v43, %v503_v50  ;;  %v1599_v25 = vrot.slane %v1597_v59, 5  ;;  %v514_v29 = vsel %vm6215_vm5, %v509_v26, %v513_v57 }
  0x68   : > { %v1607_v45 = vrot.slane %v8019_v13, 5  ;;  %v1585_v56 = vrot.slane %v1584_v15, 4  ;;  %v1594_v33 = vor.u32 %v1593_v62, %v1589_v47  ;;  %v1613_v16 = vrot.slane %v1611_v24, 5 }
  0x69   : > { %v8020_v37 = vshrl.u32 %v6156_v21, 16  ;;  %v4545_v20 = vcombine.low %v504_v58, %v514_v29  ;;  %v1621_v13 = vshll.u32 %v6502_v23, 16  ;;  %v8021_v62 = vrot.slane %v6015_v6, 5  ;;  %v5703_v21 = vld [vmem:[%s7988_s1 + $0x180] sm:$0xff]  }
  0x6a   : > { %v1608_v49 = vor.u32 %v1607_v45, %v1604_v11  ;;  %v1590_v18 = vsel %vm6215_vm5, %v1585_v56, %v1589_v47  ;;  %v1595_v34 = vrot.slane %v1594_v33, 4  ;;  %5269 = vmatpush3.bf16.msra.mxu0 %v5697_v17  ;;  %v1848_v57 = vrot.slane %v6211_v60, 5  ;;  %v5868_v33 = vld [vmem:[%s6008_s17 + $0x28] sm:$0xf] }
  0x6b   : > { %v1617_v51 = vrot.slane %v8020_v37, 4  ;;  %5270 = vmatprep.subr.bf16.mxu0 %v5699_v12  ;;  %v1847_v15 = vrot.slane %v8021_v62, 4  ;;  %5125 = vmatmul.mubr.bf16.gmra.mrb[12].mxu1 %v4545_v20  ;;  %v1623_v59 = vrot.slane %v1621_v13, 5  ;;  %v1855_v17 = vrot.slane %v6220_v22, 5 }
  0x6c   : > { %v1609_v50 = vrot.slane %v1608_v49, 4  ;;  %v1600_v47 = vsel %vm6215_vm5, %v1595_v34, %v1599_v25  ;;  %v8022_v60 = vcombine.low %v6169_v28, %v6172_v30  ;;  %v1859_v25 = vrot.slane %v5868_v33, 5 }
  0x6d   : > { %v1618_v43 = vor.u32 %v1617_v51, %v1613_v16  ;;  %v4690_v26 = vcombine.low %v1590_v18, %v1600_v47  ;;  %v1849_v45 = vsel %vm6036_vm2, %v1847_v15, %v1848_v57  ;;  %v1856_v22 = vsel %vm6036_vm2, %v6075_v42, %v1855_v17  ;;  %v5870_v18 = vld [vmem:[%s6008_s17 + $0x30] sm:$0xf]  ;;  %v5872_v47 = vld [vmem:[%s6008_s17 + $0x48] sm:$0xf] }
  0x6e   : > { %v1614_v6 = vsel %vm6215_vm5, %v1609_v50, %v1613_v16  ;;  %5144 = vmatprep.mubr.bf16.mxu1 %v8022_v60  ;;  %5271 = vmatpush3.bf16.msra.mxu0 %v5699_v12  ;;  %v4724_v24 = vcombine.low %v6057_v31, %v1849_v45  ;;  %v4725_v56 = vcombine.low %v6061_v32, %v1856_v22  ;;  %v5869_v12 = vld [vmem:[%s6008_s17 + $0x24] sm:$0xf]  ;;  %v1862_v31 = vrot.slane %v6306_v52, 5  ;;  %v5704_v32 = vld [vmem:[%s7988_s1 + $0x88] sm:$0xff]   ;;  %v5871_v50 = vld [vmem:[%s6008_s17 + $0x3c] sm:$0xf] }
  0x6f   : > { %v1619_v11 = vrot.slane %v1618_v43, 4  ;;  %5252 = vmatprep.mubr.bf16.mxu0 %v4690_v26  ;;  %5288 = vmatprep.subr.bf16.mxu0 %v5703_v21  ;;  %v4555_v49 = vcombine.low %v6186_v44, %v6195_v0  ;;  %v4702_v16 = vrot.slane %v5869_v12, 9  ;;  %v4556_v42 = vcombine.low %v6245_v38, %v6248_v39  ;;  %v5709_v22 = vld [vmem:[%s7988_s1 + $0x190] sm:$0xff]  }
  0x70   : > { %v1861_v37 = vrot.slane %v1859_v25, 4  ;;  %v1866_v51 = vrot.slane %v6097_v53, 5  ;;  %v1873_v44 = vrot.slane %v6112_v61, 5  ;;  %v1880_v20 = vrot.slane %v6123_v2, 5  ;;  %v5708_v53 = vld [vmem:[%s7988_s1 + $0x90] sm:$0xff]  }
  0x71   : > { %v1624_v58 = vsel %vm6215_vm5, %v1619_v11, %v1623_v59  ;;  %v1860_v0 = vsel %vm6036_vm2, %v4702_v16, %v1859_v25  ;;  %v4703_v34 = vrot.slane %v5870_v18, 9  ;;  %v1869_v61 = vrot.slane %v6319_v5, 5  ;;  %v5710_v11 = vld [vmem:[%s7988_s1 + $0x98] sm:$0xff]   ;;  %v5714_v25 = vld [vmem:[%s7988_s1 + $0xa0] sm:$0xff]  }
  0x72   : > { %v4691_v29 = vcombine.low %v1614_v6, %v1624_v58  ;;  %v1863_v52 = vsel %vm6036_vm2, %v1861_v37, %v1862_v31  ;;  %v1868_v13 = vrot.slane %v1866_v51, 4  ;;  %v4704_v43 = vrot.slane %v5871_v50, 9  ;;  %v6614_v16 = vld [vmem:[%s6008_s17 + $0x64] sm:$0xf] }
  0x73   : > { %5145 = vmatmul.mubr.bf16.vlgmr.msra.gmra.mrb[0].mxu1 %v4555_v49  ;;  %v4726_v62 = vcombine.low %v1860_v0, %v1863_v52  ;;  %v1875_v15 = vrot.slane %v1873_v44, 4  ;;  %v1876_v2 = vrot.slane %v6395_v54, 5  ;;  %v4557_v57 = vcombine.low %v6268_v9, %v6281_v40  ;;  %v5873_v49 = vld [vmem:[%s6008_s17 + $0x54] sm:$0xf] }
  0x74   : > { %5253 = vmatmul.mubr.bf16.gmra.mrb[12].mxu0 %v4691_v29  ;;  %5161 = vmatpush3.bf16.msra.mxu1 %v6463_v46  ;;  %v5705_v46 = vld [vmem:[%s7988_s1 + $0x188] sm:$0xff]   ;;  %v4705_v59 = vrot.slane %v5872_v47, 9  ;;  %v1882_v17 = vrot.slane %v1880_v20, 4  ;;  %v1883_v5 = vrot.slane %v6421_v4, 5  ;;  %v4558_v26 = vcombine.low %v6331_v8, %v6344_v1 }
  0x75   : > { %5272 = vmatprep.mubr.bf16.mxu0 %v4724_v24  ;;  %5148 = vmatprep.mubr.bf16.mxu1 %v4556_v42  ;;  %v1867_v54 = vsel %vm6036_vm2, %v4703_v34, %v1866_v51  ;;  %v1870_v6 = vsel %vm6036_vm2, %v1868_v13, %v1869_v61  ;;  %v1874_v4 = vsel %vm6036_vm2, %v4704_v43, %v1873_v44  ;;  %v1887_v45 = vrot.slane %v6141_v14, 5  ;;  %v5711_v42 = vld [vmem:[%s7988_s1 + $0x198] sm:$0xff]   ;;  %v8023_v13 = vld [vmem:[#allocation2_spill] sm:$0xff] }
  0x76   : > { %5162 = vmatprep.subr.bf16.mxu1 %v5704_v32  ;;  %v1877_v60 = vsel %vm6036_vm2, %v1875_v15, %v1876_v2  ;;  %v915_v24 = vrot.slane %v6172_v30, 5  ;;  %v6601_v58 = vsel %vm6036_vm2, %v1882_v17, %v1883_v5  ;;  %v918_v14 = vrot.slane %v6179_v35, 5  ;;  %v5715_v2 = vld [vmem:[%s7988_s1 + $0x1a0] sm:$0xff]  }
  0x77   : > { %v4559_v30 = vcombine.low %v6361_v3, %v6364_v48  ;;  %v4560_v33 = vcombine.low %v6424_v7, %v6439_v63  ;;  %v4728_v29 = vcombine.low %v1874_v4, %v1877_v60  ;;  %v4706_v12 = vrot.slane %v5873_v49, 9 }
  0x78   : > { %5163 = vmatpush3.bf16.msra.mxu1 %v5704_v32  ;;  %v1890_v35 = vrot.slane %v6483_v27, 5  ;;  %v1894_v31 = vrot.slane %v6614_v16, 5  ;;  %v1889_v32 = vrot.slane %v1887_v45, 4  ;;  %v4570_v51 = vrot.slane %v6169_v28, 9 }
  0x79   : > { %5164 = vmatprep.subr.bf16.mxu1 %v5708_v53  ;;  %v917_v44 = vrot.slane %v915_v24, 4  ;;  %v4572_v0 = vrot.slane %v6245_v38, 9  ;;  %v929_v27 = vrot.slane %v6248_v39, 5  ;;  %v932_v52 = vrot.slane %v6264_v41, 5  ;;  %v5716_v38 = vld [vmem:[%s7988_s1 + $0xa8] sm:$0xff]  }
  0x7a   : > { %v1897_v34 = vrot.slane %v6502_v23, 5  ;;  %v936_v61 = vrot.slane %v6281_v40, 5  ;;  %v939_v28 = vrot.slane %v8023_v13, 5  ;;  %v1888_v39 = vsel %vm6036_vm2, %v4706_v12, %v1887_v45  ;;  %v6643_v23 = vld [vmem:[%s6008_s17 + $0x10] sm:$0xf]  ;;  %v8025_v45 = vld [vmem:[#allocation4_spill] sm:$0xff] }
  0x7b   : > { %5149 = vmatmul.mubr.bf16.gmra.mrb[4].mxu1 %v4557_v57  ;;  %v1896_v41 = vrot.slane %v1894_v31, 4  ;;  %v931_v50 = vrot.slane %v929_v27, 4  ;;  %v1891_v40 = vsel %vm6036_vm2, %v1889_v32, %v1890_v35  ;;  %v922_v43 = vrot.slane %v6643_v23, 5  ;;  %v5878_v12 = vld [vmem:[%s6008_s17 + $0xc] sm:$0xf]  ;;  %v5722_v32 = vld [vmem:[%s7988_s1 + $0xb8] sm:$0xff]  }
  0x7c   : > { %5273 = vmatmul.mubr.bf16.vlgmr.msra.gmra.mrb[0].mxu0 %v4725_v56  ;;  %5165 = vmatpush3.bf16.msra.mxu1 %v5708_v53  ;;  %v4727_v56 = vcombine.low %v1867_v54, %v1870_v6  ;;  %v5875_v53 = vld [vmem:[%s6008_s17 + $0x60] sm:$0xf]  ;;  %v938_v15 = vrot.slane %v936_v61, 4  ;;  %v919_v57 = vsel %vm6036_vm2, %v917_v44, %v918_v14  ;;  %v8024_v54 = vld [vmem:[#allocation3_spill] sm:$0xff]  ;;  %v4575_v4 = vrot.slane %v6361_v3, 9  ;;  %v5717_v3 = vld [vmem:[%s7988_s1 + $0x1a8] sm:$0xff]  }
  0x7d   : > { %5289 = vmatpush3.bf16.msra.mxu0 %v5703_v21  ;;  %5276 = vmatprep.mubr.bf16.mxu0 %v4726_v62  ;;  %v6597_v21 = vsel %vm6036_vm2, %v4705_v59, %v1880_v20  ;;  %v4573_v20 = vrot.slane %v6268_v9, 9  ;;  %v4707_v18 = vrot.slane %v5875_v53, 9  ;;  %v6638_v9 = vsel %vm6036_vm2, %v4572_v0, %v929_v27 }
  0x7e   : > { %5290 = vmatprep.subr.bf16.mxu0 %v5705_v46  ;;  %5152 = vmatprep.mubr.bf16.mxu1 %v4558_v26  ;;  %v4729_v37 = vcombine.low %v6597_v21, %v6601_v58  ;;  %v6659_v47 = vsel %vm6036_vm2, %v931_v50, %v932_v52  ;;  %v4574_v59 = vrot.slane %v6331_v8, 9  ;;  %v6666_v5 = vsel %vm6036_vm2, %v938_v15, %v939_v28  ;;  %v5721_v58 = vld [vmem:[%s7988_s1 + $0x1b0] sm:$0xff]   ;;  %v8026_v52 = vld [vmem:[#allocation5_spill] sm:$0xff] }
  0x7f   : > { %5166 = vmatprep.subr.bf16.mxu1 %v5710_v11  ;;  %v6648_v62 = vsel %vm6036_vm2, %v4573_v20, %v936_v61  ;;  %v4596_v17 = vcombine.low %v6638_v9, %v6659_v47  ;;  %v943_v26 = vrot.slane %v6344_v1, 5  ;;  %v946_v6 = vrot.slane %v8024_v54, 5  ;;  %v6776_v54 = vld [vmem:[%s6008_s17 + $0x34] sm:$0xf]  ;;  %v6792_v47 = vld [vmem:[%s6008_s17 + $0x3c] sm:$0xf] }
  0x80   : > { %5167 = vmatpush3.bf16.msra.mxu1 %v5710_v11  ;;  %v5720_v11 = vld [vmem:[%s7988_s1 + $0xb0] sm:$0xff]   ;;  %v4597_v8 = vcombine.low %v6648_v62, %v6666_v5  ;;  %v950_v60 = vrot.slane %v6364_v48, 5  ;;  %v4730_v1 = vcombine.low %v1888_v39, %v1891_v40  ;;  %v4561_v48 = vcombine.low %v6448_v55, %v6456_v36  ;;  %v5723_v40 = vld [vmem:[%s7988_s1 + $0x1b8] sm:$0xff]  }
  0x81   : > { %5291 = vmatpush3.bf16.msra.mxu0 %v5705_v46  ;;  %5168 = vmatprep.subr.bf16.mxu1 %v5714_v25  ;;  %v916_v46 = vsel %vm6036_vm2, %v4570_v51, %v915_v24  ;;  %v953_v24 = vrot.slane %v8025_v45, 5  ;;  %v4571_v35 = vrot.slane %v5878_v12, 9  ;;  %v924_v16 = vrot.slane %v922_v43, 4  ;;  %v6710_v51 = vld [vmem:[%s6008_s17 + $0x18] sm:$0xf] }
  0x82   : > { %5292 = vmatprep.subr.bf16.mxu0 %v5709_v22  ;;  %v4594_v49 = vcombine.low %v916_v46, %v919_v57  ;;  %v4576_v21 = vrot.slane %v6424_v7, 9  ;;  %v957_v27 = vrot.slane %v6439_v63, 5  ;;  %v960_v20 = vrot.slane %v8026_v52, 5  ;;  %v6764_v46 = vld [vmem:[%s6008_s17 + $0x24] sm:$0xf] }
  0x83   : > { %5153 = vmatmul.mubr.bf16.gmra.mrb[8].mxu1 %v4559_v30  ;;  %v945_v30 = vrot.slane %v943_v26, 4  ;;  %v4577_v53 = vrot.slane %v6448_v55, 9  ;;  %v964_v7 = vrot.slane %v6456_v36, 5  ;;  %v923_v13 = vsel %vm6036_vm2, %v4571_v35, %v922_v43  ;;  %v5726_v57 = vld [vmem:[%s7988_s1 + $0x1c0] sm:$0xff]  }
  0x84   : > { %5277 = vmatmul.mubr.bf16.gmra.mrb[4].mxu0 %v4727_v56  ;;  %5169 = vmatpush3.bf16.msra.mxu1 %v5714_v25  ;;  %v6681_v56 = vsel %vm6036_vm2, %v4574_v59, %v943_v26  ;;  %v6692_v25 = vsel %vm6036_vm2, %v4575_v4, %v950_v60  ;;  %v6740_v55 = vsel %vm6036_vm2, %v4576_v21, %v957_v27  ;;  %v959_v28 = vrot.slane %v957_v27, 4  ;;  %v6770_v59 = vld [vmem:[%s6008_s17 + $0x28] sm:$0xf]  ;;  %v6773_v26 = vld [vmem:[%s6008_s17 + $0x30] sm:$0xf] }
  0x85   : > { %5293 = vmatpush3.bf16.msra.mxu0 %v5709_v22  ;;  %5280 = vmatprep.mubr.bf16.mxu0 %v4728_v29  ;;  %v5877_v22 = vld [vmem:[%s6008_s17 + $0x14] sm:$0x1]  ;;  %v952_v29 = vrot.slane %v950_v60, 4  ;;  %v6744_v36 = vsel %vm6036_vm2, %v4577_v53, %v964_v7  ;;  %v966_v39 = vrot.slane %v964_v7, 4  ;;  %v2364_v4 = vshrl.u32 %v6710_v51, 16  ;;  %v5727_v60 = vld [vmem:[%s7988_s1 + $0x1c8] sm:$0xff]  }
  0x86   : > { %5294 = vmatprep.subr.bf16.mxu0 %v5711_v42  ;;  %5156 = vmatprep.mubr.bf16.mxu1 %v4560_v33  ;;  %v925_v14 = vrot.slane %v5877_v22, 5  ;;  %v1895_v33 = vsel %vm6036_vm2, %v4707_v18, %v1894_v31  ;;  %v1898_v31 = vsel %vm6036_vm2, %v1896_v41, %v1897_v34  ;;  %v6728_v18 = vld [vmem:[%s6008_s17 + $0x1c] sm:$0xf]  ;;  %v8027_v34 = vld [vmem:[#allocation6_spill] sm:$0xff]  ;;  %v6750_v50 = vsel %vm6036_vm2, %v959_v28, %v960_v20  ;;  %v6821_v35 = vld [vmem:[%s6008_s17 + $0x20] sm:$0x1] }
  0x87   : > { %5170 = vmatprep.subr.bf16.mxu1 %v5716_v38  ;;  %v6716_v0 = vsel %vm6036_vm2, %v952_v29, %v953_v24  ;;  %v967_v61 = vrot.slane %v8027_v34, 5  ;;  %v4782_v41 = vcombine.low %v6710_v51, %v6728_v18  ;;  %v4600_v43 = vcombine.low %v6740_v55, %v6750_v50  ;;  %v6839_v27 = vld [vmem:[%s6008_s17 + $0x58] sm:$0xf]  ;;  %v6844_v53 = vld [vmem:[%s6008_s17 + $0x60] sm:$0xf] }
  0x88   : > { %5171 = vmatpush3.bf16.msra.mxu1 %v5716_v38  ;;  %v926_v63 = vsel %vm6036_vm2, %v924_v16, %v925_v14  ;;  %v4731_v38 = vcombine.low %v1895_v33, %v1898_v31  ;;  %v2367_v45 = vshll.u32 %v6710_v51, 16  ;;  %v2377_v9 = vshrl.u32 %v6728_v18, 16  ;;  %v5730_v14 = vld [vmem:[%s7988_s1 + $0x1d0] sm:$0xff]   ;;  %v6847_v7 = vld [vmem:[%s6008_s17 + $0x64] sm:$0xf] }
  0x89   : > { %5295 = vmatpush3.bf16.msra.mxu0 %v5711_v42  ;;  %v6699_v42 = vsel %vm6036_vm2, %v945_v30, %v946_v6  ;;  %5172 = vmatprep.subr.bf16.mxu1 %v5720_v11  ;;  %v4595_v23 = vcombine.low %v923_v13, %v926_v63  ;;  %v6759_v15 = vsel %vm6036_vm2, %v966_v39, %v967_v61  ;;  %v2388_v24 = vshrl.u32 %v6764_v46, 16  ;;  %v6806_v30 = vld [vmem:[%s6008_s17 + $0x4c] sm:$0xf]  ;;  %v5734_v63 = vld [vmem:[%s7988_s1 + $0x1e0] sm:$0xff]  }
  0x8a   : > { %5296 = vmatprep.subr.bf16.mxu0 %v5715_v2  ;;  %v4598_v44 = vcombine.low %v6681_v56, %v6699_v42  ;;  %v4783_v6 = vcombine.low %v6764_v46, %v6770_v59  ;;  %v2391_v22 = vshll.u32 %v6764_v46, 16  ;;  %v2415_v33 = vshll.u32 %v6773_v26, 16  ;;  %v5731_v56 = vld [vmem:[%s7988_s1 + $0x1d8] sm:$0xff]   ;;  %v6851_v61 = vld [vmem:[%s6008_s17 + $0x2c] sm:$0x1] }
  0x8b   : > { %5157 = vmatmul.mubr.bf16.gmra.mrb[12].mxu1 %v4561_v48  ;;  %v2412_v48 = vshrl.u32 %v6773_v26, 16  ;;  %v2425_v29 = vshrl.u32 %v6776_v54, 16  ;;  %v2373_v12 = vshll.u32 %v6728_v18, 16  ;;  %v2366_v16 = vrot.slane %v2364_v4, 4 }
  0x8c   : > { %5281 = vmatmul.mubr.bf16.gmra.mrb[8].mxu0 %v4729_v37  ;;  %v4599_v37 = vcombine.low %v6692_v25, %v6716_v0  ;;  %5173 = vmatpush3.bf16.msra.mxu1 %v5720_v11  ;;  %v4784_v11 = vcombine.low %v6773_v26, %v6776_v54  ;;  %v2369_v62 = vrot.slane %v2367_v45, 5  ;;  %v2379_v20 = vrot.slane %v2377_v9, 4 }
  0x8d   : > { %5297 = vmatpush3.bf16.msra.mxu0 %v5715_v2  ;;  %5284 = vmatprep.mubr.bf16.mxu0 %v4730_v1  ;;  %v4601_v2 = vcombine.low %v6744_v36, %v6759_v15  ;;  %v6803_v1 = vld [vmem:[%s6008_s17 + $0x48] sm:$0xf]  ;;  %v6841_v52 = vrot.slane %v2373_v12, 5  ;;  %v2383_v34 = vshll.u32 %v6821_v35, 16  ;;  %v2421_v13 = vshll.u32 %v6776_v54, 16  ;;  %v5739_v15 = vld [vmem:[%s7988_s1 + $0x1f8] sm:$0xff]  }
  0x8e   : > { %5298 = vmatprep.subr.bf16.mxu0 %v5717_v3  ;;  %5176 = vmatprep.mubr.bf16.mxu1 %v4594_v49  ;;  %v2436_v49 = vshrl.u32 %v6792_v47, 16  ;;  %v4786_v42 = vcombine.low %v6803_v1, %v6806_v30  ;;  %v2463_v21 = vshll.u32 %v6803_v1, 16  ;;  %v2370_v28 = vor.u32 %v2369_v62, %v2366_v16  ;;  %v6886_v12 = vld [vmem:[%s6008_s17 + $0x6c] sm:$0xf]  ;;  %v6889_v16 = vld [vmem:[%s6008_s17 + $0x70] sm:$0xf] }
  0x8f   : > { %5174 = vmatprep.subr.bf16.mxu1 %v5722_v32  ;;  %v2393_v39 = vrot.slane %v2391_v22, 5  ;;  %v2380_v4 = vor.u32 %v2379_v20, %v6841_v52  ;;  %v6873_v9 = vrot.slane %v2421_v13, 5  ;;  %v2427_v25 = vrot.slane %v2425_v29, 4 }
  0x90   : > { %5175 = vmatpush3.bf16.msra.mxu1 %v5722_v32  ;;  %v2397_v32 = vshll.u32 %v6770_v59, 16  ;;  %v2407_v22 = vshll.u32 %v6851_v61, 16  ;;  %v2371_v55 = vrot.slane %v2370_v28, 4  ;;  %v2385_v50 = vrot.slane %v2383_v34, 5 }
  0x91   : > { %5299 = vmatpush3.bf16.msra.mxu0 %v5717_v3  ;;  %v2401_v3 = vshrl.u32 %v6770_v59, 16  ;;  %v2497_v29 = vshrl.u32 %v6839_v27, 16  ;;  %v2428_v62 = vor.u32 %v2427_v25, %v6873_v9  ;;  %v2438_v34 = vrot.slane %v2436_v49, 4 }
  0x92   : > { %5300 = vmatprep.subr.bf16.mxu0 %v5721_v58  ;;  %v2409_v20 = vrot.slane %v2407_v22, 5  ;;  %v4789_v36 = vcombine.low %v6886_v12, %v6889_v16  ;;  %v4831_v10 = vrot.slane %v6764_v46, 9 }
  0x93   : > { %5177 = vmatmul.mubr.bf16.vlgmr.msra.gmra.mrb[0].mxu1 %v4595_v23  ;;  %v2414_v23 = vrot.slane %v2412_v48, 4  ;;  %v2381_v48 = vrot.slane %v2380_v4, 4 }
  0x94   : > { %5285 = vmatmul.mubr.bf16.gmra.mrb[12].mxu0 %v4731_v38  ;;  %5180 = vmatprep.mubr.bf16.mxu1 %v4596_v17  ;;  %v6795_v17 = vld [vmem:[%s6008_s17 + $0x40] sm:$0xf]  ;;  %v2390_v38 = vrot.slane %v2388_v24, 4 }
  0x95   : > { %5301 = vmatpush3.bf16.msra.mxu0 %v5721_v58  ;;  %5304 = vmatprep.mubr.bf16.mxu0 %v4782_v41  ;;  %v4785_v5 = vcombine.low %v6792_v47, %v6795_v17  ;;  %v2449_v31 = vshrl.u32 %v6795_v17, 16  ;;  %v6836_v58 = vld [vmem:[%s6008_s17 + $0x54] sm:$0xf]  ;;  %v6857_v41 = vrot.slane %v2397_v32, 5  ;;  %v2386_v49 = vsel %vm6215_vm5, %v2381_v48, %v2385_v50 }
  0x96   : > { %5302 = vmatprep.subr.bf16.mxu0 %v5723_v40  ;;  %v4787_v45 = vcombine.low %v6836_v58, %v6839_v27  ;;  %v2487_v0 = vshll.u32 %v6836_v58, 16  ;;  %v2394_v24 = vor.u32 %v2393_v39, %v2390_v38  ;;  %v2469_v39 = vshll.u32 %v6806_v30, 16 }
  0x98   : > { %v2395_v32 = vrot.slane %v2394_v24, 4  ;;  %v6926_v25 = vrot.slane %v2469_v39, 5 }
  0x99   : > { %5303 = vmatpush3.bf16.msra.mxu0 %v5723_v40  ;;  %v2403_v40 = vrot.slane %v2401_v3, 4 }
  0x9a   : > { %5320 = vmatprep.subr.bf16.mxu0 %v5726_v57  ;;  %v2400_v24 = vsel %vm6215_vm5, %v2395_v32, %v6857_v41 }
  0x9b   : > { %5181 = vmatmul.mubr.bf16.gmra.mrb[4].mxu1 %v4597_v8  ;;  %v2439_v8 = vshll.u32 %v6792_v47, 16 }
  0x9c   : > { %5305 = vmatmul.mubr.bf16.vlgmr.msra.gmra.mrb[0].mxu0 %v4783_v6  ;;  %5184 = vmatprep.mubr.bf16.mxu1 %v4598_v44  ;;  %v2460_v44 = vshrl.u32 %v6803_v1, 16  ;;  %v2473_v6 = vshrl.u32 %v6806_v30, 16 }
  0x9d   : > { %5321 = vmatpush3.bf16.msra.mxu0 %v5726_v57  ;;  %5308 = vmatprep.mubr.bf16.mxu0 %v4784_v11  ;;  %v2417_v57 = vrot.slane %v2415_v33, 5  ;;  %v2484_v11 = vshrl.u32 %v6836_v58, 16  ;;  %v2441_v38 = vrot.slane %v2439_v8, 5  ;;  %v2451_v8 = vrot.slane %v2449_v31, 4 }
  0x9e   : > { %5322 = vmatprep.subr.bf16.mxu0 %v5727_v60  ;;  %v2475_v31 = vrot.slane %v2473_v6, 4 }
  0x9f   : > { %v2418_v3 = vor.u32 %v2417_v57, %v2414_v23  ;;  %v6911_v23 = vld [vmem:[%s6008_s17 + $0x44] sm:$0x1]  ;;  %v2429_v57 = vrot.slane %v2428_v62, 4  ;;  %v2517_v62 = vshll.u32 %v6847_v7, 16 }
  0xa1   : > { %5323 = vmatpush3.bf16.msra.mxu0 %v5727_v60  ;;  %v6866_v60 = vld [vmem:[%s6008_s17 + $0x38] sm:$0x1]  ;;  %v2419_v28 = vrot.slane %v2418_v3, 4  ;;  %v2476_v3 = vor.u32 %v2475_v31, %v6926_v25  ;;  %v6970_v31 = vld [vmem:[%s6008_s17 + $0x68] sm:$0x1] }
  0xa2   : > { %5324 = vmatprep.subr.bf16.mxu0 %v5730_v14  ;;  %v2431_v33 = vshll.u32 %v6866_v60, 16 }
  0xa3   : > { %5185 = vmatmul.mubr.bf16.gmra.mrb[8].mxu1 %v4599_v37  ;;  %v4788_v37 = vcombine.low %v6844_v53, %v6847_v7  ;;  %v2477_v39 = vrot.slane %v2476_v3, 4 }
  0xa4   : > { %5309 = vmatmul.mubr.bf16.gmra.mrb[4].mxu0 %v4785_v5  ;;  %5188 = vmatprep.mubr.bf16.mxu1 %v4600_v43  ;;  %v2404_v43 = vor.u32 %v2403_v40, %v6857_v41  ;;  %v2445_v5 = vshll.u32 %v6795_v17, 16  ;;  %v2376_v40 = vsel %vm6215_vm5, %v2371_v55, %v6841_v52  ;;  %v2465_v52 = vrot.slane %v2463_v21, 5  ;;  %v5740_v41 = vld [vmem:[%s7988_s1 + $0x200] sm:$0xff]  }
  0xa5   : > { %5325 = vmatpush3.bf16.msra.mxu0 %v5730_v14  ;;  %5312 = vmatprep.mubr.bf16.mxu0 %v4786_v42  ;;  %v5735_v14 = vld [vmem:[%s7988_s1 + $0x1e8] sm:$0xff]   ;;  %v5738_v42 = vld [vmem:[%s7988_s1 + $0x1f0] sm:$0xff]   ;;  %v2442_v55 = vor.u32 %v2441_v38, %v2438_v34  ;;  %v2424_v21 = vsel %vm6215_vm5, %v2419_v28, %v6873_v9  ;;  %v2493_v9 = vshll.u32 %v6839_v27, 16  ;;  %v2486_v28 = vrot.slane %v2484_v11, 4 }
  0xa6   : > { %5326 = vmatprep.subr.bf16.mxu0 %v5731_v56  ;;  %v2405_v13 = vrot.slane %v2404_v43, 4  ;;  %v6915_v4 = vrot.slane %v2445_v5, 5  ;;  %v2511_v43 = vshll.u32 %v6844_v53, 16  ;;  %v2489_v38 = vrot.slane %v2487_v0, 5 }
  0xa7   : > { %v2519_v0 = vrot.slane %v2517_v62, 5 }
  0xa8   : > { %v2410_v22 = vsel %vm6215_vm5, %v2405_v13, %v2409_v20 }
  0xa9   : > { %5327 = vmatpush3.bf16.msra.mxu0 %v5731_v56  ;;  %v2508_v56 = vshrl.u32 %v6844_v53, 16  ;;  %v4815_v5 = vcombine.low %v2400_v24, %v2410_v22 }
  0xaa   : > { %5328 = vmatprep.subr.bf16.mxu0 %v5734_v63 }
  0xab   : > { %5189 = vmatmul.mubr.bf16.gmra.mrb[12].mxu1 %v4601_v2  ;;  %v2462_v2 = vrot.slane %v2460_v44, 4  ;;  %v2455_v44 = vshll.u32 %v6911_v23, 16  ;;  %v2510_v11 = vrot.slane %v2508_v56, 4  ;;  %v2490_v56 = vor.u32 %v2489_v38, %v2486_v28  ;;  %v6992_v28 = vld [vmem:[%s6008_s17 + $0x74] sm:$0x1] }
  0xac   : > { %5313 = vmatmul.mubr.bf16.gmra.mrb[8].mxu0 %v4787_v45  ;;  %v4814_v45 = vcombine.low %v2376_v40, %v2386_v49  ;;  %v6957_v49 = vld [vmem:[%s6008_s17 + $0x5c] sm:$0x1] }
  0xad   : > { %5329 = vmatpush3.bf16.msra.mxu0 %v5734_v63  ;;  %5316 = vmatprep.mubr.bf16.mxu0 %v4788_v37  ;;  %v2433_v63 = vrot.slane %v2431_v33, 5  ;;  %v6929_v37 = vld [vmem:[%s6008_s17 + $0x50] sm:$0x1]  ;;  %v2466_v50 = vor.u32 %v2465_v52, %v2462_v2  ;;  %v2521_v33 = vshrl.u32 %v6847_v7, 16  ;;  %v2457_v20 = vrot.slane %v2455_v44, 5  ;;  %s4517_s17 = sshll.u32 %s8039_s22, 5 }
  0xae   : > { %5330 = vmatprep.subr.bf16.mxu0 %v5735_v14  ;;  %v2479_v48 = vshll.u32 %v6929_v37, 16  ;;  %v2535_v52 = vshll.u32 %v6886_v12, 16  ;;  %v2503_v22 = vshll.u32 %v6957_v49, 16  ;;  %s271_s20 = sadd.s32 %s4517_s17, %s8041_s19 }
  0xaf   : > { %v2434_v6 = vsel %vm6215_vm5, %v2429_v57, %v2433_v63  ;;  %v2467_v13 = vrot.slane %v2466_v50, 4  ;;  %v2495_v63 = vrot.slane %v2493_v9, 5  ;;  %v5741_v57 = vld [vmem:[%s7988_s1 + $0x208] sm:$0xff]   ;;  %v2523_v2 = vrot.slane %v2521_v33, 4  ;;  %s4518_s29 = sshll.u32 %s271_s20, 3 }
  0xb0   : > { %v4816_v32 = vcombine.low %v2424_v21, %v2434_v6  ;;  %v2481_v40 = vrot.slane %v2479_v48, 5  ;;  %v2541_v6 = vshll.u32 %v6889_v16, 16  ;;  %v2491_v48 = vrot.slane %v2490_v56, 4  ;;  %v5745_v56 = vld [vmem:[%s7988_s1 + $0x228] sm:$0xff]   ;;  %s7885_s9 = scalar_lea.vmem %s7993_s6, %s4518_s29 }
  0xb1   : > { %5331 = vmatpush3.bf16.msra.mxu0 %v5735_v14  ;;  %v2452_v14 = vor.u32 %v2451_v8, %v6915_v4  ;;  %v2499_v8 = vrot.slane %v2497_v29, 4  ;;  %v2524_v50 = vor.u32 %v2523_v2, %v2519_v0  ;;  %v2537_v62 = vrot.slane %v2535_v52, 5 }
  0xb2   : > { %5332 = vmatprep.subr.bf16.mxu0 %v5738_v42  ;;  %v2482_v44 = vsel %vm6215_vm5, %v2477_v39, %v2481_v40  ;;  %v2496_v38 = vsel %vm6215_vm5, %v2491_v48, %v2495_v63  ;;  %v2775_v2 = vrot.slane %v6728_v18, 5 }
  0xb3   : > { %v2453_v34 = vrot.slane %v2452_v14, 4  ;;  %v2500_v21 = vor.u32 %v2499_v8, %v2495_v63 }
  0xb4   : > { %5317 = vmatmul.mubr.bf16.gmra.mrb[12].mxu0 %v4789_v36  ;;  %v2513_v36 = vrot.slane %v2511_v43, 5  ;;  %v2527_v43 = vshll.u32 %v6970_v31, 16 }
  0xb5   : > { %5333 = vmatpush3.bf16.msra.mxu0 %v5738_v42  ;;  %5336 = vmatprep.mubr.bf16.mxu0 %v4814_v45  ;;  %v2443_v42 = vrot.slane %v2442_v55, 4  ;;  %v2545_v45 = vshrl.u32 %v6889_v16, 16  ;;  %v2458_v24 = vsel %vm6215_vm5, %v2453_v34, %v2457_v20  ;;  %v2472_v55 = vsel %vm6215_vm5, %v2467_v13, %v6926_v25 }
  0xb6   : > { %5334 = vmatprep.subr.bf16.mxu0 %v5739_v15  ;;  %v2514_v14 = vor.u32 %v2513_v36, %v2510_v11  ;;  %v4818_v3 = vcombine.low %v2472_v55, %v2482_v44  ;;  %v2505_v25 = vrot.slane %v2503_v22, 5  ;;  %v2501_v33 = vrot.slane %v2500_v21, 4  ;;  %v5744_v11 = vld [vmem:[%s7988_s1 + $0x220] sm:$0xff]  }
  0xb7   : > { %v2448_v29 = vsel %vm6215_vm5, %v2443_v42, %v6915_v4  ;;  %v5742_v4 = vld [vmem:[%s7988_s1 + $0x210] sm:$0xff]   ;;  %v5743_v42 = vld [vmem:[%s7988_s1 + $0x218] sm:$0xff]   ;;  %v2525_v34 = vrot.slane %v2524_v50, 4  ;;  %v2529_v13 = vrot.slane %v2527_v43, 5  ;;  %v4830_v22 = vrot.slane %v6710_v51, 9 }
  0xb8   : > { %v2515_v20 = vrot.slane %v2514_v14, 4  ;;  %v2506_v39 = vsel %vm6215_vm5, %v2501_v33, %v2505_v25  ;;  %v2777_v55 = vrot.slane %v2775_v2, 4  ;;  %v2782_v21 = vrot.slane %v6770_v59, 5 }
  0xb9   : > { %5335 = vmatpush3.bf16.msra.mxu0 %v5739_v15  ;;  %v2532_v15 = vshrl.u32 %v6886_v12, 16  ;;  %v2530_v63 = vsel %vm6215_vm5, %v2525_v34, %v2529_v13  ;;  %v2776_v51 = vsel %vm6036_vm2, %v4830_v22, %v2775_v2  ;;  %v2785_v59 = vrot.slane %v6851_v61, 5  ;;  %v5752_v22 = vld [vmem:[%s7989_s2 + $0x20] sm:$0xff]  }
  0xba   : > { %5352 = vmatprep.subr.bf16.mxu0 %v5740_v41  ;;  %v2520_v36 = vsel %vm6215_vm5, %v2515_v20, %v2519_v0  ;;  %v2778_v0 = vrot.slane %v6821_v35, 5  ;;  %v2784_v43 = vrot.slane %v2782_v21, 4  ;;  %v2792_v25 = vrot.slane %v6866_v60, 5 }
  0xbb   : > { %v2534_v9 = vrot.slane %v2532_v15, 4  ;;  %v4819_v15 = vcombine.low %v2496_v38, %v2506_v39  ;;  %v4820_v52 = vcombine.low %v2520_v36, %v2530_v63  ;;  %v2796_v61 = vrot.slane %v6795_v17, 5 }
  0xbc   : > { %5337 = vmatmul.mubr.bf16.vlgmr.msra.gmra.mrb[0].mxu0 %v4815_v5  ;;  %v2543_v5 = vrot.slane %v2541_v6, 5  ;;  %v5746_v6 = vld [vmem:[%s7988_s1 + $0x230] sm:$0xff]   ;;  %v2779_v35 = vsel %vm6036_vm2, %v2777_v55, %v2778_v0  ;;  %v2786_v46 = vsel %vm6036_vm2, %v2784_v43, %v2785_v59  ;;  %v2803_v60 = vrot.slane %v6806_v30, 5  ;;  %v5753_v55 = vld [vmem:[%s7989_s2 + $0x28] sm:$0xff]  }
  0xbd   : > { %5353 = vmatpush3.bf16.msra.mxu0 %v5740_v41  ;;  %5340 = vmatprep.mubr.bf16.mxu0 %v4816_v32  ;;  %v4817_v41 = vcombine.low %v2448_v29, %v2458_v24  ;;  %v2547_v32 = vrot.slane %v2545_v45, 4  ;;  %v2538_v40 = vor.u32 %v2537_v62, %v2534_v9  ;;  %v4854_v50 = vcombine.low %v2776_v51, %v2779_v35  ;;  %v5754_v0 = vld [vmem:[%s7989_s2 + $0x30] sm:$0xff]  }
  0xbe   : > { %5354 = vmatprep.subr.bf16.mxu0 %v5741_v57  ;;  %v4834_v20 = vrot.slane %v6803_v1, 9  ;;  %v2805_v17 = vrot.slane %v2803_v60, 4  ;;  %v2806_v34 = vrot.slane %v6929_v37, 5  ;;  %v2810_v38 = vrot.slane %v6839_v27, 5 }
  0xbf   : > { %v2548_v8 = vor.u32 %v2547_v32, %v2543_v5  ;;  %v2539_v45 = vrot.slane %v2538_v40, 4  ;;  %v2798_v32 = vrot.slane %v2796_v61, 4  ;;  %v2817_v1 = vrot.slane %v6847_v7, 5 }
  0xc0   : > { %v4835_v40 = vrot.slane %v6836_v58, 9  ;;  %v2820_v27 = vrot.slane %v6970_v31, 5  ;;  %v2824_v2 = vrot.slane %v6889_v16, 5  ;;  %v4837_v31 = vrot.slane %v6886_v12, 9  ;;  %v5749_v12 = vld [vmem:[%s7989_s2 + $0x8] sm:$0xff]  }
  0xc1   : > { %5355 = vmatpush3.bf16.msra.mxu0 %v5741_v57  ;;  %v2551_v57 = vshll.u32 %v6992_v28, 16  ;;  %v2549_v29 = vrot.slane %v2548_v8, 4  ;;  %v2544_v18 = vsel %vm6215_vm5, %v2539_v45, %v2543_v5  ;;  %v4833_v5 = vrot.slane %v6792_v47, 9 }
  0xc2   : > { %5356 = vmatprep.subr.bf16.mxu0 %v5742_v4  ;;  %v2804_v47 = vsel %vm6036_vm2, %v4834_v20, %v2803_v60  ;;  %v2812_v8 = vrot.slane %v2810_v38, 4  ;;  %v2819_v36 = vrot.slane %v2817_v1, 4  ;;  %v2811_v63 = vsel %vm6036_vm2, %v4835_v40, %v2810_v38 }
  0xc3   : > { %v2553_v24 = vrot.slane %v2551_v57, 5  ;;  %v2797_v13 = vsel %vm6036_vm2, %v4833_v5, %v2796_v61  ;;  %v2813_v57 = vrot.slane %v6957_v49, 5  ;;  %v2827_v45 = vrot.slane %v6992_v28, 5  ;;  %v5750_v28 = vld [vmem:[%s7989_s2 + $0x10] sm:$0xff]  }
  0xc4   : > { %5341 = vmatmul.mubr.bf16.gmra.mrb[4].mxu0 %v4817_v41  ;;  %v5747_v41 = vld [vmem:[%s7988_s1 + $0x238] sm:$0xff]   ;;  %v2821_v49 = vsel %vm6036_vm2, %v2819_v36, %v2820_v27 }
  0xc5   : > { %5357 = vmatpush3.bf16.msra.mxu0 %v5742_v4  ;;  %5344 = vmatprep.mubr.bf16.mxu0 %v4818_v3  ;;  %v2554_v44 = vsel %vm6215_vm5, %v2549_v29, %v2553_v24  ;;  %v2789_v4 = vrot.slane %v6776_v54, 5  ;;  %v4832_v3 = vrot.slane %v6773_v26, 9  ;;  %v2783_v54 = vsel %vm6036_vm2, %v4831_v10, %v2782_v21 }
  0xc6   : > { %5358 = vmatprep.subr.bf16.mxu0 %v5743_v42  ;;  %v4821_v14 = vcombine.low %v2544_v18, %v2554_v44  ;;  %v4855_v33 = vcombine.low %v2783_v54, %v2786_v46  ;;  %v2814_v7 = vsel %vm6036_vm2, %v2812_v8, %v2813_v57  ;;  %v2825_v29 = vsel %vm6036_vm2, %v4837_v31, %v2824_v2  ;;  %v5755_v18 = vld [vmem:[%s7989_s2 + $0x38] sm:$0xff]   ;;  %v5756_v44 = vld [vmem:[%s7990_s3] sm:$0xff]  }
  0xc7   : > { %v2791_v48 = vrot.slane %v2789_v4, 4  ;;  %v2790_v9 = vsel %vm6036_vm2, %v4832_v3, %v2789_v4 }
  0xc9   : > { %5359 = vmatpush3.bf16.msra.mxu0 %v5743_v42  ;;  %v2793_v26 = vsel %vm6036_vm2, %v2791_v48, %v2792_v25  ;;  %v2799_v42 = vrot.slane %v6911_v23, 5  ;;  %v2807_v23 = vsel %vm6036_vm2, %v2805_v17, %v2806_v34 }
  0xca   : > { %5360 = vmatprep.subr.bf16.mxu0 %v5744_v11  ;;  %v4856_v62 = vcombine.low %v2790_v9, %v2793_v26  ;;  %v4858_v37 = vcombine.low %v2804_v47, %v2807_v23  ;;  %v7113_v9 = vld [vmem:[%s7992_s5] ss:$0 sm:$0xff] }
  0xcb   : > { %v2800_v30 = vsel %vm6036_vm2, %v2798_v32, %v2799_v42 }
  0xcc   : > { %5345 = vmatmul.mubr.bf16.gmra.mrb[8].mxu0 %v4819_v15  ;;  %v4857_v39 = vcombine.low %v2797_v13, %v2800_v30 }
  0xcd   : > { %5361 = vmatpush3.bf16.msra.mxu0 %v5744_v11  ;;  %5348 = vmatprep.mubr.bf16.mxu0 %v4820_v52  ;;  %v4836_v11 = vrot.slane %v6844_v53, 9  ;;  %v4859_v53 = vcombine.low %v2811_v63, %v2814_v7  ;;  %v2826_v52 = vrot.slane %v2824_v2, 4  ;;  %v5757_v7 = vld [vmem:[%s7990_s3 + $0x8] sm:$0xff]  }
  0xce   : > { %5362 = vmatprep.subr.bf16.mxu0 %v5745_v56 }
  0xcf   : > { %v2818_v58 = vsel %vm6036_vm2, %v4836_v11, %v2817_v1  ;;  %v2828_v16 = vsel %vm6036_vm2, %v2826_v52, %v2827_v45  ;;  %v5758_v52 = vld [vmem:[%s7990_s3 + $0x10] sm:$0xff]  }
  0xd0   : > { %v4860_v15 = vcombine.low %v2818_v58, %v2821_v49  ;;  %v4861_v24 = vcombine.low %v2825_v29, %v2828_v16 }
  0xd1   : > { %5363 = vmatpush3.bf16.msra.mxu0 %v5745_v56  ;;  %v5748_v56 = vld [vmem:[%s7989_s2] sm:$0xff]  }
  0xd2   : > { %5364 = vmatprep.subr.bf16.mxu0 %v5746_v6  ;;  %5384 = vmatprep.subr.bf16.mxu1 %v5748_v56 }
  0xd3   : > { %5385 = vmatpush3.bf16.msra.mxu1 %v5748_v56 }
  0xd4   : > { %5349 = vmatmul.mubr.bf16.gmra.mrb[12].mxu0 %v4821_v14  ;;  %5386 = vmatprep.subr.bf16.mxu1 %v5749_v12 }
  0xd5   : > { %5365 = vmatpush3.bf16.msra.mxu0 %v5746_v6  ;;  %5368 = vmatprep.mubr.bf16.mxu0 %v4854_v50 }
  0xd6   : > { %5366 = vmatprep.subr.bf16.mxu0 %v5747_v41 }
  0xd7   : > { %5387 = vmatpush3.bf16.msra.mxu1 %v5749_v12 }
  0xd8   : > { %5388 = vmatprep.subr.bf16.mxu1 %v5750_v28 }
  0xd9   : > { %5367 = vmatpush3.bf16.msra.mxu0 %v5747_v41 }
  0xdb   : > { %5389 = vmatpush3.bf16.msra.mxu1 %v5750_v28 }
  0xdc   : > { %5369 = vmatmul.mubr.bf16.vlgmr.msra.gmra.mrb[0].mxu0 %v4855_v33  ;;  %5390 = vmatprep.subr.bf16.mxu1 %v5751_v19 }
  0xdd   : > { %5372 = vmatprep.mubr.bf16.mxu0 %v4856_v62 }
  0xdf   : > { %5391 = vmatpush3.bf16.msra.mxu1 %v5751_v19 }
  0xe0   : > { %5392 = vmatprep.subr.bf16.mxu1 %v5752_v22 }
  0xe3   : > { %5393 = vmatpush3.bf16.msra.mxu1 %v5752_v22 }
  0xe4   : > { %5373 = vmatmul.mubr.bf16.gmra.mrb[4].mxu0 %v4857_v39  ;;  %5394 = vmatprep.subr.bf16.mxu1 %v5753_v55 }
  0xe5   : > { %5376 = vmatprep.mubr.bf16.mxu0 %v4858_v37 }
  0xe7   : > { %5395 = vmatpush3.bf16.msra.mxu1 %v5753_v55 }
  0xe8   : > { %5396 = vmatprep.subr.bf16.mxu1 %v5754_v0 }
  0xeb   : > { %5397 = vmatpush3.bf16.msra.mxu1 %v5754_v0 }
  0xec   : > { %5377 = vmatmul.mubr.bf16.gmra.mrb[8].mxu0 %v4859_v53  ;;  %5398 = vmatprep.subr.bf16.mxu1 %v5755_v18 }
  0xed   : > { %5380 = vmatprep.mubr.bf16.mxu0 %v4860_v15 }
  0xef   : > { %5399 = vmatpush3.bf16.msra.mxu1 %v5755_v18 }
  0xf0   : > { %5416 = vmatprep.subr.bf16.mxu1 %v5756_v44 }
  0xf4   : > { %5381 = vmatmul.mubr.bf16.gmra.mrb[12].mxu0 %v4861_v24 }
 0x166   : > { %v5178_v21 = vpop.f32.mrb[0].mxu1 }
 0x167   : > { %v1100_v6 = vpop.f32.mrb[1].mxu1 }
 0x168   : > { %v5179_v51 = vpop.f32.mrb[2].mxu1 }
 0x169   : > { %v1103_v35 = vpop.f32.mrb[3].mxu1 }
 0x16e   : > { %v5182_v4 = vpop.f32.mrb[4].mxu1 }
 0x16f   : > { %v1116_v14 = vpop.f32.mrb[5].mxu1 }
 0x170   : > { %v5183_v50 = vpop.f32.mrb[6].mxu1 }
 0x171   : > { %v1119_v10 = vpop.f32.mrb[7].mxu1 }
 0x176   : > { %v5186_v43 = vpop.f32.mrb[8].mxu1 }
 0x177   : > { %v1132_v59 = vpop.f32.mrb[9].mxu1 }
 0x178   : > { %v5187_v41 = vpop.f32.mrb[10].mxu1 }
 0x179   : > { %v1135_v3 = vpop.f32.mrb[11].mxu1 }
 0x17e   : > { %v7102_v48 = vpop.f32.mrb[12].mxu1 }
 0x17f   : > { %v7104_v25 = vpop.f32.mrb[13].mxu1 }
 0x180   : > { %v7106_v54 = vpop.f32.mrb[14].mxu1 }
 0x181   : > { %v7108_v46 = vpop.f32.mrb[15].mxu1 }
 0x1af   : > { %v5370_v61 = vpop.f32.mrb[0].mxu0 }
 0x1b0   : > { %v5480_v26 = vadd.f32 %v5370_v61, %v5178_v21  ;;  %v2960_v60 = vpop.f32.mrb[1].mxu0 }
 0x1b1   : > { %v5481_v33 = vadd.f32 %v2960_v60, %v1100_v6  ;;  %v5371_v62 = vpop.f32.mrb[2].mxu0 }
 0x1b2   : > { %v3046_v5 = vadd.f32 %v5480_v26, %v7113_v9  ;;  %v5482_v32 = vadd.f32 %v5371_v62, %v5179_v51  ;;  %v2963_v42 = vpop.f32.mrb[3].mxu0 }
 0x1b3   : > { %v3044_v20 = vadd.f32 %v5481_v33, %v7113_v9  ;;  %v5483_v17 = vadd.f32 %v2963_v42, %v1103_v35  ;;  %v5761_v42 = vld [vmem:[%s7990_s3 + $0x28] sm:$0xff]  }
 0x1b4   : > { %v3047_v34 = vadd.f32 %v5482_v32, %v7113_v9  ;;  %v3062_v30 = vmax.f32 %v3046_v5, 0.0 }
 0x1b5   : > { %v3045_v13 = vadd.f32 %v5483_v17, %v7113_v9  ;;  %v3060_v47 = vmax.f32 %v3044_v20, 0.0 }
 0x1b6   : > { %v3063_v38 = vmax.f32 %v3047_v34, 0.0 }
 0x1b7   : > { %v3061_v23 = vmax.f32 %v3045_v13, 0.0  ;;  %v5374_v1 = vpop.f32.mrb[4].mxu0 }
 0x1b8   : > { %v3077_v39 = vpack.c.bf16 %v3063_v38, %v3062_v30  ;;  %v5484_v37 = vadd.f32 %v5374_v1, %v5182_v4  ;;  %v2976_v40 = vpop.f32.mrb[5].mxu0 }
 0x1b9   : > { %v5485_v8 = vadd.f32 %v2976_v40, %v1116_v14  ;;  %v5375_v57 = vpop.f32.mrb[6].mxu0  ;;  %v3076_v11 = vpack.c.bf16 %v3061_v23, %v3060_v47  ;;  %v4871_v23 = vld [vmem:[%s7992_s5 + $0x1] ss:$0 sm:$0xff] }
 0x1ba   : > { %v3050_v36 = vadd.f32 %v5484_v37, %v7113_v9  ;;  %v5486_v27 = vadd.f32 %v5375_v57, %v5183_v50  ;;  %v2979_v63 = vpop.f32.mrb[7].mxu0  ;;  %v5760_v50 = vld [vmem:[%s7990_s3 + $0x20] sm:$0xff]  }
 0x1bb   : > { %v3048_v2 = vadd.f32 %v5485_v8, %v7113_v9  ;;  %v5487_v58 = vadd.f32 %v2979_v63, %v1119_v10  ;;  %5400 = vmatprep.mubr.bf16.mxu1 %v3076_v11 }
 0x1bc   : > { %v3051_v49 = vadd.f32 %v5486_v27, %v7113_v9  ;;  %5401 = vmatmul.mubr.bf16.vlgmr.msra.gmra.mrb[16].mxu1 %v3077_v39  ;;  %v3066_v15 = vmax.f32 %v3050_v36, 0.0 }
 0x1bd   : > { %v3049_v53 = vadd.f32 %v5487_v58, %v7113_v9  ;;  %5417 = vmatpush3.bf16.msra.mxu1 %v5756_v44  ;;  %v3064_v45 = vmax.f32 %v3048_v2, 0.0  ;;  %v5759_v44 = vld [vmem:[%s7990_s3 + $0x18] sm:$0xff]  }
 0x1be   : > { %v3067_v31 = vmax.f32 %v3051_v49, 0.0  ;;  %5418 = vmatprep.subr.bf16.mxu1 %v5757_v7 }
 0x1bf   : > { %v3065_v29 = vmax.f32 %v3049_v53, 0.0  ;;  %v5378_v16 = vpop.f32.mrb[8].mxu0 }
 0x1c0   : > { %v5488_v24 = vadd.f32 %v5378_v16, %v5186_v43  ;;  %v2992_v56 = vpop.f32.mrb[9].mxu0  ;;  %v3079_v12 = vpack.c.bf16 %v3067_v31, %v3066_v15 }
 0x1c1   : > { %v5489_v28 = vadd.f32 %v2992_v56, %v1132_v59  ;;  %v5379_v19 = vpop.f32.mrb[10].mxu0  ;;  %v3078_v22 = vpack.c.bf16 %v3065_v29, %v3064_v45  ;;  %5419 = vmatpush3.bf16.msra.mxu1 %v5757_v7 }
 0x1c2   : > { %v3054_v55 = vadd.f32 %v5488_v24, %v7113_v9  ;;  %v5490_v0 = vadd.f32 %v5379_v19, %v5187_v41  ;;  %v2995_v18 = vpop.f32.mrb[11].mxu0  ;;  %5420 = vmatprep.subr.bf16.mxu1 %v5758_v52 }
 0x1c3   : > { %v3052_v21 = vadd.f32 %v5489_v28, %v7113_v9  ;;  %v5491_v6 = vadd.f32 %v2995_v18, %v1135_v3  ;;  %5404 = vmatprep.mubr.bf16.mxu1 %v3078_v22 }
 0x1c4   : > { %v3055_v51 = vadd.f32 %v5490_v0, %v7113_v9  ;;  %5405 = vmatmul.mubr.bf16.gmra.mrb[20].mxu1 %v3079_v12  ;;  %v3070_v4 = vmax.f32 %v3054_v55, 0.0 }
 0x1c5   : > { %v3053_v35 = vadd.f32 %v5491_v6, %v7113_v9  ;;  %5421 = vmatpush3.bf16.msra.mxu1 %v5758_v52  ;;  %v3068_v10 = vmax.f32 %v3052_v21, 0.0 }
 0x1c6   : > { %v3071_v14 = vmax.f32 %v3055_v51, 0.0  ;;  %5422 = vmatprep.subr.bf16.mxu1 %v5759_v44 }
 0x1c7   : > { %v3069_v43 = vmax.f32 %v3053_v35, 0.0  ;;  %v5382_v59 = vpop.f32.mrb[12].mxu0 }
 0x1c8   : > { %v5492_v41 = vadd.f32 %v5382_v59, %v7102_v48  ;;  %v3008_v3 = vpop.f32.mrb[13].mxu0  ;;  %v3081_v61 = vpack.c.bf16 %v3071_v14, %v3070_v4 }
 0x1c9   : > { %v5493_v26 = vadd.f32 %v3008_v3, %v7104_v25  ;;  %v5383_v60 = vpop.f32.mrb[14].mxu0  ;;  %v3080_v33 = vpack.c.bf16 %v3069_v43, %v3068_v10  ;;  %5423 = vmatpush3.bf16.msra.mxu1 %v5759_v44 }
 0x1ca   : > { %v3058_v62 = vadd.f32 %v5492_v41, %v7113_v9  ;;  %v5494_v5 = vadd.f32 %v5383_v60, %v7106_v54  ;;  %v3011_v32 = vpop.f32.mrb[15].mxu0  ;;  %5424 = vmatprep.subr.bf16.mxu1 %v5760_v50 }
 0x1cb   : > { %v3056_v20 = vadd.f32 %v5493_v26, %v7113_v9  ;;  %v5495_v48 = vadd.f32 %v3011_v32, %v7108_v46  ;;  %5408 = vmatprep.mubr.bf16.mxu1 %v3080_v33  ;;  %v5762_v46 = vld [vmem:[%s7990_s3 + $0x30] sm:$0xff]  }
 0x1cc   : > { %v3059_v25 = vadd.f32 %v5494_v5, %v7113_v9  ;;  %5409 = vmatmul.mubr.bf16.gmra.mrb[24].mxu1 %v3081_v61  ;;  %v3074_v34 = vmax.f32 %v3058_v62, 0.0 }
 0x1cd   : > { %v3057_v17 = vadd.f32 %v5495_v48, %v7113_v9  ;;  %5425 = vmatpush3.bf16.msra.mxu1 %v5760_v50  ;;  %v3072_v54 = vmax.f32 %v3056_v20, 0.0  ;;  %v5763_v9 = vld [vmem:[%s7990_s3 + $0x38] sm:$0xff]  }
 0x1ce   : > { %v3075_v13 = vmax.f32 %v3059_v25, 0.0  ;;  %5426 = vmatprep.subr.bf16.mxu1 %v5761_v42 }
 0x1cf   : > { %v3073_v30 = vmax.f32 %v3057_v17, 0.0 }
 0x1d0   : > { %v3083_v38 = vpack.c.bf16 %v3075_v13, %v3074_v34  ;;  %v4880_v13 = vld [vmem:[%s7992_s5 + $0x2] ss:$0 sm:$0xff] }
 0x1d1   : > { %v3082_v47 = vpack.c.bf16 %v3073_v30, %v3072_v54  ;;  %5427 = vmatpush3.bf16.msra.mxu1 %v5761_v42 }
 0x1d2   : > { %5428 = vmatprep.subr.bf16.mxu1 %v5762_v46 }
 0x1d3   : > { %5412 = vmatprep.mubr.bf16.mxu1 %v3082_v47 }
 0x1d4   : > { %5413 = vmatmul.mubr.bf16.gmra.mrb[28].mxu1 %v3083_v38 }
 0x1d5   : > { %5429 = vmatpush3.bf16.msra.mxu1 %v5762_v46 }
 0x1d6   : > { %5430 = vmatprep.subr.bf16.mxu1 %v5763_v9 }
 0x1d9   : > { %5431 = vmatpush3.bf16.msra.mxu1 %v5763_v9 }
 0x28f   : > { %v5402_v1 = vpop.f32.mrb[16].mxu1 }
 0x290   : > { %v3196_v39 = vadd.f32 %v5402_v1, %v4871_v23  ;;  %v3187_v37 = vpop.f32.mrb[17].mxu1 }
 0x291   : > { %v3188_v40 = vadd.f32 %v4871_v23, %v3187_v37  ;;  %v5403_v8 = vpop.f32.mrb[18].mxu1 }
 0x292   : > { %v3199_v57 = vadd.f32 %v5403_v8, %v4871_v23  ;;  %v3190_v11 = vpop.f32.mrb[19].mxu1  ;;  %v3252_v27 = vmax.f32 %v3196_v39, 0.0 }
 0x293   : > { %v3191_v36 = vadd.f32 %v4871_v23, %v3190_v11  ;;  %v3250_v7 = vmax.f32 %v3188_v40, 0.0 }
 0x294   : > { %v3253_v63 = vmax.f32 %v3199_v57, 0.0 }
 0x295   : > { %v3251_v2 = vmax.f32 %v3191_v36, 0.0 }
 0x296   : > { %v3267_v58 = vpack.c.bf16 %v3253_v63, %v3252_v27 }
 0x297   : > { %v3266_v49 = vpack.c.bf16 %v3251_v2, %v3250_v7  ;;  %v5406_v53 = vpop.f32.mrb[20].mxu1 }
 0x298   : > { %v3212_v15 = vadd.f32 %v5406_v53, %v4871_v23  ;;  %v3203_v31 = vpop.f32.mrb[21].mxu1 }
 0x299   : > { %v3204_v52 = vadd.f32 %v4871_v23, %v3203_v31  ;;  %v5407_v45 = vpop.f32.mrb[22].mxu1  ;;  %5432 = vmatprep.mubr.bf16.mxu1 %v3266_v49 }
 0x29a   : > { %v3215_v29 = vadd.f32 %v5407_v45, %v4871_v23  ;;  %v3206_v16 = vpop.f32.mrb[23].mxu1  ;;  %5433 = vmatmul.mubr.bf16.vlgmr.msra.gmra.mrb[32].mxu1 %v3267_v58  ;;  %v3256_v56 = vmax.f32 %v3212_v15, 0.0 }
 0x29b   : > { %v3207_v24 = vadd.f32 %v4871_v23, %v3206_v16  ;;  %v3254_v28 = vmax.f32 %v3204_v52, 0.0 }
 0x29c   : > { %v3257_v12 = vmax.f32 %v3215_v29, 0.0 }
 0x29d   : > { %v3255_v19 = vmax.f32 %v3207_v24, 0.0 }
 0x29e   : > { %v3269_v22 = vpack.c.bf16 %v3257_v12, %v3256_v56 }
 0x29f   : > { %v3268_v55 = vpack.c.bf16 %v3255_v19, %v3254_v28  ;;  %v5410_v0 = vpop.f32.mrb[24].mxu1 }
 0x2a0   : > { %v3228_v18 = vadd.f32 %v5410_v0, %v4871_v23  ;;  %v3219_v44 = vpop.f32.mrb[25].mxu1 }
 0x2a1   : > { %v3220_v21 = vadd.f32 %v4871_v23, %v3219_v44  ;;  %v5411_v6 = vpop.f32.mrb[26].mxu1  ;;  %5436 = vmatprep.mubr.bf16.mxu1 %v3268_v55 }
 0x2a2   : > { %v3231_v51 = vadd.f32 %v5411_v6, %v4871_v23  ;;  %v3222_v35 = vpop.f32.mrb[27].mxu1  ;;  %5437 = vmatmul.mubr.bf16.gmra.mrb[36].mxu1 %v3269_v22  ;;  %v3260_v14 = vmax.f32 %v3228_v18, 0.0 }
 0x2a3   : > { %v3223_v4 = vadd.f32 %v4871_v23, %v3222_v35  ;;  %v3258_v10 = vmax.f32 %v3220_v21, 0.0 }
 0x2a4   : > { %v3261_v50 = vmax.f32 %v3231_v51, 0.0 }
 0x2a5   : > { %v3259_v43 = vmax.f32 %v3223_v4, 0.0 }
 0x2a6   : > { %v3271_v59 = vpack.c.bf16 %v3261_v50, %v3260_v14 }
 0x2a7   : > { %v3270_v41 = vpack.c.bf16 %v3259_v43, %v3258_v10  ;;  %v5414_v3 = vpop.f32.mrb[28].mxu1 }
 0x2a8   : > { %v3244_v61 = vadd.f32 %v5414_v3, %v4871_v23  ;;  %v3235_v26 = vpop.f32.mrb[29].mxu1 }
 0x2a9   : > { %v3236_v60 = vadd.f32 %v4871_v23, %v3235_v26  ;;  %v5415_v33 = vpop.f32.mrb[30].mxu1  ;;  %5440 = vmatprep.mubr.bf16.mxu1 %v3270_v41 }
 0x2aa   : > { %v3247_v62 = vadd.f32 %v5415_v33, %v4871_v23  ;;  %v3238_v5 = vpop.f32.mrb[31].mxu1  ;;  %5441 = vmatmul.mubr.bf16.gmra.mrb[40].mxu1 %v3271_v59  ;;  %v3264_v42 = vmax.f32 %v3244_v61, 0.0 }
 0x2ab   : > { %v3239_v32 = vadd.f32 %v4871_v23, %v3238_v5  ;;  %v3262_v48 = vmax.f32 %v3236_v60, 0.0 }
 0x2ac   : > { %v3265_v20 = vmax.f32 %v3247_v62, 0.0 }
 0x2ad   : > { %v3263_v25 = vmax.f32 %v3239_v32, 0.0 }
 0x2ae   : > { %v3273_v17 = vpack.c.bf16 %v3265_v20, %v3264_v42 }
 0x2af   : > { %v3272_v34 = vpack.c.bf16 %v3263_v25, %v3262_v48 }
 0x2b1   : > { %5444 = vmatprep.mubr.bf16.mxu1 %v3272_v34 }
 0x2b2   : > { %5445 = vmatmul.mubr.bf16.gmra.mrb[44].mxu1 %v3273_v17 }
 0x36d   : > { %v5434_v54 = vpop.f32.mrb[32].mxu1 }
 0x36e   : > { %v3386_v30 = vadd.f32 %v5434_v54, %v4880_v13  ;;  %v3377_v38 = vpop.f32.mrb[33].mxu1 }
 0x36f   : > { %v3378_v47 = vadd.f32 %v4880_v13, %v3377_v38  ;;  %v5435_v46 = vpop.f32.mrb[34].mxu1 }
 0x370   : > { %3444 = vadd.xlane.f32.xlu1 %v3386_v30  ;;  %v3380_v9 = vpop.f32.mrb[35].mxu1  ;;  %v3389_v23 = vadd.f32 %v5435_v46, %v4880_v13 }
 0x371   : > { %3440 = vadd.xlane.f32.xlu0 %v3378_v47  ;;  %v3381_v1 = vadd.f32 %v4880_v13, %v3380_v9 }
 0x374   : > { %3446 = vadd.xlane.f32.xlu1 %v3389_v23 }
 0x375   : > { %v5438_v39 = vpop.f32.mrb[36].mxu1  ;;  %3442 = vadd.xlane.f32.xlu0 %v3381_v1 }
 0x376   : > { %v3393_v37 = vpop.f32.mrb[37].mxu1  ;;  %v3402_v36 = vadd.f32 %v5438_v39, %v4880_v13 }
 0x377   : > { %v3394_v40 = vadd.f32 %v4880_v13, %v3393_v37  ;;  %v5439_v8 = vpop.f32.mrb[38].mxu1 }
 0x378   : > { %v3396_v57 = vpop.f32.mrb[39].mxu1  ;;  %v7162_v27 = vadd.f32 %v5439_v8, %v4880_v13 }
 0x379   : > { %v3397_v11 = vadd.f32 %v4880_v13, %v3396_v57  ;;  %3448 = vadd.xlane.f32.xlu0 %v3394_v40 }
 0x37b   : > { %3450 = vadd.xlane.f32.xlu1 %v3397_v11 }
 0x37d   : > { %v5442_v63 = vpop.f32.mrb[40].mxu1  ;;  %3452 = vadd.xlane.f32.xlu0 %v3402_v36 }
 0x37e   : > { %v3409_v7 = vpop.f32.mrb[41].mxu1  ;;  %v7170_v15 = vadd.f32 %v5442_v63, %v4880_v13 }
 0x37f   : > { %v7164_v2 = vadd.f32 %v4880_v13, %v3409_v7  ;;  %v5443_v58 = vpop.f32.mrb[42].mxu1  ;;  %3454 = vadd.xlane.f32.xlu1 %v7162_v27 }
 0x380   : > { %v3412_v49 = vpop.f32.mrb[43].mxu1  ;;  %v7173_v31 = vadd.f32 %v5443_v58, %v4880_v13 }
 0x381   : > { %v7167_v53 = vadd.f32 %v4880_v13, %v3412_v49  ;;  %3456 = vadd.xlane.f32.xlu0 %v7164_v2 }
 0x383   : > { %3458 = vadd.xlane.f32.xlu1 %v7167_v53 }
 0x385   : > { %3460 = vadd.xlane.f32.xlu0 %v7170_v15  ;;  %v5446_v52 = vpop.f32.mrb[44].mxu1 }
 0x386   : > { %v3425_v45 = vpop.f32.mrb[45].mxu1  ;;  %v7182_v12 = vadd.f32 %v5446_v52, %v4880_v13 }
 0x387   : > { %v7176_v29 = vadd.f32 %v4880_v13, %v3425_v45  ;;  %3462 = vadd.xlane.f32.xlu1 %v7173_v31  ;;  %v5447_v16 = vpop.f32.mrb[46].mxu1 }
 0x388   : > { %v3428_v24 = vpop.f32.mrb[47].mxu1  ;;  %v7185_v28 = vadd.f32 %v5447_v16, %v4880_v13 }
 0x389   : > { %v7179_v56 = vadd.f32 %v4880_v13, %v3428_v24  ;;  %3464 = vadd.xlane.f32.xlu0 %v7176_v29 }
 0x38b   : > { %3466 = vadd.xlane.f32.xlu1 %v7179_v56 }
 0x38d   : > { %3468 = vadd.xlane.f32.xlu0 %v7182_v12 }
 0x38f   : > { %3470 = vadd.xlane.f32.xlu1 %v7185_v28 }
 0x3fd   : > { %v3445_v19 = vpop.xlane.xlu1 %3444 }
 0x3fe   : > { %v3441_v22 = vpop.xlane.xlu0 %3440  ;;  %v7189_v55 = vmul.f32 0.008333334, %v3445_v19 }
 0x3ff   : > { %v7191_v0 = vmul.f32 0.008333334, %v3441_v22 }
 0x400   : > { %v7203_v4 = vsub.f32 %v3386_v30, %v7189_v55 }
 0x401   : > { %v3447_v18 = vpop.xlane.xlu1 %3446  ;;  %v7194_v44 = vsub.f32 %v3378_v47, %v7191_v0 }
 0x402   : > { %v3443_v21 = vpop.xlane.xlu0 %3442  ;;  %v7196_v6 = vmul.f32 0.008333334, %v3447_v18  ;;  %v3506_v59 = vmul.f32 %v7203_v4, %v7203_v4  ;;  %v5765_v18 = vld [vmem:[%s7991_s4 + $0x8] sm:$0xff]  }
 0x403   : > { %v7198_v51 = vmul.f32 0.008333334, %v3443_v21  ;;  %v3504_v35 = vmul.f32 %v7194_v44, %v7194_v44 }
 0x404   : > { %v7215_v41 = vsub.f32 %v3389_v23, %v7196_v6 }
 0x405   : > { %3520 = vadd.xlane.f32.xlu0 %v3504_v35  ;;  %v7206_v14 = vsub.f32 %v3381_v1, %v7198_v51  ;;  %v3553_v35 = vmul.f32 8.0, %v7198_v51 }
 0x406   : > { %v3449_v50 = vpop.xlane.xlu0 %3448  ;;  %v3507_v62 = vmul.f32 %v7215_v41, %v7215_v41 }
 0x407   : > { %v7208_v10 = vmul.f32 0.008333334, %v3449_v50  ;;  %v3505_v43 = vmul.f32 %v7206_v14, %v7206_v14  ;;  %v3554_v50 = vmul.f32 8.0, %v7189_v55 }
 0x408   : > { %v3451_v3 = vpop.xlane.xlu1 %3450 }
 0x409   : > { %v7217_v61 = vmul.f32 0.008333334, %v3451_v3  ;;  %3522 = vadd.xlane.f32.xlu1 %v3505_v43  ;;  %3524 = vadd.xlane.f32.xlu0 %v3506_v59  ;;  %v7220_v26 = vsub.f32 %v3394_v40, %v7208_v10  ;;  %v3555_v3 = vmul.f32 8.0, %v7196_v6 }
 0x40a   : > { %v3453_v60 = vpop.xlane.xlu0 %3452 }
 0x40b   : > { %v7222_v33 = vmul.f32 0.008333334, %v3453_v60  ;;  %v3508_v5 = vmul.f32 %v7220_v26, %v7220_v26  ;;  %v7229_v32 = vsub.f32 %v3397_v11, %v7217_v61  ;;  %v3556_v60 = vmul.f32 8.0, %v7208_v10 }
 0x40c   : > { %v3455_v42 = vpop.xlane.xlu1 %3454 }
 0x40d   : > { %v7231_v20 = vmul.f32 0.008333334, %v3455_v42  ;;  %3526 = vadd.xlane.f32.xlu1 %v3507_v62  ;;  %3528 = vadd.xlane.f32.xlu0 %v3508_v5  ;;  %v7234_v48 = vsub.f32 %v3402_v36, %v7222_v33  ;;  %v3509_v34 = vmul.f32 %v7229_v32, %v7229_v32  ;;  %v3569_v5 = vmul.f32 %v3553_v35, %v7198_v51 }
 0x40e   : > { %v3457_v25 = vpop.xlane.xlu0 %3456  ;;  %v3570_v42 = vmul.f32 %v3554_v50, %v7189_v55 }
 0x40f   : > { %v7236_v17 = vmul.f32 0.008333334, %v3457_v25  ;;  %v3510_v13 = vmul.f32 %v7234_v48, %v7234_v48  ;;  %v7244_v54 = vsub.f32 %v7162_v27, %v7231_v20 }
 0x410   : > { %v3459_v30 = vpop.xlane.xlu1 %3458 }
 0x411   : > { %v7246_v38 = vmul.f32 0.008333334, %v3459_v30  ;;  %3530 = vadd.xlane.f32.xlu1 %v3509_v34  ;;  %3532 = vadd.xlane.f32.xlu0 %v3510_v13  ;;  %v7250_v47 = vsub.f32 %v7164_v2, %v7236_v17  ;;  %v3511_v23 = vmul.f32 %v7244_v54, %v7244_v54 }
 0x412   : > { %v3461_v46 = vpop.xlane.xlu0 %3460 }
 0x413   : > { %v7252_v9 = vmul.f32 0.008333334, %v3461_v46  ;;  %v3512_v1 = vmul.f32 %v7250_v47, %v7250_v47  ;;  %v7260_v39 = vsub.f32 %v7167_v53, %v7246_v38  ;;  %v3571_v46 = vmul.f32 %v3555_v3, %v7196_v6 }
 0x414   : > { %v3463_v37 = vpop.xlane.xlu1 %3462  ;;  %v3560_v6 = vmul.f32 8.0, %v7236_v17 }
 0x415   : > { %v7262_v40 = vmul.f32 0.008333334, %v3463_v37  ;;  %3534 = vadd.xlane.f32.xlu1 %v3511_v23  ;;  %3536 = vadd.xlane.f32.xlu0 %v3512_v1  ;;  %v7266_v8 = vsub.f32 %v7170_v15, %v7252_v9  ;;  %v3513_v36 = vmul.f32 %v7260_v39, %v7260_v39  ;;  %v3572_v23 = vmul.f32 %v3556_v60, %v7208_v10 }
 0x416   : > { %v3465_v57 = vpop.xlane.xlu0 %3464  ;;  %v3557_v1 = vmul.f32 8.0, %v7217_v61 }
 0x417   : > { %v7268_v11 = vmul.f32 0.008333334, %v3465_v57  ;;  %v3514_v27 = vmul.f32 %v7266_v8, %v7266_v8  ;;  %v7276_v63 = vsub.f32 %v7173_v31, %v7262_v40 }
 0x418   : > { %v3467_v7 = vpop.xlane.xlu1 %3466 }
 0x419   : > { %v7278_v2 = vmul.f32 0.008333334, %v3467_v7  ;;  %3538 = vadd.xlane.f32.xlu1 %v3513_v36  ;;  %3540 = vadd.xlane.f32.xlu0 %v3514_v27  ;;  %v7282_v58 = vsub.f32 %v7176_v29, %v7268_v11  ;;  %v3515_v15 = vmul.f32 %v7276_v63, %v7276_v63  ;;  %v3558_v36 = vmul.f32 8.0, %v7222_v33 }
 0x41a   : > { %v3469_v49 = vpop.xlane.xlu0 %3468 }
 0x41b   : > { %v7284_v53 = vmul.f32 0.008333334, %v3469_v49  ;;  %v3516_v52 = vmul.f32 %v7282_v58, %v7282_v58  ;;  %v7292_v31 = vsub.f32 %v7179_v56, %v7278_v2 }
 0x41c   : > { %v3471_v45 = vpop.xlane.xlu1 %3470 }
 0x41d   : > { %v7294_v16 = vmul.f32 0.008333334, %v3471_v45  ;;  %3542 = vadd.xlane.f32.xlu1 %v3515_v15  ;;  %3544 = vadd.xlane.f32.xlu0 %v3516_v52  ;;  %v7298_v29 = vsub.f32 %v7182_v12, %v7284_v53  ;;  %v3517_v24 = vmul.f32 %v7292_v31, %v7292_v31  ;;  %v5764_v12 = vld [vmem:[%s7991_s4] sm:$0xff]   ;;  %v3573_v52 = vmul.f32 %v3557_v1, %v7217_v61 }
 0x41e   : > { %5448 = vmatprep.subr.bf16.mxu1 %v5764_v12  ;;  %v3559_v45 = vmul.f32 8.0, %v7231_v20  ;;  %v3576_v61 = vmul.f32 %v3560_v6, %v7236_v17  ;;  %v7341_v17 = vld [vmem:[%s7992_s5 + $0x3] ss:$0 sm:$0xff]  ;;  %v3565_v1 = vmul.f32 8.0, %v7278_v2 }
 0x41f   : > { %v3518_v19 = vmul.f32 %v7298_v29, %v7298_v29  ;;  %v7306_v22 = vsub.f32 %v7185_v28, %v7294_v16  ;;  %5449 = vmatpush3.bf16.msra.mxu1 %v5764_v12  ;;  %v3552_v28 = vmul.f32 8.0, %v7191_v0 }
 0x420   : > { %5450 = vmatprep.subr.bf16.mxu1 %v5765_v18  ;;  %v3575_v50 = vmul.f32 %v3559_v45, %v7231_v20 }
 0x421   : > { %3546 = vadd.xlane.f32.xlu1 %v3517_v24  ;;  %3548 = vadd.xlane.f32.xlu0 %v3518_v19  ;;  %v3519_v56 = vmul.f32 %v7306_v22, %v7306_v22  ;;  %v3568_v21 = vmul.f32 %v3552_v28, %v7191_v0  ;;  %v3574_v19 = vmul.f32 %v3558_v36, %v7222_v33  ;;  %v3563_v33 = vmul.f32 8.0, %v7262_v40 }
 0x423   : > { %5451 = vmatpush3.bf16.msra.mxu1 %v5765_v18  ;;  %v3579_v36 = vmul.f32 %v3563_v33, %v7262_v40 }
 0x425   : > { %3550 = vadd.xlane.f32.xlu1 %v3519_v56 }
 0x492   : > { %v3521_v43 = vpop.xlane.xlu0 %3520 }
 0x493   : > { %v3584_v59 = vsub.f32 %v3521_v43, %v3568_v21  ;;  %v3561_v43 = vmul.f32 8.0, %v7246_v38 }
 0x495   : > { %v3600_v62 = vmul.f32 0.008333334, %v3584_v59  ;;  %v3562_v59 = vmul.f32 8.0, %v7252_v9 }
 0x496   : > { %v3523_v25 = vpop.xlane.xlu1 %3522  ;;  %v3525_v34 = vpop.xlane.xlu0 %3524 }
 0x497   : > { %v3616_v13 = vadd.f32 1e-05, %v3600_v62  ;;  %v3585_v30 = vsub.f32 %v3523_v25, %v3569_v5  ;;  %v3586_v0 = vsub.f32 %v3525_v34, %v3570_v42  ;;  %v3564_v42 = vmul.f32 8.0, %v7268_v11 }
 0x499   : > { %5772 = vrsqrt.f32 %v3616_v13  ;;  %v3601_v37 = vmul.f32 0.008333334, %v3585_v30  ;;  %v3602_v57 = vmul.f32 0.008333334, %v3586_v0  ;;  %v3577_v0 = vmul.f32 %v3561_v43, %v7246_v38 }
 0x49a   : > { %v3527_v27 = vpop.xlane.xlu1 %3526  ;;  %v3529_v51 = vpop.xlane.xlu0 %3528  ;;  %v3580_v38 = vmul.f32 %v3564_v42, %v7268_v11 }
 0x49b   : > { %v3617_v7 = vadd.f32 1e-05, %v3601_v37  ;;  %v3618_v55 = vadd.f32 1e-05, %v3602_v57  ;;  %v3587_v49 = vsub.f32 %v3527_v27, %v3571_v46  ;;  %v3588_v15 = vsub.f32 %v3529_v51, %v3572_v23  ;;  %v7351_v27 = vld [vmem:[%s7992_s5 + $0x4] ss:$0 sm:$0xff] }
 0x49c   : > { %v3578_v46 = vmul.f32 %v3562_v59, %v7252_v9 }
 0x49d   : > { %5774 = vrsqrt.f32 %v3617_v7  ;;  %v3603_v10 = vmul.f32 0.008333334, %v3587_v49  ;;  %v3604_v24 = vmul.f32 0.008333334, %v3588_v15 }
 0x49e   : > { %5776 = vrsqrt.f32 %v3618_v55  ;;  %v3531_v56 = vpop.xlane.xlu1 %3530  ;;  %v3533_v12 = vpop.xlane.xlu0 %3532 }
 0x49f   : > { %v3619_v18 = vadd.f32 1e-05, %v3603_v10  ;;  %v3620_v28 = vadd.f32 1e-05, %v3604_v24  ;;  %v3589_v21 = vsub.f32 %v3531_v56, %v3573_v52  ;;  %v3590_v35 = vsub.f32 %v3533_v12, %v3574_v19 }
 0x4a0   : > { %v3581_v10 = vmul.f32 %v3565_v1, %v7278_v2  ;;  %v3567_v19 = vmul.f32 8.0, %v7294_v16 }
 0x4a1   : > { %5778 = vrsqrt.f32 %v3619_v18  ;;  %v3605_v3 = vmul.f32 0.008333334, %v3589_v21  ;;  %v3606_v60 = vmul.f32 0.008333334, %v3590_v35 }
 0x4a2   : > { %5780 = vrsqrt.f32 %v3620_v28  ;;  %v3535_v62 = vpop.xlane.xlu1 %3534  ;;  %v3537_v5 = vpop.xlane.xlu0 %3536  ;;  %v3583_v33 = vmul.f32 %v3567_v19, %v7294_v16 }
 0x4a3   : > { %v5773_v25 = vpop.eup %5772  ;;  %v3621_v34 = vadd.f32 1e-05, %v3605_v3  ;;  %v3622_v13 = vadd.f32 1e-05, %v3606_v60  ;;  %v3591_v20 = vsub.f32 %v3535_v62, %v3575_v50  ;;  %v3592_v30 = vsub.f32 %v3537_v5, %v3576_v61 }
 0x4a4   : > { %v3648_v23 = vmul.f32 %v5773_v25, %v7194_v44  ;;  %v3566_v44 = vmul.f32 8.0, %v7284_v53 }
 0x4a5   : > { %5782 = vrsqrt.f32 %v3621_v34  ;;  %v3607_v37 = vmul.f32 0.008333334, %v3591_v20  ;;  %v3608_v57 = vmul.f32 0.008333334, %v3592_v30 }
 0x4a6   : > { %5784 = vrsqrt.f32 %v3622_v13  ;;  %v3539_v51 = vpop.xlane.xlu1 %3538  ;;  %v3541_v7 = vpop.xlane.xlu0 %3540  ;;  %v3669_v9 = vmul.f32 %v7341_v17, %v3648_v23  ;;  %v3582_v35 = vmul.f32 %v3566_v44, %v7284_v53 }
 0x4a7   : > { %v5775_v55 = vpop.eup %5774  ;;  %v3623_v49 = vadd.f32 1e-05, %v3607_v37  ;;  %v3624_v15 = vadd.f32 1e-05, %v3608_v57  ;;  %v3593_v52 = vsub.f32 %v3539_v51, %v3577_v0  ;;  %v3594_v45 = vsub.f32 %v3541_v7, %v3578_v46 }
 0x4a8   : > { %v5777_v40 = vpop.eup %5776  ;;  %v7357_v6 = vadd.f32 %v7351_v27, %v3669_v9  ;;  %v3649_v24 = vmul.f32 %v5775_v55, %v7206_v14 }
 0x4a9   : > { %5786 = vrsqrt.f32 %v3623_v49  ;;  %v3609_v11 = vmul.f32 0.008333334, %v3593_v52  ;;  %v3610_v56 = vmul.f32 0.008333334, %v3594_v45  ;;  %v3650_v12 = vmul.f32 %v5777_v40, %v7203_v4 }
 0x4aa   : > { %5788 = vrsqrt.f32 %v3624_v15  ;;  %v3543_v18 = vpop.xlane.xlu1 %3542  ;;  %v3545_v28 = vpop.xlane.xlu0 %3544  ;;  %v3706_v21 = vmul.f32 %v7357_v6, %v7357_v6  ;;  %v3670_v50 = vmul.f32 %v7341_v17, %v3649_v24 }
 0x4ab   : > { %v5779_v2 = vpop.eup %5778  ;;  %v3625_v61 = vadd.f32 1e-05, %v3609_v11  ;;  %v3626_v14 = vadd.f32 1e-05, %v3610_v56  ;;  %v3595_v43 = vsub.f32 %v3543_v18, %v3579_v36  ;;  %v3596_v59 = vsub.f32 %v3545_v28, %v3580_v38 }
 0x4ac   : > { %v5781_v3 = vpop.eup %5780  ;;  %3722 = vadd.xlane.f32.xlu0 %v3706_v21  ;;  %v7368_v60 = vadd.f32 %v7351_v27, %v3670_v50  ;;  %v3671_v4 = vmul.f32 %v7341_v17, %v3650_v12  ;;  %v3651_v62 = vmul.f32 %v5779_v2, %v7215_v41 }
 0x4ad   : > { %5790 = vrsqrt.f32 %v3625_v61  ;;  %v3611_v53 = vmul.f32 0.008333334, %v3595_v43  ;;  %v3612_v5 = vmul.f32 0.008333334, %v3596_v59  ;;  %v3652_v42 = vmul.f32 %v5781_v3, %v7220_v26 }
 0x4ae   : > { %5792 = vrsqrt.f32 %v3626_v14  ;;  %v3547_v25 = vpop.xlane.xlu1 %3546  ;;  %v3549_v34 = vpop.xlane.xlu0 %3548  ;;  %v3707_v13 = vmul.f32 %v7368_v60, %v7368_v60  ;;  %v7377_v20 = vadd.f32 %v7351_v27, %v3671_v4  ;;  %v3672_v30 = vmul.f32 %v7341_v17, %v3651_v62 }
 0x4af   : > { %v5783_v0 = vpop.eup %5782  ;;  %v3627_v16 = vadd.f32 1e-05, %v3611_v53  ;;  %v3628_v46 = vadd.f32 1e-05, %v3612_v5  ;;  %v3597_v41 = vsub.f32 %v3547_v25, %v3581_v10  ;;  %v3598_v23 = vsub.f32 %v3549_v34, %v3582_v35 }
 0x4b0   : > { %v5785_v1 = vpop.eup %5784  ;;  %3724 = vadd.xlane.f32.xlu1 %v3707_v13  ;;  %v3708_v26 = vmul.f32 %v7377_v20, %v7377_v20  ;;  %v7383_v37 = vadd.f32 %v7351_v27, %v3672_v30  ;;  %v3673_v57 = vmul.f32 %v7341_v17, %v3652_v42  ;;  %v3653_v36 = vmul.f32 %v5783_v0, %v7229_v32 }
 0x4b1   : > { %5794 = vrsqrt.f32 %v3627_v16  ;;  %v3613_v51 = vmul.f32 0.008333334, %v3597_v41  ;;  %v3614_v7 = vmul.f32 0.008333334, %v3598_v23  ;;  %v3654_v38 = vmul.f32 %v5785_v1, %v7234_v48 }
 0x4b2   : > { %5796 = vrsqrt.f32 %v3628_v46  ;;  %3726 = vadd.xlane.f32.xlu0 %v3708_v26  ;;  %v3551_v9 = vpop.xlane.xlu1 %3550  ;;  %v3709_v44 = vmul.f32 %v7383_v37, %v7383_v37  ;;  %v7391_v55 = vadd.f32 %v7351_v27, %v3673_v57  ;;  %v3674_v49 = vmul.f32 %v7341_v17, %v3653_v36 }
 0x4b3   : > { %v5787_v15 = vpop.eup %5786  ;;  %v3629_v52 = vadd.f32 1e-05, %v3613_v51  ;;  %v3630_v45 = vadd.f32 1e-05, %v3614_v7  ;;  %v3599_v32 = vsub.f32 %v3551_v9, %v3583_v33  ;;  %v3675_v40 = vmul.f32 %v7341_v17, %v3654_v38 }
 0x4b4   : > { %v5789_v10 = vpop.eup %5788  ;;  %3728 = vadd.xlane.f32.xlu1 %v3709_v44  ;;  %v3710_v48 = vmul.f32 %v7391_v55, %v7391_v55  ;;  %v7398_v24 = vadd.f32 %v7351_v27, %v3674_v49  ;;  %v3655_v19 = vmul.f32 %v5787_v15, %v7244_v54 }
 0x4b5   : > { %5798 = vrsqrt.f32 %v3629_v52  ;;  %v3615_v11 = vmul.f32 0.008333334, %v3599_v32  ;;  %v7402_v56 = vadd.f32 %v7351_v27, %v3675_v40  ;;  %v3656_v12 = vmul.f32 %v5789_v10, %v7250_v47  ;;  %v5769_v52 = vld [vmem:[%s7991_s4 + $0x28] sm:$0xff]   ;;  %v5771_v32 = vld [vmem:[%s7991_s4 + $0x38] sm:$0xff]  }
 0x4b6   : > { %5800 = vrsqrt.f32 %v3630_v45  ;;  %3730 = vadd.xlane.f32.xlu0 %v3710_v48  ;;  %v3711_v18 = vmul.f32 %v7398_v24, %v7398_v24  ;;  %v3676_v28 = vmul.f32 %v7341_v17, %v3655_v19 }
 0x4b7   : > { %v5791_v21 = vpop.eup %5790  ;;  %v3631_v35 = vadd.f32 1e-05, %v3615_v11  ;;  %v3712_v50 = vmul.f32 %v7402_v56, %v7402_v56  ;;  %v3677_v54 = vmul.f32 %v7341_v17, %v3656_v12 }
 0x4b8   : > { %v5793_v2 = vpop.eup %5792  ;;  %3732 = vadd.xlane.f32.xlu1 %v3711_v18  ;;  %v7412_v61 = vadd.f32 %v7351_v27, %v3676_v28  ;;  %v3657_v47 = vmul.f32 %v5791_v21, %v7260_v39  ;;  %v5766_v39 = vld [vmem:[%s7991_s4 + $0x10] sm:$0xff]  }
 0x4b9   : > { %5802 = vrsqrt.f32 %v3631_v35  ;;  %v7416_v14 = vadd.f32 %v7351_v27, %v3677_v54  ;;  %v3658_v43 = vmul.f32 %v5793_v2, %v7266_v8  ;;  %5452 = vmatprep.subr.bf16.mxu1 %v5766_v39 }
 0x4ba   : > { %3734 = vadd.xlane.f32.xlu0 %v3712_v50  ;;  %v3713_v59 = vmul.f32 %v7412_v61, %v7412_v61  ;;  %v3678_v3 = vmul.f32 %v7341_v17, %v3657_v47  ;;  %5453 = vmatpush3.bf16.msra.mxu1 %v5766_v39 }
 0x4bb   : > { %v5795_v4 = vpop.eup %5794  ;;  %v3714_v33 = vmul.f32 %v7416_v14, %v7416_v14  ;;  %v3679_v62 = vmul.f32 %v7341_v17, %v3658_v43 }
 0x4bc   : > { %v5797_v53 = vpop.eup %5796  ;;  %3736 = vadd.xlane.f32.xlu1 %v3713_v59  ;;  %v7429_v8 = vadd.f32 %v7351_v27, %v3678_v3  ;;  %v3659_v5 = vmul.f32 %v5795_v4, %v7276_v63  ;;  %v5767_v63 = vld [vmem:[%s7991_s4 + $0x18] sm:$0xff]  }
 0x4bd   : > { %v7433_v42 = vadd.f32 %v7351_v27, %v3679_v62  ;;  %v3660_v25 = vmul.f32 %v5797_v53, %v7282_v58  ;;  %5454 = vmatprep.subr.bf16.mxu1 %v5767_v63 }
 0x4be   : > { %3738 = vadd.xlane.f32.xlu0 %v3714_v33  ;;  %v3715_v34 = vmul.f32 %v7429_v8, %v7429_v8  ;;  %v3680_v13 = vmul.f32 %v7341_v17, %v3659_v5  ;;  %5455 = vmatpush3.bf16.msra.mxu1 %v5767_v63 }
 0x4bf   : > { %v5799_v30 = vpop.eup %5798  ;;  %v3716_v0 = vmul.f32 %v7433_v42, %v7433_v42  ;;  %v3681_v16 = vmul.f32 %v7341_v17, %v3660_v25 }
 0x4c0   : > { %v5801_v46 = vpop.eup %5800  ;;  %3740 = vadd.xlane.f32.xlu1 %v3715_v34  ;;  %v7446_v58 = vadd.f32 %v7351_v27, %v3680_v13  ;;  %v3661_v41 = vmul.f32 %v5799_v30, %v7292_v31  ;;  %v5768_v31 = vld [vmem:[%s7991_s4 + $0x20] sm:$0xff]  }
 0x4c1   : > { %v7450_v23 = vadd.f32 %v7351_v27, %v3681_v16  ;;  %v3662_v1 = vmul.f32 %v5801_v46, %v7298_v29  ;;  %5456 = vmatprep.subr.bf16.mxu1 %v5768_v31 }
 0x4c2   : > { %3742 = vadd.xlane.f32.xlu0 %v3716_v0  ;;  %v3717_v26 = vmul.f32 %v7446_v58, %v7446_v58  ;;  %v3682_v57 = vmul.f32 %v7341_v17, %v3661_v41  ;;  %5457 = vmatpush3.bf16.msra.mxu1 %v5768_v31 }
 0x4c3   : > { %v5803_v36 = vpop.eup %5802  ;;  %v3718_v51 = vmul.f32 %v7450_v23, %v7450_v23  ;;  %v3683_v7 = vmul.f32 %v7341_v17, %v3662_v1  ;;  %5458 = vmatprep.subr.bf16.mxu1 %v5769_v52 }
 0x4c4   : > { %3744 = vadd.xlane.f32.xlu1 %v3717_v26  ;;  %v7463_v29 = vadd.f32 %v7351_v27, %v3682_v57  ;;  %v3663_v38 = vmul.f32 %v5803_v36, %v7306_v22 }
 0x4c5   : > { %v7467_v9 = vadd.f32 %v7351_v27, %v3683_v7 }
 0x4c6   : > { %3746 = vadd.xlane.f32.xlu0 %v3718_v51  ;;  %v3719_v44 = vmul.f32 %v7463_v29, %v7463_v29  ;;  %v3684_v49 = vmul.f32 %v7341_v17, %v3663_v38  ;;  %5459 = vmatpush3.bf16.msra.mxu1 %v5769_v52  ;;  %v5770_v17 = vld [vmem:[%s7991_s4 + $0x30] sm:$0xff]  }
 0x4c7   : > { %v3720_v15 = vmul.f32 %v7467_v9, %v7467_v9  ;;  %5460 = vmatprep.subr.bf16.mxu1 %v5770_v17 }
 0x4c8   : > { %3748 = vadd.xlane.f32.xlu1 %v3719_v44  ;;  %v7478_v22 = vadd.f32 %v7351_v27, %v3684_v49 }
 0x4ca   : > { %3750 = vadd.xlane.f32.xlu0 %v3720_v15  ;;  %v3721_v45 = vmul.f32 %v7478_v22, %v7478_v22  ;;  %5461 = vmatpush3.bf16.msra.mxu1 %v5770_v17 }
 0x4cb   : > { %5462 = vmatprep.subr.bf16.mxu1 %v5771_v32 }
 0x4cc   : > { %3752 = vadd.xlane.f32.xlu1 %v3721_v45 }
 0x4ce   : > { %5463 = vmatpush3.bf16.msra.mxu1 %v5771_v32 }
 0x539   : > { %v3723_v27 = vpop.xlane.xlu0 %3722 }
 0x53a   : > { %v3754_v40 = vadd.f32 1e-12, %v3723_v27 }
 0x53c   : > { %5804 = vrsqrt.f32 %v3754_v40 }
 0x53d   : > { %v3725_v10 = vpop.xlane.xlu1 %3724 }
 0x53e   : > { %v3755_v48 = vadd.f32 1e-12, %v3725_v10 }
 0x53f   : > { %v3727_v19 = vpop.xlane.xlu0 %3726 }
 0x540   : > { %5806 = vrsqrt.f32 %v3755_v48  ;;  %v3756_v11 = vadd.f32 1e-12, %v3727_v19 }
 0x541   : > { %v3729_v12 = vpop.xlane.xlu1 %3728 }
 0x542   : > { %5808 = vrsqrt.f32 %v3756_v11  ;;  %v3757_v18 = vadd.f32 1e-12, %v3729_v12 }
 0x543   : > { %v3731_v28 = vpop.xlane.xlu0 %3730 }
 0x544   : > { %5810 = vrsqrt.f32 %v3757_v18  ;;  %v3758_v21 = vadd.f32 1e-12, %v3731_v28 }
 0x545   : > { %v3733_v35 = vpop.xlane.xlu1 %3732 }
 0x546   : > { %5812 = vrsqrt.f32 %v3758_v21  ;;  %v3759_v50 = vadd.f32 1e-12, %v3733_v35  ;;  %v5805_v2 = vpop.eup %5804 }
 0x547   : > { %v3735_v54 = vpop.xlane.xlu0 %3734  ;;  %v3786_v33 = vmul.f32 %v5805_v2, %v7357_v6 }
 0x548   : > { %5814 = vrsqrt.f32 %v3759_v50  ;;  %v3760_v47 = vadd.f32 1e-12, %v3735_v54 }
 0x549   : > { %v3737_v43 = vpop.xlane.xlu1 %3736 }
 0x54a   : > { %v5807_v59 = vpop.eup %5806  ;;  %5816 = vrsqrt.f32 %v3760_v47  ;;  %v3761_v3 = vadd.f32 1e-12, %v3737_v43 }
 0x54b   : > { %v3739_v4 = vpop.xlane.xlu0 %3738  ;;  %v3787_v62 = vmul.f32 %v5807_v59, %v7368_v60 }
 0x54c   : > { %v5809_v39 = vpop.eup %5808  ;;  %5818 = vrsqrt.f32 %v3761_v3  ;;  %v3762_v53 = vadd.f32 1e-12, %v3739_v4 }
 0x54d   : > { %v3741_v5 = vpop.xlane.xlu1 %3740  ;;  %v3802_v25 = vpack.c.bf16 %v3787_v62, %v3786_v33  ;;  %v3788_v30 = vmul.f32 %v5809_v39, %v7377_v20 }
 0x54e   : > { %v5811_v34 = vpop.eup %5810  ;;  %5820 = vrsqrt.f32 %v3762_v53  ;;  %v3763_v13 = vadd.f32 1e-12, %v3741_v5 }
 0x54f   : > { %v3789_v0 = vmul.f32 %v5811_v34, %v7383_v37  ;;  %v3743_v16 = vpop.xlane.xlu0 %3742  ;;  %5464 = vmatprep.mubr.bf16.mxu1 %v3802_v25  ;;  %v4115_v25 = vlaneseq }
 0x550   : > { %v5813_v63 = vpop.eup %5812  ;;  %5822 = vrsqrt.f32 %v3763_v13  ;;  %v3764_v46 = vadd.f32 1e-12, %v3743_v16 }
 0x551   : > { %v3745_v6 = vpop.xlane.xlu1 %3744  ;;  %v3803_v41 = vpack.c.bf16 %v3789_v0, %v3788_v30  ;;  %v3790_v57 = vmul.f32 %v5813_v63, %v7391_v55  ;;  %v7632_v30 = vand.u32 127, %v4115_v25 }
 0x552   : > { %v5815_v60 = vpop.eup %5814  ;;  %5824 = vrsqrt.f32 %v3764_v46  ;;  %v3765_v1 = vadd.f32 1e-12, %v3745_v6 }
 0x553   : > { %v3747_v26 = vpop.xlane.xlu0 %3746  ;;  %5465 = vmatmul.mubr.bf16.vlgmr.msra.gmra.mrb[48].mxu1 %v3803_v41  ;;  %v3791_v36 = vmul.f32 %v5815_v60, %v7398_v24  ;;  %vm4117_vm6 = vcmp.lt.s32.totalorder %v7632_v30, 8 }
 0x554   : > { %v5817_v51 = vpop.eup %5816  ;;  %5826 = vrsqrt.f32 %v3765_v1  ;;  %v3766_v20 = vadd.f32 1e-12, %v3747_v26 }
 0x555   : > { %v3749_v37 = vpop.xlane.xlu1 %3748  ;;  %v3804_v7 = vpack.c.bf16 %v3791_v36, %v3790_v57  ;;  %v3792_v49 = vmul.f32 %v5817_v51, %v7402_v56 }
 0x556   : > { %v5819_v31 = vpop.eup %5818  ;;  %5828 = vrsqrt.f32 %v3766_v20  ;;  %v3767_v38 = vadd.f32 1e-12, %v3749_v37 }
 0x557   : > { %v3751_v44 = vpop.xlane.xlu0 %3750  ;;  %5468 = vmatprep.mubr.bf16.mxu1 %v3804_v7  ;;  %v3793_v15 = vmul.f32 %v5819_v31, %v7412_v61 }
 0x558   : > { %v5821_v52 = vpop.eup %5820  ;;  %5830 = vrsqrt.f32 %v3767_v38  ;;  %v3768_v45 = vadd.f32 1e-12, %v3751_v44 }
 0x559   : > { %v3753_v55 = vpop.xlane.xlu1 %3752  ;;  %v3805_v17 = vpack.c.bf16 %v3793_v15, %v3792_v49  ;;  %v3794_v27 = vmul.f32 %v5821_v52, %v7416_v14 }
 0x55a   : > { %v5823_v24 = vpop.eup %5822  ;;  %5832 = vrsqrt.f32 %v3768_v45  ;;  %v3769_v32 = vadd.f32 1e-12, %v3753_v55 }
 0x55b   : > { %5469 = vmatmul.mubr.bf16.gmra.mrb[52].mxu1 %v3805_v17  ;;  %v3795_v40 = vmul.f32 %v5823_v24, %v7429_v8 }
 0x55c   : > { %v5825_v10 = vpop.eup %5824  ;;  %5834 = vrsqrt.f32 %v3769_v32 }
 0x55d   : > { %v3806_v48 = vpack.c.bf16 %v3795_v40, %v3794_v27  ;;  %v3796_v56 = vmul.f32 %v5825_v10, %v7433_v42 }
 0x55e   : > { %v5827_v19 = vpop.eup %5826 }
 0x55f   : > { %5472 = vmatprep.mubr.bf16.mxu1 %v3806_v48  ;;  %v3797_v61 = vmul.f32 %v5827_v19, %v7446_v58 }
 0x560   : > { %v5829_v11 = vpop.eup %5828 }
 0x561   : > { %v3807_v12 = vpack.c.bf16 %v3797_v61, %v3796_v56  ;;  %v3798_v28 = vmul.f32 %v5829_v11, %v7450_v23 }
 0x562   : > { %v5831_v18 = vpop.eup %5830 }
 0x563   : > { %5473 = vmatmul.mubr.bf16.gmra.mrb[56].mxu1 %v3807_v12  ;;  %v3799_v21 = vmul.f32 %v5831_v18, %v7463_v29 }
 0x564   : > { %v5833_v14 = vpop.eup %5832 }
 0x565   : > { %v3808_v35 = vpack.c.bf16 %v3799_v21, %v3798_v28  ;;  %v3800_v50 = vmul.f32 %v5833_v14, %v7467_v9 }
 0x566   : > { %v5835_v8 = vpop.eup %5834 }
 0x567   : > { %5476 = vmatprep.mubr.bf16.mxu1 %v3808_v35  ;;  %v3801_v54 = vmul.f32 %v5835_v8, %v7478_v22 }
 0x569   : > { %v3809_v2 = vpack.c.bf16 %v3801_v54, %v3800_v50 }
 0x56b   : > { %5477 = vmatmul.mubr.bf16.gmra.mrb[60].mxu1 %v3809_v2 }
 0x626   : > { %v7504_v42 = vpop.f32.mrb[48].mxu1 }
 0x627   : > { %4023 = vrot.lane.b32.xlu0 %v7504_v42, %s5919_s15  ;;  %3975 = vrot.lane.b32.xlu1 %v7504_v42, %s5920_s16  ;;  %v7510_v58 = vpop.f32.mrb[49].mxu1 }
 0x628   : > { %v7512_v23 = vpop.f32.mrb[50].mxu1 }
 0x629   : > { %v7514_v29 = vpop.f32.mrb[51].mxu1 }
 0x62b   : > { %4071 = vrot.lane.b32.xlu0 %v7504_v42, %s5921_s18  ;;  %3977 = vrot.lane.b32.xlu1 %v7512_v23, %s5920_s16 }
 0x62e   : > { %v7520_v9 = vpop.f32.mrb[52].mxu1 }
 0x62f   : > { %3971 = vrot.lane.b32.xlu0 %v7510_v58, %s5920_s16  ;;  %4025 = vrot.lane.b32.xlu1 %v7512_v23, %s5919_s15  ;;  %v7526_v22 = vpop.f32.mrb[53].mxu1 }
 0x630   : > { %v7528_v47 = vpop.f32.mrb[54].mxu1 }
 0x631   : > { %v7530_v43 = vpop.f32.mrb[55].mxu1 }
 0x633   : > { %4019 = vrot.lane.b32.xlu0 %v7510_v58, %s5919_s15  ;;  %4073 = vrot.lane.b32.xlu1 %v7512_v23, %s5921_s18 }
 0x636   : > { %v7536_v59 = vpop.f32.mrb[56].mxu1 }
 0x637   : > { %4067 = vrot.lane.b32.xlu0 %v7510_v58, %s5921_s18  ;;  %3973 = vrot.lane.b32.xlu1 %v7514_v29, %s5920_s16  ;;  %v7542_v3 = vpop.f32.mrb[57].mxu1 }
 0x638   : > { %v7544_v4 = vpop.f32.mrb[58].mxu1 }
 0x639   : > { %v7546_v33 = vpop.f32.mrb[59].mxu1 }
 0x63b   : > { %4021 = vrot.lane.b32.xlu1 %v7514_v29, %s5919_s15  ;;  %3983 = vrot.lane.b32.xlu0 %v7520_v9, %s5920_s16 }
 0x63e   : > { %v7552_v62 = vpop.f32.mrb[60].mxu1 }
 0x63f   : > { %4069 = vrot.lane.b32.xlu1 %v7514_v29, %s5921_s18  ;;  %4031 = vrot.lane.b32.xlu0 %v7520_v9, %s5919_s15  ;;  %v7558_v39 = vpop.f32.mrb[61].mxu1 }
 0x640   : > { %v7560_v53 = vpop.f32.mrb[62].mxu1 }
 0x641   : > { %v7562_v5 = vpop.f32.mrb[63].mxu1 }
 0x643   : > { %4079 = vrot.lane.b32.xlu0 %v7520_v9, %s5921_s18  ;;  %3985 = vrot.lane.b32.xlu1 %v7528_v47, %s5920_s16 }
 0x647   : > { %3979 = vrot.lane.b32.xlu0 %v7526_v22, %s5920_s16  ;;  %4033 = vrot.lane.b32.xlu1 %v7528_v47, %s5919_s15 }
 0x64b   : > { %4027 = vrot.lane.b32.xlu0 %v7526_v22, %s5919_s15  ;;  %4081 = vrot.lane.b32.xlu1 %v7528_v47, %s5921_s18 }
 0x64f   : > { %4075 = vrot.lane.b32.xlu0 %v7526_v22, %s5921_s18  ;;  %3981 = vrot.lane.b32.xlu1 %v7530_v43, %s5920_s16 }
 0x653   : > { %4029 = vrot.lane.b32.xlu1 %v7530_v43, %s5919_s15  ;;  %3991 = vrot.lane.b32.xlu0 %v7536_v59, %s5920_s16 }
 0x657   : > { %4077 = vrot.lane.b32.xlu1 %v7530_v43, %s5921_s18  ;;  %4039 = vrot.lane.b32.xlu0 %v7536_v59, %s5919_s15 }
 0x65b   : > { %4087 = vrot.lane.b32.xlu0 %v7536_v59, %s5921_s18  ;;  %3993 = vrot.lane.b32.xlu1 %v7544_v4, %s5920_s16 }
 0x65f   : > { %3987 = vrot.lane.b32.xlu0 %v7542_v3, %s5920_s16  ;;  %4041 = vrot.lane.b32.xlu1 %v7544_v4, %s5919_s15 }
 0x663   : > { %4035 = vrot.lane.b32.xlu0 %v7542_v3, %s5919_s15  ;;  %4089 = vrot.lane.b32.xlu1 %v7544_v4, %s5921_s18 }
 0x667   : > { %4083 = vrot.lane.b32.xlu0 %v7542_v3, %s5921_s18  ;;  %3989 = vrot.lane.b32.xlu1 %v7546_v33, %s5920_s16 }
 0x66b   : > { %4037 = vrot.lane.b32.xlu1 %v7546_v33, %s5919_s15  ;;  %3999 = vrot.lane.b32.xlu0 %v7552_v62, %s5920_s16 }
 0x66f   : > { %4085 = vrot.lane.b32.xlu1 %v7546_v33, %s5921_s18  ;;  %4047 = vrot.lane.b32.xlu0 %v7552_v62, %s5919_s15 }
 0x673   : > { %3995 = vrot.lane.b32.xlu0 %v7558_v39, %s5920_s16  ;;  %4001 = vrot.lane.b32.xlu1 %v7560_v53, %s5920_s16 }
 0x677   : > { %4043 = vrot.lane.b32.xlu0 %v7558_v39, %s5919_s15  ;;  %4049 = vrot.lane.b32.xlu1 %v7560_v53, %s5919_s15 }
 0x67b   : > { %4091 = vrot.lane.b32.xlu0 %v7558_v39, %s5921_s18  ;;  %3997 = vrot.lane.b32.xlu1 %v7562_v5, %s5920_s16 }
 0x67f   : > { %4095 = vrot.lane.b32.xlu0 %v7552_v62, %s5921_s18  ;;  %4045 = vrot.lane.b32.xlu1 %v7562_v5, %s5919_s15 }
 0x683   : > { %4093 = vrot.lane.b32.xlu1 %v7562_v5, %s5921_s18 }
 0x687   : > { %4097 = vrot.lane.b32.xlu1 %v7560_v53, %s5921_s18 }
 0x699   : > { %v3976_v34 = vpop.permute.xlu1 %3975  ;;  %v4024_v13 = vpop.permute.xlu0 %4023 }
 0x69a   : > { %v4005_v0 = vmax.f32 %v7504_v42, %v3976_v34 }
 0x69c   : > { %v4053_v16 = vmax.f32 %v4005_v0, %v4024_v13 }
 0x69d   : > { %v3978_v63 = vpop.permute.xlu1 %3977  ;;  %v4072_v46 = vpop.permute.xlu0 %4071 }
 0x69e   : > { %v4101_v6 = vmax.f32 %v4053_v16, %v4072_v46  ;;  %v4006_v51 = vmax.f32 %v7512_v23, %v3978_v63 }
 0x6a0   : > { %v7638_v41 = vsel %vm4117_vm6, %v4101_v6, 0.0 }
 0x6a1   : > { %v4026_v60 = vpop.permute.xlu1 %4025  ;;  %4138 = vadd.xlane.f32.xlu0 %v7638_v41  ;;  %v3972_v1 = vpop.permute.xlu0 %3971 }
 0x6a2   : > { %v4003_v36 = vmax.f32 %v7510_v58, %v3972_v1  ;;  %v4054_v31 = vmax.f32 %v4006_v51, %v4026_v60 }
 0x6a5   : > { %v4074_v26 = vpop.permute.xlu1 %4073  ;;  %v4020_v57 = vpop.permute.xlu0 %4019 }
 0x6a6   : > { %v4051_v20 = vmax.f32 %v4003_v36, %v4020_v57  ;;  %v4102_v44 = vmax.f32 %v4054_v31, %v4074_v26 }
 0x6a8   : > { %v7651_v17 = vsel %vm4117_vm6, %v4102_v44, 0.0 }
 0x6a9   : > { %v3974_v37 = vpop.permute.xlu1 %3973  ;;  %v4068_v7 = vpop.permute.xlu0 %4067 }
 0x6aa   : > { %v4099_v38 = vmax.f32 %v4051_v20, %v4068_v7  ;;  %v4004_v45 = vmax.f32 %v7514_v29, %v3974_v37 }
 0x6ac   : > { %v7645_v49 = vsel %vm4117_vm6, %v4099_v38, 0.0 }
 0x6ad   : > { %v4022_v15 = vpop.permute.xlu1 %4021  ;;  %4134 = vadd.xlane.f32.xlu0 %v7645_v49  ;;  %v3984_v52 = vpop.permute.xlu0 %3983 }
 0x6ae   : > { %v4052_v55 = vmax.f32 %v4004_v45, %v4022_v15  ;;  %v4009_v27 = vmax.f32 %v7520_v9, %v3984_v52 }
 0x6b1   : > { %v4070_v24 = vpop.permute.xlu1 %4069  ;;  %4140 = vadd.xlane.f32.xlu0 %v7651_v17  ;;  %v4032_v32 = vpop.permute.xlu0 %4031 }
 0x6b2   : > { %v4100_v40 = vmax.f32 %v4052_v55, %v4070_v24  ;;  %v4057_v10 = vmax.f32 %v4009_v27, %v4032_v32 }
 0x6b4   : > { %v7657_v48 = vsel %vm4117_vm6, %v4100_v40, 0.0 }
 0x6b5   : > { %v3986_v19 = vpop.permute.xlu1 %3985  ;;  %4136 = vadd.xlane.f32.xlu1 %v7657_v48  ;;  %v4080_v56 = vpop.permute.xlu0 %4079 }
 0x6b6   : > { %v4105_v61 = vmax.f32 %v4057_v10, %v4080_v56  ;;  %v4010_v28 = vmax.f32 %v7528_v47, %v3986_v19 }
 0x6b8   : > { %v7662_v11 = vsel %vm4117_vm6, %v4105_v61, 0.0 }
 0x6b9   : > { %v4034_v12 = vpop.permute.xlu1 %4033  ;;  %4146 = vadd.xlane.f32.xlu0 %v7662_v11  ;;  %v3980_v18 = vpop.permute.xlu0 %3979 }
 0x6ba   : > { %v4058_v21 = vmax.f32 %v4010_v28, %v4034_v12  ;;  %v4007_v8 = vmax.f32 %v7526_v22, %v3980_v18 }
 0x6bd   : > { %v4082_v14 = vpop.permute.xlu1 %4081  ;;  %v4028_v35 = vpop.permute.xlu0 %4027 }
 0x6be   : > { %v4106_v50 = vmax.f32 %v4058_v21, %v4082_v14  ;;  %v4055_v54 = vmax.f32 %v4007_v8, %v4028_v35 }
 0x6c0   : > { %v7669_v2 = vsel %vm4117_vm6, %v4106_v50, 0.0 }
 0x6c1   : > { %v3982_v42 = vpop.permute.xlu1 %3981  ;;  %4148 = vadd.xlane.f32.xlu1 %v7669_v2  ;;  %v4076_v58 = vpop.permute.xlu0 %4075 }
 0x6c2   : > { %v4103_v23 = vmax.f32 %v4055_v54, %v4076_v58  ;;  %v4008_v22 = vmax.f32 %v7530_v43, %v3982_v42 }
 0x6c4   : > { %v7674_v29 = vsel %vm4117_vm6, %v4103_v23, 0.0 }
 0x6c5   : > { %v4030_v9 = vpop.permute.xlu1 %4029  ;;  %4142 = vadd.xlane.f32.xlu0 %v7674_v29  ;;  %v3992_v47 = vpop.permute.xlu0 %3991 }
 0x6c6   : > { %v4056_v25 = vmax.f32 %v4008_v22, %v4030_v9  ;;  %v4013_v0 = vmax.f32 %v7536_v59, %v3992_v47 }
 0x6c9   : > { %v4078_v34 = vpop.permute.xlu1 %4077  ;;  %v4040_v13 = vpop.permute.xlu0 %4039 }
 0x6ca   : > { %v4104_v16 = vmax.f32 %v4056_v25, %v4078_v34  ;;  %v4061_v63 = vmax.f32 %v4013_v0, %v4040_v13 }
 0x6cc   : > { %v7681_v46 = vsel %vm4117_vm6, %v4104_v16, 0.0 }
 0x6cd   : > { %v3994_v6 = vpop.permute.xlu1 %3993  ;;  %4144 = vadd.xlane.f32.xlu1 %v7681_v46  ;;  %v4088_v60 = vpop.permute.xlu0 %4087 }
 0x6ce   : > { %v4109_v1 = vmax.f32 %v4061_v63, %v4088_v60  ;;  %v4014_v59 = vmax.f32 %v7544_v4, %v3994_v6 }
 0x6d0   : > { %v7686_v26 = vsel %vm4117_vm6, %v4109_v1, 0.0 }
 0x6d1   : > { %v4042_v43 = vpop.permute.xlu1 %4041  ;;  %4154 = vadd.xlane.f32.xlu0 %v7686_v26  ;;  %v3988_v57 = vpop.permute.xlu0 %3987 }
 0x6d2   : > { %v4062_v36 = vmax.f32 %v4014_v59, %v4042_v43  ;;  %v4011_v37 = vmax.f32 %v7542_v3, %v3988_v57 }
 0x6d5   : > { %v4090_v51 = vpop.permute.xlu1 %4089  ;;  %v4036_v20 = vpop.permute.xlu0 %4035 }
 0x6d6   : > { %v4110_v7 = vmax.f32 %v4062_v36, %v4090_v51  ;;  %v4059_v31 = vmax.f32 %v4011_v37, %v4036_v20 }
 0x6d8   : > { %v7693_v38 = vsel %vm4117_vm6, %v4110_v7, 0.0 }
 0x6d9   : > { %v3990_v44 = vpop.permute.xlu1 %3989  ;;  %4156 = vadd.xlane.f32.xlu1 %v7693_v38  ;;  %v4084_v15 = vpop.permute.xlu0 %4083 }
 0x6da   : > { %v4107_v52 = vmax.f32 %v4059_v31, %v4084_v15  ;;  %v4012_v3 = vmax.f32 %v7546_v33, %v3990_v44 }
 0x6dc   : > { %v7698_v45 = vsel %vm4117_vm6, %v4107_v52, 0.0 }
 0x6dd   : > { %v4038_v4 = vpop.permute.xlu1 %4037  ;;  %4150 = vadd.xlane.f32.xlu0 %v7698_v45  ;;  %v4000_v55 = vpop.permute.xlu0 %3999 }
 0x6de   : > { %v4060_v24 = vmax.f32 %v4012_v3, %v4038_v4  ;;  %v4017_v33 = vmax.f32 %v7552_v62, %v4000_v55 }
 0x6e1   : > { %v4086_v32 = vpop.permute.xlu1 %4085  ;;  %v4048_v27 = vpop.permute.xlu0 %4047 }
 0x6e2   : > { %v4108_v40 = vmax.f32 %v4060_v24, %v4086_v32  ;;  %v4065_v8 = vmax.f32 %v4017_v33, %v4048_v27 }
 0x6e4   : > { %v7704_v10 = vsel %vm4117_vm6, %v4108_v40, 0.0 }
 0x6e5   : > { %v4002_v19 = vpop.permute.xlu1 %4001  ;;  %4152 = vadd.xlane.f32.xlu1 %v7704_v10  ;;  %v3996_v56 = vpop.permute.xlu0 %3995 }
 0x6e6   : > { %v4015_v18 = vmax.f32 %v7558_v39, %v3996_v56  ;;  %v4018_v62 = vmax.f32 %v7560_v53, %v4002_v19 }
 0x6e9   : > { %v4050_v61 = vpop.permute.xlu1 %4049  ;;  %v4044_v12 = vpop.permute.xlu0 %4043 }
 0x6ea   : > { %v4063_v28 = vmax.f32 %v4015_v18, %v4044_v12  ;;  %v4066_v25 = vmax.f32 %v4018_v62, %v4050_v61 }
 0x6ed   : > { %v3998_v21 = vpop.permute.xlu1 %3997  ;;  %v4092_v14 = vpop.permute.xlu0 %4091 }
 0x6ee   : > { %v4111_v35 = vmax.f32 %v4063_v28, %v4092_v14  ;;  %v4016_v58 = vmax.f32 %v7562_v5, %v3998_v21 }
 0x6f0   : > { %v7711_v50 = vsel %vm4117_vm6, %v4111_v35, 0.0 }
 0x6f1   : > { %v4046_v54 = vpop.permute.xlu1 %4045  ;;  %4158 = vadd.xlane.f32.xlu0 %v7711_v50  ;;  %v4096_v42 = vpop.permute.xlu0 %4095 }
 0x6f2   : > { %v4113_v23 = vmax.f32 %v4065_v8, %v4096_v42  ;;  %v4064_v9 = vmax.f32 %v4016_v58, %v4046_v54 }
 0x6f4   : > { %v7717_v39 = vsel %vm4117_vm6, %v4113_v23, 0.0 }
 0x6f5   : > { %v4094_v47 = vpop.permute.xlu1 %4093  ;;  %4162 = vadd.xlane.f32.xlu0 %v7717_v39 }
 0x6f6   : > { %v4112_v22 = vmax.f32 %v4064_v9, %v4094_v47 }
 0x6f8   : > { %v7723_v34 = vsel %vm4117_vm6, %v4112_v22, 0.0 }
 0x6f9   : > { %4160 = vadd.xlane.f32.xlu1 %v7723_v34  ;;  %v4098_v5 = vpop.permute.xlu1 %4097 }
 0x6fa   : > { %v4114_v13 = vmax.f32 %v4066_v25, %v4098_v5 }
 0x6fc   : > { %v7728_v0 = vsel %vm4117_vm6, %v4114_v13, 0.0 }
 0x6fd   : > { %4164 = vadd.xlane.f32.xlu1 %v7728_v0 }
 0x72e   : > { %v4139_v16 = vpop.xlane.xlu0 %4138 }
 0x72f   : > { %v7731_v63 = vmul.f32 0.125, %v4139_v16 }
 0x731   : > { %v7735_v53 = vsub.f32 %v7638_v41, %v7731_v63 }
 0x733   : > { %v4200_v6 = vmul.f32 %v7735_v53, %v7735_v53 }
 0x735   : > { %4218 = vadd.xlane.f32.xlu0 %v4200_v6 }
 0x73a   : > { %v4135_v60 = vpop.xlane.xlu0 %4134 }
 0x73b   : > { %v7739_v1 = vmul.f32 0.125, %v4135_v60 }
 0x73d   : > { %v7743_v30 = vsub.f32 %v7645_v49, %v7739_v1 }
 0x73e   : > { %v4141_v43 = vpop.xlane.xlu0 %4140 }
 0x73f   : > { %v7745_v57 = vmul.f32 0.125, %v4141_v43  ;;  %v4198_v59 = vmul.f32 %v7743_v30, %v7743_v30 }
 0x741   : > { %v7751_v41 = vsub.f32 %v7651_v17, %v7745_v57  ;;  %4214 = vadd.xlane.f32.xlu0 %v4198_v59 }
 0x742   : > { %v4137_v36 = vpop.xlane.xlu1 %4136 }
 0x743   : > { %v7753_v51 = vmul.f32 0.125, %v4137_v36  ;;  %v4201_v20 = vmul.f32 %v7751_v41, %v7751_v41 }
 0x745   : > { %v7759_v49 = vsub.f32 %v7657_v48, %v7753_v51  ;;  %4220 = vadd.xlane.f32.xlu1 %v4201_v20 }
 0x746   : > { %v4147_v37 = vpop.xlane.xlu0 %4146 }
 0x747   : > { %v7761_v7 = vmul.f32 0.125, %v4147_v37  ;;  %v4199_v31 = vmul.f32 %v7759_v49, %v7759_v49 }
 0x749   : > { %v7767_v17 = vsub.f32 %v7662_v11, %v7761_v7  ;;  %4216 = vadd.xlane.f32.xlu1 %v4199_v31  ;;  %v4249_v31 = vmul.f32 120.0, %v7745_v57 }
 0x74b   : > { %v4204_v44 = vmul.f32 %v7767_v17, %v7767_v17 }
 0x74d   : > { %4226 = vadd.xlane.f32.xlu0 %v4204_v44 }
 0x74e   : > { %v4149_v15 = vpop.xlane.xlu1 %4148 }
 0x74f   : > { %v7771_v52 = vmul.f32 0.125, %v4149_v15 }
 0x751   : > { %v7775_v48 = vsub.f32 %v7669_v2, %v7771_v52 }
 0x752   : > { %v4143_v4 = vpop.xlane.xlu0 %4142 }
 0x753   : > { %v7777_v55 = vmul.f32 0.125, %v4143_v4  ;;  %v4205_v3 = vmul.f32 %v7775_v48, %v7775_v48 }
 0x755   : > { %v7783_v11 = vsub.f32 %v7674_v29, %v7777_v55  ;;  %4228 = vadd.xlane.f32.xlu1 %v4205_v3  ;;  %v4247_v3 = vmul.f32 120.0, %v7753_v51 }
 0x757   : > { %v4202_v24 = vmul.f32 %v7783_v11, %v7783_v11 }
 0x759   : > { %4222 = vadd.xlane.f32.xlu0 %v4202_v24 }
 0x75a   : > { %v4145_v32 = vpop.xlane.xlu1 %4144 }
 0x75b   : > { %v7787_v27 = vmul.f32 0.125, %v4145_v32 }
 0x75d   : > { %v7791_v2 = vsub.f32 %v7681_v46, %v7787_v27 }
 0x75e   : > { %v4155_v40 = vpop.xlane.xlu0 %4154 }
 0x75f   : > { %v7793_v19 = vmul.f32 0.125, %v4155_v40  ;;  %v4203_v56 = vmul.f32 %v7791_v2, %v7791_v2  ;;  %v7871_v40 = vld [vmem:[%s7992_s5 + $0x5] ss:$0 sm:$0xff] }
 0x761   : > { %v7799_v29 = vsub.f32 %v7686_v26, %v7793_v19  ;;  %4224 = vadd.xlane.f32.xlu1 %v4203_v56 }
 0x763   : > { %v4208_v61 = vmul.f32 %v7799_v29, %v7799_v29 }
 0x765   : > { %4234 = vadd.xlane.f32.xlu0 %v4208_v61 }
 0x766   : > { %v4157_v12 = vpop.xlane.xlu1 %4156 }
 0x767   : > { %v7803_v18 = vmul.f32 0.125, %v4157_v12  ;;  %v7877_v12 = vld [vmem:[%s7992_s5 + $0x6] ss:$0 sm:$0xff] }
 0x769   : > { %v7807_v46 = vsub.f32 %v7693_v38, %v7803_v18 }
 0x76a   : > { %v4151_v28 = vpop.xlane.xlu0 %4150 }
 0x76b   : > { %v7809_v21 = vmul.f32 0.125, %v4151_v28  ;;  %v4209_v14 = vmul.f32 %v7807_v46, %v7807_v46  ;;  %v4263_v28 = vmul.f32 %v4247_v3, %v7753_v51 }
 0x76d   : > { %v7815_v26 = vsub.f32 %v7698_v45, %v7809_v21  ;;  %4236 = vadd.xlane.f32.xlu1 %v4209_v14  ;;  %v4252_v14 = vmul.f32 120.0, %v7761_v7 }
 0x76f   : > { %v4206_v33 = vmul.f32 %v7815_v26, %v7815_v26 }
 0x771   : > { %4230 = vadd.xlane.f32.xlu0 %v4206_v33 }
 0x772   : > { %v4153_v35 = vpop.xlane.xlu1 %4152 }
 0x773   : > { %v7819_v8 = vmul.f32 0.125, %v4153_v35 }
 0x775   : > { %v7823_v38 = vsub.f32 %v7704_v10, %v7819_v8 }
 0x777   : > { %v4207_v54 = vmul.f32 %v7823_v38, %v7823_v38 }
 0x779   : > { %4232 = vadd.xlane.f32.xlu1 %v4207_v54 }
 0x77e   : > { %v4159_v42 = vpop.xlane.xlu0 %4158 }
 0x77f   : > { %v7827_v58 = vmul.f32 0.125, %v4159_v42 }
 0x781   : > { %v7831_v45 = vsub.f32 %v7711_v50, %v7827_v58 }
 0x782   : > { %v4163_v23 = vpop.xlane.xlu0 %4162 }
 0x783   : > { %v7833_v9 = vmul.f32 0.125, %v4163_v23  ;;  %v4210_v47 = vmul.f32 %v7831_v45, %v7831_v45 }
 0x785   : > { %v7839_v10 = vsub.f32 %v7717_v39, %v7833_v9  ;;  %4238 = vadd.xlane.f32.xlu0 %v4210_v47  ;;  %v4268_v47 = vmul.f32 %v4252_v14, %v7761_v7 }
 0x786   : > { %v4161_v62 = vpop.xlane.xlu1 %4160 }
 0x787   : > { %v7841_v22 = vmul.f32 0.125, %v4161_v62  ;;  %v4212_v25 = vmul.f32 %v7839_v10, %v7839_v10 }
 0x789   : > { %v7847_v50 = vsub.f32 %v7723_v34, %v7841_v22  ;;  %4242 = vadd.xlane.f32.xlu0 %v4212_v25  ;;  %v4248_v34 = vmul.f32 120.0, %v7731_v63 }
 0x78a   : > { %v4165_v5 = vpop.xlane.xlu1 %4164 }
 0x78b   : > { %v7849_v13 = vmul.f32 0.125, %v4165_v5  ;;  %v4211_v39 = vmul.f32 %v7847_v50, %v7847_v50  ;;  %v4264_v60 = vmul.f32 %v4248_v34, %v7731_v63  ;;  %v4265_v63 = vmul.f32 %v4249_v31, %v7745_v57 }
 0x78d   : > { %v7855_v16 = vsub.f32 %v7728_v0, %v7849_v13  ;;  %4240 = vadd.xlane.f32.xlu1 %v4211_v39  ;;  %v4246_v0 = vmul.f32 120.0, %v7739_v1  ;;  %v4253_v39 = vmul.f32 120.0, %v7771_v52 }
 0x78f   : > { %v4213_v6 = vmul.f32 %v7855_v16, %v7855_v16  ;;  %v4262_v37 = vmul.f32 %v4246_v0, %v7739_v1 }
 0x791   : > { %4244 = vadd.xlane.f32.xlu1 %v4213_v6 }
 0x7c2   : > { %v4219_v43 = vpop.xlane.xlu0 %4218 }
 0x7c3   : > { %v4280_v59 = vsub.f32 %v4219_v43, %v4264_v60  ;;  %v4269_v43 = vmul.f32 %v4253_v39, %v7771_v52 }
 0x7c5   : > { %v4296_v36 = vmul.f32 0.125, %v4280_v59  ;;  %v4250_v59 = vmul.f32 120.0, %v7777_v55 }
 0x7c7   : > { %v4312_v20 = vadd.f32 1e-05, %v4296_v36 }
 0x7c9   : > { %5836 = vrsqrt.f32 %v4312_v20 }
 0x7ce   : > { %v4215_v44 = vpop.xlane.xlu0 %4214 }
 0x7cf   : > { %v4278_v15 = vsub.f32 %v4215_v44, %v4262_v37 }
 0x7d1   : > { %v4294_v4 = vmul.f32 0.125, %v4278_v15  ;;  %v4266_v15 = vmul.f32 %v4250_v59, %v7777_v55  ;;  %v4254_v59 = vmul.f32 120.0, %v7809_v21 }
 0x7d2   : > { %v4221_v24 = vpop.xlane.xlu1 %4220 }
 0x7d3   : > { %v5837_v32 = vpop.eup %5836  ;;  %v4310_v56 = vadd.f32 1e-05, %v4294_v4  ;;  %v4281_v1 = vsub.f32 %v4221_v24, %v4265_v63 }
 0x7d4   : > { %v4344_v61 = vmul.f32 %v5837_v32, %v7735_v53 }
 0x7d5   : > { %5838 = vrsqrt.f32 %v4310_v56  ;;  %v4297_v57 = vmul.f32 0.125, %v4281_v1  ;;  %v4251_v1 = vmul.f32 120.0, %v7787_v27 }
 0x7d6   : > { %v4365_v33 = vmul.f32 %v7871_v40, %v4344_v61  ;;  %v4217_v35 = vpop.xlane.xlu1 %4216 }
 0x7d7   : > { %v4313_v53 = vadd.f32 1e-05, %v4297_v57  ;;  %v4279_v54 = vsub.f32 %v4217_v35, %v4263_v28  ;;  %v4267_v14 = vmul.f32 %v4251_v1, %v7787_v27 }
 0x7d8   : > { %v4386_v42 = vadd.f32 %v7877_v12, %v4365_v33  ;;  %v4256_v33 = vmul.f32 120.0, %v7793_v19 }
 0x7d9   : > { %5840 = vrsqrt.f32 %v4313_v53  ;;  %v4295_v23 = vmul.f32 0.125, %v4279_v54 }
 0x7da   : > { %4402 = vst [vmem:[%s7885_s9 + $0x10] sm:$0xff] %v4386_v42  ;;  %v4227_v51 = vpop.xlane.xlu0 %4226 }
 0x7db   : > { %v4311_v62 = vadd.f32 1e-05, %v4295_v23  ;;  %v4284_v25 = vsub.f32 %v4227_v51, %v4268_v47  ;;  %v4272_v23 = vmul.f32 %v4256_v33, %v7793_v19 }
 0x7dd   : > { %5842 = vrsqrt.f32 %v4311_v62  ;;  %v4300_v5 = vmul.f32 0.125, %v4284_v25 }
 0x7df   : > { %v5839_v6 = vpop.eup %5838  ;;  %v4316_v34 = vadd.f32 1e-05, %v4300_v5  ;;  %v4257_v5 = vmul.f32 120.0, %v7803_v18 }
 0x7e0   : > { %v4342_v60 = vmul.f32 %v5839_v6, %v7743_v30 }
 0x7e1   : > { %5844 = vrsqrt.f32 %v4316_v34 }
 0x7e2   : > { %v4363_v7 = vmul.f32 %v7871_v40, %v4342_v60  ;;  %v4229_v36 = vpop.xlane.xlu1 %4228 }
 0x7e3   : > { %v5841_v20 = vpop.eup %5840  ;;  %v4285_v0 = vsub.f32 %v4229_v36, %v4269_v43  ;;  %v4273_v43 = vmul.f32 %v4257_v5, %v7803_v18 }
 0x7e4   : > { %v4384_v37 = vadd.f32 %v7877_v12, %v4363_v7  ;;  %v4345_v31 = vmul.f32 %v5841_v20, %v7751_v41 }
 0x7e5   : > { %v4301_v44 = vmul.f32 0.125, %v4285_v0 }
 0x7e6   : > { %4400 = vst [vmem:[%s7885_s9] sm:$0xff] %v4384_v37  ;;  %v4366_v30 = vmul.f32 %v7871_v40, %v4345_v31  ;;  %v4223_v4 = vpop.xlane.xlu0 %4222  ;;  %v4270_v37 = vmul.f32 %v4254_v59, %v7809_v21 }
 0x7e7   : > { %v5843_v52 = vpop.eup %5842  ;;  %v4317_v63 = vadd.f32 1e-05, %v4301_v44  ;;  %v4282_v3 = vsub.f32 %v4223_v4, %v4266_v15  ;;  %v4255_v4 = vmul.f32 120.0, %v7819_v8 }
 0x7e8   : > { %v4387_v24 = vadd.f32 %v7877_v12, %v4366_v30  ;;  %v4343_v32 = vmul.f32 %v5843_v52, %v7759_v49 }
 0x7e9   : > { %5846 = vrsqrt.f32 %v4317_v63  ;;  %v4298_v56 = vmul.f32 0.125, %v4282_v3 }
 0x7ea   : > { %4403 = vst [vmem:[%s7885_s9 + $0x18] sm:$0xff] %v4387_v24  ;;  %v4364_v41 = vmul.f32 %v7871_v40, %v4343_v32  ;;  %v4271_v32 = vmul.f32 %v4255_v4, %v7819_v8 }
 0x7eb   : > { %v5845_v55 = vpop.eup %5844  ;;  %v4314_v61 = vadd.f32 1e-05, %v4298_v56 }
 0x7ec   : > { %v4385_v57 = vadd.f32 %v7877_v12, %v4364_v41  ;;  %v4348_v28 = vmul.f32 %v5845_v55, %v7767_v17 }
 0x7ed   : > { %5848 = vrsqrt.f32 %v4314_v61 }
 0x7ee   : > { %4401 = vst [vmem:[%s7885_s9 + $0x8] sm:$0xff] %v4385_v57  ;;  %v4369_v49 = vmul.f32 %v7871_v40, %v4348_v28  ;;  %v4225_v35 = vpop.xlane.xlu1 %4224 }
 0x7ef   : > { %v4283_v53 = vsub.f32 %v4225_v35, %v4267_v14 }
 0x7f0   : > { %v4390_v54 = vadd.f32 %v7877_v12, %v4369_v49 }
 0x7f1   : > { %v4299_v42 = vmul.f32 0.125, %v4283_v53  ;;  %v4260_v53 = vmul.f32 120.0, %v7833_v9 }
 0x7f2   : > { %4406 = vst [vmem:[%s7885_s9 + $0x30] sm:$0xff] %v4390_v54  ;;  %v4235_v47 = vpop.xlane.xlu0 %4234 }
 0x7f3   : > { %v5847_v51 = vpop.eup %5846  ;;  %v4315_v17 = vadd.f32 1e-05, %v4299_v42  ;;  %v4288_v62 = vsub.f32 %v4235_v47, %v4272_v23 }
 0x7f4   : > { %v4349_v27 = vmul.f32 %v5847_v51, %v7775_v48  ;;  %v4276_v51 = vmul.f32 %v4260_v53, %v7833_v9 }
 0x7f5   : > { %5850 = vrsqrt.f32 %v4315_v17  ;;  %v4304_v25 = vmul.f32 0.125, %v4288_v62  ;;  %v4259_v17 = vmul.f32 120.0, %v7841_v22 }
 0x7f6   : > { %v4370_v39 = vmul.f32 %v7871_v40, %v4349_v27 }
 0x7f7   : > { %v5849_v6 = vpop.eup %5848  ;;  %v4320_v34 = vadd.f32 1e-05, %v4304_v25 }
 0x7f8   : > { %v4391_v60 = vadd.f32 %v7877_v12, %v4370_v39  ;;  %v4346_v19 = vmul.f32 %v5849_v6, %v7783_v11  ;;  %v4275_v39 = vmul.f32 %v4259_v17, %v7841_v22  ;;  %v4261_v6 = vmul.f32 120.0, %v7849_v13 }
 0x7f9   : > { %5852 = vrsqrt.f32 %v4320_v34 }
 0x7fa   : > { %4407 = vst [vmem:[%s7885_s9 + $0x38] sm:$0xff] %v4391_v60  ;;  %v4367_v48 = vmul.f32 %v7871_v40, %v4346_v19  ;;  %v4237_v7 = vpop.xlane.xlu1 %4236 }
 0x7fb   : > { %v4289_v36 = vsub.f32 %v4237_v7, %v4273_v43 }
 0x7fc   : > { %v4388_v20 = vadd.f32 %v7877_v12, %v4367_v48  ;;  %v4277_v48 = vmul.f32 %v4261_v6, %v7849_v13 }
 0x7fd   : > { %v4305_v0 = vmul.f32 0.125, %v4289_v36 }
 0x7fe   : > { %4404 = vst [vmem:[%s7885_s9 + $0x20] sm:$0xff] %v4388_v20  ;;  %v4231_v31 = vpop.xlane.xlu0 %4230 }
 0x7ff   : > { %v5851_v44 = vpop.eup %5850  ;;  %v4321_v11 = vadd.f32 1e-05, %v4305_v0  ;;  %v4286_v15 = vsub.f32 %v4231_v31, %v4270_v37 }
 0x800   : > { %v4347_v18 = vmul.f32 %v5851_v44, %v7791_v2 }
 0x801   : > { %5854 = vrsqrt.f32 %v4321_v11  ;;  %v4302_v30 = vmul.f32 0.125, %v4286_v15 }
 0x802   : > { %v4368_v52 = vmul.f32 %v7871_v40, %v4347_v18 }
 0x803   : > { %v5853_v63 = vpop.eup %5852  ;;  %v4318_v3 = vadd.f32 1e-05, %v4302_v30 }
 0x804   : > { %v4389_v24 = vadd.f32 %v7877_v12, %v4368_v52  ;;  %v4352_v21 = vmul.f32 %v5853_v63, %v7799_v29  ;;  %v4258_v29 = vmul.f32 120.0, %v7827_v58 }
 0x805   : > { %5856 = vrsqrt.f32 %v4318_v3 }
 0x806   : > { %4405 = vst [vmem:[%s7885_s9 + $0x28] sm:$0xff] %v4389_v24  ;;  %v4373_v56 = vmul.f32 %v7871_v40, %v4352_v21  ;;  %v4233_v2 = vpop.xlane.xlu1 %4232  ;;  %v4274_v35 = vmul.f32 %v4258_v29, %v7827_v58 }
 0x807   : > { %v4287_v1 = vsub.f32 %v4233_v2, %v4271_v32 }
 0x808   : > { %v4394_v41 = vadd.f32 %v7877_v12, %v4373_v56 }
 0x809   : > { %v4303_v55 = vmul.f32 0.125, %v4287_v1 }
 0x80a   : > { %4410 = vst [vmem:[%s7885_s9 + $0x50] sm:$0xff] %v4394_v41 }
 0x80b   : > { %v5855_v61 = vpop.eup %5854  ;;  %v4319_v57 = vadd.f32 1e-05, %v4303_v55 }
 0x80c   : > { %v4353_v28 = vmul.f32 %v5855_v61, %v7807_v46 }
 0x80d   : > { %5858 = vrsqrt.f32 %v4319_v57 }
 0x80e   : > { %v4374_v8 = vmul.f32 %v7871_v40, %v4353_v28 }
 0x80f   : > { %v5857_v14 = vpop.eup %5856 }
 0x810   : > { %v4395_v33 = vadd.f32 %v7877_v12, %v4374_v8  ;;  %v4350_v49 = vmul.f32 %v5857_v14, %v7815_v26 }
 0x812   : > { %4411 = vst [vmem:[%s7885_s9 + $0x58] sm:$0xff] %v4395_v33  ;;  %v4371_v54 = vmul.f32 %v7871_v40, %v4350_v49  ;;  %v4239_v42 = vpop.xlane.xlu0 %4238 }
 0x813   : > { %v4290_v46 = vsub.f32 %v4239_v42, %v4274_v35 }
 0x814   : > { %v4392_v23 = vadd.f32 %v7877_v12, %v4371_v54 }
 0x815   : > { %v4306_v47 = vmul.f32 0.125, %v4290_v46 }
 0x816   : > { %4408 = vst [vmem:[%s7885_s9 + $0x40] sm:$0xff] %v4392_v23  ;;  %v4243_v62 = vpop.xlane.xlu0 %4242 }
 0x817   : > { %v5859_v27 = vpop.eup %5858  ;;  %v4322_v26 = vadd.f32 1e-05, %v4306_v47  ;;  %v4292_v58 = vsub.f32 %v4243_v62, %v4276_v51 }
 0x818   : > { %v4351_v25 = vmul.f32 %v5859_v27, %v7823_v38 }
 0x819   : > { %5860 = vrsqrt.f32 %v4322_v26  ;;  %v4308_v5 = vmul.f32 0.125, %v4292_v58 }
 0x81a   : > { %v4372_v34 = vmul.f32 %v7871_v40, %v4351_v25  ;;  %v4241_v60 = vpop.xlane.xlu1 %4240 }
 0x81b   : > { %v4324_v9 = vadd.f32 1e-05, %v4308_v5  ;;  %v4291_v19 = vsub.f32 %v4241_v60, %v4275_v39 }
 0x81c   : > { %v4393_v43 = vadd.f32 %v7877_v12, %v4372_v34 }
 0x81d   : > { %5862 = vrsqrt.f32 %v4324_v9  ;;  %v4307_v59 = vmul.f32 0.125, %v4291_v19 }
 0x81e   : > { %4409 = vst [vmem:[%s7885_s9 + $0x48] sm:$0xff] %v4393_v43  ;;  %v4245_v38 = vpop.xlane.xlu1 %4244 }
 0x81f   : > { %v4323_v7 = vadd.f32 1e-05, %v4307_v59  ;;  %v4293_v36 = vsub.f32 %v4245_v38, %v4277_v48 }
 0x821   : > { %5864 = vrsqrt.f32 %v4323_v7  ;;  %v4309_v22 = vmul.f32 0.125, %v4293_v36 }
 0x823   : > { %v5861_v20 = vpop.eup %5860  ;;  %v4325_v0 = vadd.f32 1e-05, %v4309_v22 }
 0x824   : > { %v4354_v37 = vmul.f32 %v5861_v20, %v7831_v45 }
 0x825   : > { %5866 = vrsqrt.f32 %v4325_v0 }
 0x826   : > { %v4375_v31 = vmul.f32 %v7871_v40, %v4354_v37 }
 0x827   : > { %v5863_v44 = vpop.eup %5862 }
 0x828   : > { %v4396_v11 = vadd.f32 %v7877_v12, %v4375_v31  ;;  %v4356_v13 = vmul.f32 %v5863_v44, %v7839_v10 }
 0x82a   : > { %4412 = vst [vmem:[%s7885_s9 + $0x60] sm:$0xff] %v4396_v11  ;;  %v4377_v15 = vmul.f32 %v7871_v40, %v4356_v13 }
 0x82b   : > { %v5865_v18 = vpop.eup %5864 }
 0x82c   : > { %v4398_v30 = vadd.f32 %v7877_v12, %v4377_v15  ;;  %v4355_v4 = vmul.f32 %v5865_v18, %v7847_v50 }
 0x82e   : > { %4414 = vst [vmem:[%s7885_s9 + $0x70] sm:$0xff] %v4398_v30  ;;  %v4376_v45 = vmul.f32 %v7871_v40, %v4355_v4 }
 0x82f   : > { %v5867_v52 = vpop.eup %5866 }
 0x830   : > { %v4397_v63 = vadd.f32 %v7877_v12, %v4376_v45  ;;  %v4357_v3 = vmul.f32 %v5867_v52, %v7855_v16 }
 0x832   : > { %4413 = vst [vmem:[%s7885_s9 + $0x68] sm:$0xff] %v4397_v63  ;;  %v4378_v24 = vmul.f32 %v7871_v40, %v4357_v3 }
 0x834   : > { %v4399_v10 = vadd.f32 %v7877_v12, %v4378_v24 }
 0x836   : > { %4415 = vst [vmem:[%s7885_s9 + $0x78] sm:$0xff] %v4399_v10 }
 0x837 PF: > { %s16_s25 = sadd.s32 1, %s5917_s25   ;;  %s8028_s21 = smov %s5909_s23 }
 0x838   : > { %p13_p7 = scmp.ge.s32.totalorder %s16_s25, 6   ;;  %s8029_s22 = smov %s5913_s24 }
 0x839   : > { %s8030_s23 = smov %s8033_s26  ;;  %s8031_s24 = smov %s8037_s27 }
 0x83a   :  { %15 = sbr.rel (!%p13_p7) target bundleno = 3 (0x3), region = 85 }

</bundles_post_ra>
